<compile_context>
chip_gen: v5e
topology: v5e:2x2
jax: 0.10.0
libtpu: 0.0.40
codegen_flags: <defaults>
</compile_context>

<pallas_src>
import functools

import jax
import jax.numpy as jnp
from jax.experimental import pallas as pl
from jax.experimental.pallas import tpu as pltpu


# ----------------------------- in-kernel math ------------------------------ #

def _ln_xhat(x, eps=1e-5):
    # LayerNorm WITHOUT affine (the affine part is folded into the next matmul).
    # PyTorch nn.LayerNorm default eps = 1e-5, biased variance.
    mu = jnp.mean(x, axis=-1, keepdims=True)
    xc = x - mu
    var = jnp.mean(xc * xc, axis=-1, keepdims=True)
    return xc * jax.lax.rsqrt(var + eps)


def _gelu(x):
    # TODO(synk): PyTorch nn.GELU default is the exact erf-GELU; erf has no
    # guaranteed Mosaic lowering, so the tanh approximation is used
    # (max abs deviation ~1e-3 from erf-GELU).
    c = 0.7978845608028654  # sqrt(2/pi)
    return 0.5 * x * (1.0 + jnp.tanh(c * (x + 0.044715 * x * x * x)))


def _block_kernel(num_heads, head_dim,
                  x_ref,
                  wqkv, bqkv, wproj, bproj, wfc1, bfc1, wfc2, bfc2,
                  out_ref):
    x = x_ref[0].astype(jnp.float32)          # (N, C), residual kept in f32
    n_tok = x.shape[0]
    heads2 = 2 * num_heads                    # both branches fused -> 2H heads
    c2 = heads2 * head_dim                    # == 2C
    cdt = wqkv.dtype                          # MXU compute dtype (bf16 by default)

    def mm(a, w_ref, b_ref):
        w = w_ref[...]
        return (jnp.dot(a.astype(w.dtype), w, preferred_element_type=jnp.float32)
                + b_ref[...].astype(jnp.float32))

    # ---- attention pair:  x += g1*attn(norm1(x)) + g11*attn1(norm11(x)) ----
    # LN stats computed once; both branches' (LN- and scale-folded) qkv weights
    # are one (C, 6C) matmul.  DropPath / dropouts are identity at p=0.0.
    qkv = mm(_ln_xhat(x), wqkv, bqkv).astype(cdt)   # (N, 6C) = [q(2C)|k(2C)|v(2C)]

    def split_heads(col0):
        # TODO(synk): these (1,0,2) relayouts could go away once Mosaic supports
        # non-leading batch dims in dot_general; the batch-leading canonical
        # einsum form is kept here because it is guaranteed to lower.  Casting
        # to the compute dtype before the transpose halves the relayout bytes.
        blk = qkv[:, col0:col0 + c2]                           # (N, 2C)
        return jnp.transpose(blk.reshape(n_tok, heads2, head_dim), (1, 0, 2))

    q = split_heads(0)                        # (2H, N, hd); qk scale pre-folded
    k = split_heads(c2)
    v = split_heads(2 * c2)

    s = jnp.einsum('hnd,hmd->hnm', q, k,
                   preferred_element_type=jnp.float32)          # (2H, N, N) f32
    s = s - jnp.max(s, axis=-1, keepdims=True)
    p = jnp.exp(s)
    p = p * pl.reciprocal(jnp.sum(p, axis=-1, keepdims=True), approx=True)
    o = jnp.einsum('hnm,hmd->hnd', p.astype(cdt), v,
                   preferred_element_type=jnp.float32)           # (2H, N, hd)
    o = jnp.transpose(o.astype(cdt), (1, 0, 2)).reshape(n_tok, c2)  # (N, 2C)

    # gammas are folded into wproj/bproj, so this single matmul is
    # g1*proj0(o0) + g11*proj1(o1).
    x = x + mm(o, wproj, bproj)

    # ---- MLP pair:  x += g2*mlp(norm2(x)) + g21*mlp1(norm21(x)) ----
    # TODO(synk): on v6e/v7x the GELU could run in bf16; kept in f32 so the same
    # kernel stays correct/efficient on v5e (no bf16 VPU/EUP there).
    h = _gelu(mm(_ln_xhat(x), wfc1, bfc1))    # (N, 2*hidden), f32
    x = x + mm(h, wfc2, bfc2)                 # gammas folded into wfc2/bfc2

    # TODO(synk): for N >= ~512 add a flash-style query-tile loop around the
    # attention so the (2H, N, N) logits never exceed ~16 MB VMEM (v7x concern).

    out_ref[0] = x.astype(out_ref.dtype)


# --------------------------- host-side folding ------------------------------ #

FUSED_ORDER = ["wqkv", "bqkv", "wproj", "bproj", "wfc1", "bfc1", "wfc2", "bfc2"]


def fold_params(p, num_heads, dtype=jnp.bfloat16):
    """Fold LN affine, layer-scale gammas and the qk scale into fused matmul
    weights/biases.  All folding is done in f32; the single cast to `dtype`
    happens at the end."""
    C = p["n1w"].shape[0]
    q_scale = (C // num_heads) ** -0.5

    def ln_fold(ln_w, ln_b, w, s=1.0):
        # LN(x; w, b) @ W == xhat @ (diag(w) @ W) + (b @ W); optional scalar s.
        return (ln_w[:, None] * w) * s, (ln_b @ w) * s

    wq0, bq0 = ln_fold(p["n1w"], p["n1b"], p["qkv_w"][:, 0 * C:1 * C], q_scale)
    wk0, bk0 = ln_fold(p["n1w"], p["n1b"], p["qkv_w"][:, 1 * C:2 * C])
    wv0, bv0 = ln_fold(p["n1w"], p["n1b"], p["qkv_w"][:, 2 * C:3 * C])
    wq1, bq1 = ln_fold(p["n11w"], p["n11b"], p["qkv1_w"][:, 0 * C:1 * C], q_scale)
    wk1, bk1 = ln_fold(p["n11w"], p["n11b"], p["qkv1_w"][:, 1 * C:2 * C])
    wv1, bv1 = ln_fold(p["n11w"], p["n11b"], p["qkv1_w"][:, 2 * C:3 * C])
    # column order: [q branch0 | q branch1 | k branch0 | k branch1 | v b0 | v b1]
    wqkv = jnp.concatenate([wq0, wq1, wk0, wk1, wv0, wv1], axis=1)      # (C, 6C)
    bqkv = jnp.concatenate([bq0, bq1, bk0, bk1, bv0, bv1])[None, :]     # (1, 6C)

    # gamma_1 * (o0 @ Wp0 + bp0) + gamma_1_1 * (o1 @ Wp1 + bp1)
    #   == [o0|o1] @ [[Wp0*g1],[Wp1*g11]] + (bp0*g1 + bp1*g11)
    wproj = jnp.concatenate([p["proj_w"] * p["g1"][None, :],
                             p["proj1_w"] * p["g11"][None, :]], axis=0)  # (2C, C)
    bproj = (p["proj_b"] * p["g1"] + p["proj1_b"] * p["g11"])[None, :]

    w10, b10 = ln_fold(p["n2w"], p["n2b"], p["fc1_w"])
    w11, b11 = ln_fold(p["n21w"], p["n21b"], p["fc1b_w"])
    wfc1 = jnp.concatenate([w10, w11], axis=1)                    # (C, 2*hidden)
    bfc1 = jnp.concatenate([b10 + p["fc1_b"], b11 + p["fc1b_b"]])[None, :]

    wfc2 = jnp.concatenate([p["fc2_w"] * p["g2"][None, :],
                            p["fc2b_w"] * p["g21"][None, :]], axis=0)  # (2*hid, C)
    bfc2 = (p["fc2_b"] * p["g2"] + p["fc2b_b"] * p["g21"])[None, :]

    fused = dict(wqkv=wqkv, bqkv=bqkv, wproj=wproj, bproj=bproj,
                 wfc1=wfc1, bfc1=bfc1, wfc2=wfc2, bfc2=bfc2)
    return {k: v.astype(dtype) for k, v in fused.items()}


# ------------------------------- wrapper ------------------------------------ #

def _vmem_limit_bytes():
    # Generation-aware scoped-VMEM budget: leave headroom for Mosaic internal
    # scratch + the (1, N, C) x/out pipeline buffers.
    try:
        cap = int(pltpu.get_tpu_info().vmem_capacity_bytes)
    except Exception:
        return 64 * 1024 * 1024          # conservative fallback, fits all gens
    return max(32 * 1024 * 1024, cap - 12 * 1024 * 1024)


def _const_spec(shape):
    # Fused weights/biases: full-extent blocks, constant block index -> fetched
    # once and kept resident.  Buffered(1) disables the (useless) double buffer.
    idx = lambda b: (0,) * len(shape)
    try:
        return pl.BlockSpec(shape, idx, pipeline_mode=pl.Buffered(1))
    except TypeError:                    # older jax without pipeline_mode kwarg
        return pl.BlockSpec(shape, idx)


def layer_scale_block_paralx2(x, params, num_heads, *, weight_dtype=jnp.bfloat16):
    B, N, C = x.shape
    head_dim = C // num_heads

    fused = fold_params(params, num_heads, dtype=weight_dtype)
    args = [fused[k] for k in FUSED_ORDER]

    in_specs = [pl.BlockSpec((1, N, C), lambda b: (b, 0, 0))]
    in_specs += [_const_spec(a.shape) for a in args]

    kernel = functools.partial(_block_kernel, num_heads, head_dim)
    return pl.pallas_call(
        kernel,
        out_shape=jax.ShapeDtypeStruct((B, N, C), x.dtype),
        grid=(B,),
        in_specs=in_specs,
        out_specs=pl.BlockSpec((1, N, C), lambda b: (b, 0, 0)),
        compiler_params=pltpu.CompilerParams(
            dimension_semantics=("parallel",),
            vmem_limit_bytes=_vmem_limit_bytes()),
    )(x, *args)


# --------------------- deterministic parameter setup ----------------------- #

def make_params(key, dim, mlp_ratio=4.0, init_values=0.1):
    """Original (unfused) parameterization, mirroring the PyTorch module."""
    hidden = int(dim * mlp_ratio)
    ks = iter(jax.random.split(key, 24))

    def w(i, o):  # Linear weight already transposed to (in, out)
        return 0.02 * jax.random.normal(next(ks), (i, o), jnp.float32)

    def vec(n, s):
        return s * jax.random.normal(next(ks), (n,), jnp.float32)

    p = {}
    # norm1 / attn / gamma_1      (qkv_bias=False in the reference module)
    p["n1w"], p["n1b"] = 1.0 + vec(dim, 0.1), vec(dim, 0.05)
    p["qkv_w"] = w(dim, 3 * dim)
    p["proj_w"], p["proj_b"] = w(dim, dim), vec(dim, 0.01)
    p["g1"] = init_values * jnp.ones((dim,), jnp.float32)
    # norm11 / attn1 / gamma_1_1
    p["n11w"], p["n11b"] = 1.0 + vec(dim, 0.1), vec(dim, 0.05)
    p["qkv1_w"] = w(dim, 3 * dim)
    p["proj1_w"], p["proj1_b"] = w(dim, dim), vec(dim, 0.01)
    p["g11"] = init_values * jnp.ones((dim,), jnp.float32)
    # norm2 / mlp / gamma_2
    p["n2w"], p["n2b"] = 1.0 + vec(dim, 0.1), vec(dim, 0.05)
    p["fc1_w"], p["fc1_b"] = w(dim, hidden), vec(hidden, 0.01)
    p["fc2_w"], p["fc2_b"] = w(hidden, dim), vec(dim, 0.01)
    p["g2"] = init_values * jnp.ones((dim,), jnp.float32)
    # norm21 / mlp1 / gamma_2_1
    p["n21w"], p["n21b"] = 1.0 + vec(dim, 0.1), vec(dim, 0.05)
    p["fc1b_w"], p["fc1b_b"] = w(dim, hidden), vec(hidden, 0.01)
    p["fc2b_w"], p["fc2b_b"] = w(hidden, dim), vec(dim, 0.01)
    p["g21"] = init_values * jnp.ones((dim,), jnp.float32)
    return p


# ------------------------- pure-JAX reference ------------------------------ #

def ref_forward(x, p, num_heads):
    """Straightforward (unfused, f32) reference matching the PyTorch forward."""
    B, N, C = x.shape
    H, hd = num_heads, C // num_heads
    scale = hd ** -0.5

    def ln(z, w, b, eps=1e-5):
        mu = z.mean(-1, keepdims=True)
        zc = z - mu
        var = (zc * zc).mean(-1, keepdims=True)
        return zc * jax.lax.rsqrt(var + eps) * w + b

    def attn(xn, wqkv, wproj, bproj):
        qkv = (xn @ wqkv).reshape(B, N, 3, H, hd).transpose(2, 0, 3, 1, 4)
        q, k, v = qkv[0] * scale, qkv[1], qkv[2]            # (B, H, N, hd)
        s = jax.nn.softmax(q @ jnp.swapaxes(k, -1, -2), axis=-1)
        o = (s @ v).transpose(0, 2, 1, 3).reshape(B, N, C)
        return o @ wproj + bproj

    def mlp(xn, w1, b1, w2, b2):
        return _gelu(xn @ w1 + b1) @ w2 + b2

    a0 = attn(ln(x, p["n1w"], p["n1b"]), p["qkv_w"], p["proj_w"], p["proj_b"])
    a1 = attn(ln(x, p["n11w"], p["n11b"]), p["qkv1_w"], p["proj1_w"], p["proj1_b"])
    x = x + p["g1"] * a0 + p["g11"] * a1
    m0 = mlp(ln(x, p["n2w"], p["n2b"]),
             p["fc1_w"], p["fc1_b"], p["fc2_w"], p["fc2_b"])
    m1 = mlp(ln(x, p["n21w"], p["n21b"]),
             p["fc1b_w"], p["fc1b_b"], p["fc2b_w"], p["fc2b_b"])
    return x + p["g2"] * m0 + p["g21"] * m1


# --------------------------------- main ------------------------------------ #

if __name__ == "__main__":
    # Small demo shapes, (8,128)-aligned: C % 128 == 0, N % 8 == 0, B even.
    B, N, C = 2, 16, 128
    num_heads = 4                # per-branch head_dim = 32

    key = jax.random.PRNGKey(0)
    kx, kp = jax.random.split(key)
    x = jax.random.normal(kx, (B, N, C), jnp.float32)
    params = make_params(kp, C, init_values=0.1)

    ref = jax.block_until_ready(ref_forward(x, params, num_heads))

    # f32 weight path: tight check (only approx-reciprocal softmax + fold reassoc.)
    out_f32 = jax.block_until_ready(
        layer_scale_block_paralx2(x, params, num_heads, weight_dtype=jnp.float32))
    assert out_f32.shape == (B, N, C)
    err_f32 = float(jnp.max(jnp.abs(out_f32 - ref)))
    assert err_f32 < 1e-3, err_f32

    # Default bf16 MXU path: looser tolerance (bf16 weights + bf16 attn operands).
    out_bf16 = jax.block_until_ready(layer_scale_block_paralx2(x, params, num_heads))
    assert out_bf16.shape == (B, N, C)
    err_bf16 = float(jnp.max(jnp.abs(out_bf16 - ref)))
    assert err_bf16 < 2e-2, err_bf16

    print("KERNEL_OK")
</pallas_src>

<mosaic_0001>
module attributes {stable_mosaic.version = 11 : i64} {
  func.func @_block_kernel(%arg0: i32, %arg1: memref<1x16x128xf32, #tpu.memory_space<vmem>>, %arg2: memref<128x768xf32, #tpu.memory_space<vmem>>, %arg3: memref<1x768xf32, #tpu.memory_space<vmem>>, %arg4: memref<256x128xf32, #tpu.memory_space<vmem>>, %arg5: memref<1x128xf32, #tpu.memory_space<vmem>>, %arg6: memref<128x1024xf32, #tpu.memory_space<vmem>>, %arg7: memref<1x1024xf32, #tpu.memory_space<vmem>>, %arg8: memref<1024x128xf32, #tpu.memory_space<vmem>>, %arg9: memref<1x128xf32, #tpu.memory_space<vmem>>, %arg10: memref<1x16x128xf32, #tpu.memory_space<vmem>>) attributes {dimension_semantics = [#tpu.dimension_semantics<parallel>], iteration_bounds = array<i64: 2>, scalar_prefetch = 0 : i64, scratch_operands = 0 : i64, tpu.core_type = #tpu.core_type<tc>, window_params = [{transform_indices = @transform_0, window_bounds = array<i64: 1, 16, 128>}, {pipeline_mode = #tpu.pipeline_mode<synchronous>, transform_indices = @transform_1, window_bounds = array<i64: 128, 768>}, {pipeline_mode = #tpu.pipeline_mode<synchronous>, transform_indices = @transform_2, window_bounds = array<i64: 1, 768>}, {pipeline_mode = #tpu.pipeline_mode<synchronous>, transform_indices = @transform_3, window_bounds = array<i64: 256, 128>}, {pipeline_mode = #tpu.pipeline_mode<synchronous>, transform_indices = @transform_4, window_bounds = array<i64: 1, 128>}, {pipeline_mode = #tpu.pipeline_mode<synchronous>, transform_indices = @transform_5, window_bounds = array<i64: 128, 1024>}, {pipeline_mode = #tpu.pipeline_mode<synchronous>, transform_indices = @transform_6, window_bounds = array<i64: 1, 1024>}, {pipeline_mode = #tpu.pipeline_mode<synchronous>, transform_indices = @transform_7, window_bounds = array<i64: 1024, 128>}, {pipeline_mode = #tpu.pipeline_mode<synchronous>, transform_indices = @transform_8, window_bounds = array<i64: 1, 128>}, {transform_indices = @transform_9, window_bounds = array<i64: 1, 16, 128>}]} {
    %c0 = arith.constant 0 : index
    %c0_0 = arith.constant 0 : index
    %c0_1 = arith.constant 0 : index
    %0 = vector.load %arg1[%c0, %c0_0, %c0_1] : memref<1x16x128xf32, #tpu.memory_space<vmem>>, vector<1x16x128xf32>
    %1 = vector.shape_cast %0 : vector<1x16x128xf32> to vector<16x128xf32>
    %cst = arith.constant dense<0.000000e+00> : vector<16xf32>
    %2 = vector.multi_reduction <add>, %1, %cst [1] : vector<16x128xf32> to vector<16xf32>
    %3 = vector.shape_cast %2 : vector<16xf32> to vector<16x1xf32>
    %cst_2 = arith.constant 1.280000e+02 : f32
    %4 = vector.broadcast %cst_2 : f32 to vector<16x1xf32>
    %5 = arith.divf %3, %4 : vector<16x1xf32>
    %6 = vector.broadcast %5 : vector<16x1xf32> to vector<16x128xf32>
    %7 = arith.subf %1, %6 : vector<16x128xf32>
    %8 = arith.mulf %7, %7 : vector<16x128xf32>
    %cst_3 = arith.constant dense<0.000000e+00> : vector<16xf32>
    %9 = vector.multi_reduction <add>, %8, %cst_3 [1] : vector<16x128xf32> to vector<16xf32>
    %10 = vector.shape_cast %9 : vector<16xf32> to vector<16x1xf32>
    %cst_4 = arith.constant 1.280000e+02 : f32
    %11 = vector.broadcast %cst_4 : f32 to vector<16x1xf32>
    %12 = arith.divf %10, %11 : vector<16x1xf32>
    %cst_5 = arith.constant 9.99999974E-6 : f32
    %13 = vector.broadcast %cst_5 : f32 to vector<16x1xf32>
    %14 = arith.addf %12, %13 : vector<16x1xf32>
    %15 = math.rsqrt %14 : vector<16x1xf32>
    %16 = vector.broadcast %15 : vector<16x1xf32> to vector<16x128xf32>
    %17 = arith.mulf %7, %16 : vector<16x128xf32>
    %c0_6 = arith.constant 0 : index
    %c0_7 = arith.constant 0 : index
    %18 = vector.load %arg2[%c0_6, %c0_7] : memref<128x768xf32, #tpu.memory_space<vmem>>, vector<128x768xf32>
    %cst_8 = arith.constant dense<0.000000e+00> : vector<16x768xf32>
    %19 = tpu.matmul %17, %18, %cst_8 {dimension_numbers = #tpu.dot_dimension_numbers<[1], [0], [0], [1], [0, 0, 1, 1], [], []>} : vector<16x128xf32>, vector<128x768xf32>, vector<16x768xf32> -> vector<16x768xf32>
    %c0_9 = arith.constant 0 : index
    %c0_10 = arith.constant 0 : index
    %20 = vector.load %arg3[%c0_9, %c0_10] : memref<1x768xf32, #tpu.memory_space<vmem>>, vector<1x768xf32>
    %21 = vector.broadcast %20 : vector<1x768xf32> to vector<16x768xf32>
    %22 = arith.addf %19, %21 : vector<16x768xf32>
    %23 = vector.extract_strided_slice %22 {offsets = [0, 0], sizes = [16, 256], strides = [1, 1]} : vector<16x768xf32> to vector<16x256xf32>
    %24 = vector.shape_cast %23 : vector<16x256xf32> to vector<16x8x32xf32>
    %25 = tpu.transpose %24, [1, 0, 2] : vector<16x8x32xf32> -> vector<8x16x32xf32>
    %26 = vector.extract_strided_slice %22 {offsets = [0, 256], sizes = [16, 256], strides = [1, 1]} : vector<16x768xf32> to vector<16x256xf32>
    %27 = vector.shape_cast %26 : vector<16x256xf32> to vector<16x8x32xf32>
    %28 = tpu.transpose %27, [1, 0, 2] : vector<16x8x32xf32> -> vector<8x16x32xf32>
    %29 = vector.extract_strided_slice %22 {offsets = [0, 512], sizes = [16, 256], strides = [1, 1]} : vector<16x768xf32> to vector<16x256xf32>
    %30 = vector.shape_cast %29 : vector<16x256xf32> to vector<16x8x32xf32>
    %31 = tpu.transpose %30, [1, 0, 2] : vector<16x8x32xf32> -> vector<8x16x32xf32>
    "tpu.trace_start"() <{level = 10 : i32, message = "hnd,hmd->hnm"}> : () -> ()
    %cst_11 = arith.constant dense<0.000000e+00> : vector<8x16x16xf32>
    %32 = tpu.matmul %25, %28, %cst_11 {dimension_numbers = #tpu.dot_dimension_numbers<[2], [2], [1], [1], [0, 0, 0, 1, 1, 1], [0], [0]>} : vector<8x16x32xf32>, vector<8x16x32xf32>, vector<8x16x16xf32> -> vector<8x16x16xf32>
    "tpu.trace_stop"() : () -> ()
    %cst_12 = arith.constant dense<0xFF800000> : vector<8x16xf32>
    %33 = vector.multi_reduction <maximumf>, %32, %cst_12 [2] : vector<8x16x16xf32> to vector<8x16xf32>
    %34 = vector.shape_cast %33 : vector<8x16xf32> to vector<8x16x1xf32>
    %35 = vector.broadcast %34 : vector<8x16x1xf32> to vector<8x16x16xf32>
    %36 = arith.subf %32, %35 : vector<8x16x16xf32>
    %37 = math.exp %36 : vector<8x16x16xf32>
    %cst_13 = arith.constant dense<0.000000e+00> : vector<8x16xf32>
    %38 = vector.multi_reduction <add>, %37, %cst_13 [2] : vector<8x16x16xf32> to vector<8x16xf32>
    %39 = vector.shape_cast %38 : vector<8x16xf32> to vector<8x16x1xf32>
    %40 = tpu.reciprocal %39 {approx = true} : vector<8x16x1xf32> -> vector<8x16x1xf32>
    %41 = vector.broadcast %40 : vector<8x16x1xf32> to vector<8x16x16xf32>
    %42 = arith.mulf %37, %41 : vector<8x16x16xf32>
    "tpu.trace_start"() <{level = 10 : i32, message = "hnm,hmd->hnd"}> : () -> ()
    %cst_14 = arith.constant dense<0.000000e+00> : vector<8x16x32xf32>
    %43 = tpu.matmul %42, %31, %cst_14 {dimension_numbers = #tpu.dot_dimension_numbers<[2], [1], [1], [2], [0, 0, 0, 1, 1, 2], [0], [0]>} : vector<8x16x16xf32>, vector<8x16x32xf32>, vector<8x16x32xf32> -> vector<8x16x32xf32>
    "tpu.trace_stop"() : () -> ()
    %44 = tpu.transpose %43, [1, 0, 2] : vector<8x16x32xf32> -> vector<16x8x32xf32>
    %45 = vector.shape_cast %44 : vector<16x8x32xf32> to vector<16x256xf32>
    %c0_15 = arith.constant 0 : index
    %c0_16 = arith.constant 0 : index
    %46 = vector.load %arg4[%c0_15, %c0_16] : memref<256x128xf32, #tpu.memory_space<vmem>>, vector<256x128xf32>
    %cst_17 = arith.constant dense<0.000000e+00> : vector<16x128xf32>
    %47 = tpu.matmul %45, %46, %cst_17 {dimension_numbers = #tpu.dot_dimension_numbers<[1], [0], [0], [1], [0, 0, 1, 1], [], []>} : vector<16x256xf32>, vector<256x128xf32>, vector<16x128xf32> -> vector<16x128xf32>
    %c0_18 = arith.constant 0 : index
    %c0_19 = arith.constant 0 : index
    %48 = vector.load %arg5[%c0_18, %c0_19] : memref<1x128xf32, #tpu.memory_space<vmem>>, vector<1x128xf32>
    %49 = vector.broadcast %48 : vector<1x128xf32> to vector<16x128xf32>
    %50 = arith.addf %47, %49 : vector<16x128xf32>
    %51 = arith.addf %1, %50 : vector<16x128xf32>
    %cst_20 = arith.constant dense<0.000000e+00> : vector<16xf32>
    %52 = vector.multi_reduction <add>, %51, %cst_20 [1] : vector<16x128xf32> to vector<16xf32>
    %53 = vector.shape_cast %52 : vector<16xf32> to vector<16x1xf32>
    %cst_21 = arith.constant 1.280000e+02 : f32
    %54 = vector.broadcast %cst_21 : f32 to vector<16x1xf32>
    %55 = arith.divf %53, %54 : vector<16x1xf32>
    %56 = vector.broadcast %55 : vector<16x1xf32> to vector<16x128xf32>
    %57 = arith.subf %51, %56 : vector<16x128xf32>
    %58 = arith.mulf %57, %57 : vector<16x128xf32>
    %cst_22 = arith.constant dense<0.000000e+00> : vector<16xf32>
    %59 = vector.multi_reduction <add>, %58, %cst_22 [1] : vector<16x128xf32> to vector<16xf32>
    %60 = vector.shape_cast %59 : vector<16xf32> to vector<16x1xf32>
    %cst_23 = arith.constant 1.280000e+02 : f32
    %61 = vector.broadcast %cst_23 : f32 to vector<16x1xf32>
    %62 = arith.divf %60, %61 : vector<16x1xf32>
    %cst_24 = arith.constant 9.99999974E-6 : f32
    %63 = vector.broadcast %cst_24 : f32 to vector<16x1xf32>
    %64 = arith.addf %62, %63 : vector<16x1xf32>
    %65 = math.rsqrt %64 : vector<16x1xf32>
    %66 = vector.broadcast %65 : vector<16x1xf32> to vector<16x128xf32>
    %67 = arith.mulf %57, %66 : vector<16x128xf32>
    %c0_25 = arith.constant 0 : index
    %c0_26 = arith.constant 0 : index
    %68 = vector.load %arg6[%c0_25, %c0_26] : memref<128x1024xf32, #tpu.memory_space<vmem>>, vector<128x1024xf32>
    %cst_27 = arith.constant dense<0.000000e+00> : vector<16x1024xf32>
    %69 = tpu.matmul %67, %68, %cst_27 {dimension_numbers = #tpu.dot_dimension_numbers<[1], [0], [0], [1], [0, 0, 1, 1], [], []>} : vector<16x128xf32>, vector<128x1024xf32>, vector<16x1024xf32> -> vector<16x1024xf32>
    %c0_28 = arith.constant 0 : index
    %c0_29 = arith.constant 0 : index
    %70 = vector.load %arg7[%c0_28, %c0_29] : memref<1x1024xf32, #tpu.memory_space<vmem>>, vector<1x1024xf32>
    %71 = vector.broadcast %70 : vector<1x1024xf32> to vector<16x1024xf32>
    %72 = arith.addf %69, %71 : vector<16x1024xf32>
    %cst_30 = arith.constant 5.000000e-01 : f32
    %73 = vector.broadcast %cst_30 : f32 to vector<16x1024xf32>
    %74 = arith.mulf %73, %72 : vector<16x1024xf32>
    %cst_31 = arith.constant 4.471500e-02 : f32
    %75 = vector.broadcast %cst_31 : f32 to vector<16x1024xf32>
    %76 = arith.mulf %75, %72 : vector<16x1024xf32>
    %77 = arith.mulf %76, %72 : vector<16x1024xf32>
    %78 = arith.mulf %77, %72 : vector<16x1024xf32>
    %79 = arith.addf %72, %78 : vector<16x1024xf32>
    %cst_32 = arith.constant 0.797884583 : f32
    %80 = vector.broadcast %cst_32 : f32 to vector<16x1024xf32>
    %81 = arith.mulf %80, %79 : vector<16x1024xf32>
    %82 = math.tanh %81 : vector<16x1024xf32>
    %cst_33 = arith.constant 1.000000e+00 : f32
    %83 = vector.broadcast %cst_33 : f32 to vector<16x1024xf32>
    %84 = arith.addf %83, %82 : vector<16x1024xf32>
    %85 = arith.mulf %74, %84 : vector<16x1024xf32>
    %c0_34 = arith.constant 0 : index
    %c0_35 = arith.constant 0 : index
    %86 = vector.load %arg8[%c0_34, %c0_35] : memref<1024x128xf32, #tpu.memory_space<vmem>>, vector<1024x128xf32>
    %cst_36 = arith.constant dense<0.000000e+00> : vector<16x128xf32>
    %87 = tpu.matmul %85, %86, %cst_36 {dimension_numbers = #tpu.dot_dimension_numbers<[1], [0], [0], [1], [0, 0, 1, 1], [], []>} : vector<16x1024xf32>, vector<1024x128xf32>, vector<16x128xf32> -> vector<16x128xf32>
    %c0_37 = arith.constant 0 : index
    %c0_38 = arith.constant 0 : index
    %88 = vector.load %arg9[%c0_37, %c0_38] : memref<1x128xf32, #tpu.memory_space<vmem>>, vector<1x128xf32>
    %89 = vector.broadcast %88 : vector<1x128xf32> to vector<16x128xf32>
    %90 = arith.addf %87, %89 : vector<16x128xf32>
    %91 = arith.addf %51, %90 : vector<16x128xf32>
    %c0_39 = arith.constant 0 : index
    %c0_40 = arith.constant 0 : index
    %c0_41 = arith.constant 0 : index
    %92 = vector.load %arg10[%c0_39, %c0_40, %c0_41] : memref<1x16x128xf32, #tpu.memory_space<vmem>>, vector<1x16x128xf32>
    %93 = vector.shape_cast %92 : vector<1x16x128xf32> to vector<16x128xf32>
    %94 = vector.shape_cast %91 : vector<16x128xf32> to vector<1x16x128xf32>
    tpu.vector_store %arg10[%c0_39, %c0_40, %c0_41], %94 {strides = array<i32>} : memref<1x16x128xf32, #tpu.memory_space<vmem>>, vector<1x16x128xf32>,
    return
  }
  func.func @transform_0(%arg0: i32) -> (i32, i32, i32) {
    %c0_i32 = arith.constant 0 : i32
    %c0_i32_0 = arith.constant 0 : i32
    %c0_i32_1 = arith.constant 0 : i32
    return %arg0, %c0_i32, %c0_i32_0 : i32, i32, i32
  }
  func.func @transform_1(%arg0: i32) -> (i32, i32) {
    %c0_i32 = arith.constant 0 : i32
    %c0_i32_0 = arith.constant 0 : i32
    %c0_i32_1 = arith.constant 0 : i32
    return %c0_i32, %c0_i32_0 : i32, i32
  }
  func.func @transform_2(%arg0: i32) -> (i32, i32) {
    %c0_i32 = arith.constant 0 : i32
    %c0_i32_0 = arith.constant 0 : i32
    %c0_i32_1 = arith.constant 0 : i32
    return %c0_i32, %c0_i32_0 : i32, i32
  }
  func.func @transform_3(%arg0: i32) -> (i32, i32) {
    %c0_i32 = arith.constant 0 : i32
    %c0_i32_0 = arith.constant 0 : i32
    %c0_i32_1 = arith.constant 0 : i32
    return %c0_i32, %c0_i32_0 : i32, i32
  }
  func.func @transform_4(%arg0: i32) -> (i32, i32) {
    %c0_i32 = arith.constant 0 : i32
    %c0_i32_0 = arith.constant 0 : i32
    %c0_i32_1 = arith.constant 0 : i32
    return %c0_i32, %c0_i32_0 : i32, i32
  }
  func.func @transform_5(%arg0: i32) -> (i32, i32) {
    %c0_i32 = arith.constant 0 : i32
    %c0_i32_0 = arith.constant 0 : i32
    %c0_i32_1 = arith.constant 0 : i32
    return %c0_i32, %c0_i32_0 : i32, i32
  }
  func.func @transform_6(%arg0: i32) -> (i32, i32) {
    %c0_i32 = arith.constant 0 : i32
    %c0_i32_0 = arith.constant 0 : i32
    %c0_i32_1 = arith.constant 0 : i32
    return %c0_i32, %c0_i32_0 : i32, i32
  }
  func.func @transform_7(%arg0: i32) -> (i32, i32) {
    %c0_i32 = arith.constant 0 : i32
    %c0_i32_0 = arith.constant 0 : i32
    %c0_i32_1 = arith.constant 0 : i32
    return %c0_i32, %c0_i32_0 : i32, i32
  }
  func.func @transform_8(%arg0: i32) -> (i32, i32) {
    %c0_i32 = arith.constant 0 : i32
    %c0_i32_0 = arith.constant 0 : i32
    %c0_i32_1 = arith.constant 0 : i32
    return %c0_i32, %c0_i32_0 : i32, i32
  }
  func.func @transform_9(%arg0: i32) -> (i32, i32, i32) {
    %c0_i32 = arith.constant 0 : i32
    %c0_i32_0 = arith.constant 0 : i32
    %c0_i32_1 = arith.constant 0 : i32
    return %arg0, %c0_i32, %c0_i32_0 : i32, i32, i32
  }
}

</mosaic_0001>

<bundles_post_ra>
// kernel: tpu_custom_call.1
= control target key start
LH: loop header
LB: loop body
LE: loop exit
PB: predicated region body
PF: predicated region fallthrough
CT: control target
= control target key end

     0   :  { %s6953_s0 = inlined_call_operand.hbm [shape: f32[2,16,128], index: 0, kind: input, shape index: {}]   ;;  %s6954_s1 = inlined_call_operand.hbm [shape: f32[128,768], index: 1, kind: input, shape index: {}]   ;;  %s6955_s2 = inlined_call_operand.hbm [shape: f32[1,768], index: 2, kind: input, shape index: {}]   ;;  %s6956_s3 = inlined_call_operand.hbm [shape: f32[256,128], index: 3, kind: input, shape index: {}]   ;;  %s6957_s4 = inlined_call_operand.vmem [shape: f32[1,128], index: 4, kind: input, shape index: {}]   ;;  %s6958_s5 = inlined_call_operand.hbm [shape: f32[128,1024], index: 5, kind: input, shape index: {}]   ;;  %s6959_s6 = inlined_call_operand.hbm [shape: f32[1,1024], index: 6, kind: input, shape index: {}]   ;;  %s6960_s7 = inlined_call_operand.hbm [shape: f32[1024,128], index: 7, kind: input, shape index: {}]   ;;  %s6961_s8 = inlined_call_operand.vmem [shape: f32[1,128], index: 8, kind: input, shape index: {}]   ;;  %s6962_s9 = inlined_call_operand.hbm [shape: f32[2,16,128], index: 9, kind: output, shape index: {}]  }
   0x1   :  { %6965 = sst [smem:[#allocation20_spill]] %s6954_s1 }
   0x2   :  { %6966 = sst [smem:[#allocation21_spill]] %s6955_s2 }
   0x3   :  { %6967 = sst [smem:[#allocation22_spill]] %s6956_s3 }
   0x4   :  { %6968 = sst [smem:[#allocation23_spill]] %s6958_s5 }
   0x5   :  { %14 = vsyncpa [#allocation3], 0 }
   0x6   :  { %16 = vsyncpa [#allocation3 + $0x1], 0 }
   0x7   :  { %17 = vsyncpa [#allocation6], 0 }
   0x8   :  { %18 = vsyncpa [#allocation9], 0 }
   0x9   :  { %19 = vsyncpa [#allocation12], 0 }
   0xa   :  { %20 = vsyncpa [#allocation4], 0 }
   0xb   :  { %22 = vsyncpa [#allocation4 + $0x1], 0  ;;  %s5201_s30 = smov 0   ;;  %s5203_s10 = smov 0  }
   0xc   :  { %s5205_s11 = smov 0   ;;  %s5207_s12 = smov 0  }
   0xd LB: > { %s6969_s1 = sld [smem:[#allocation20_spill]]  ;;  %s5225_s16 = sadd.s32 4294967295, %s5129_s12   ;;  %s5129_s12 = sphi %s5207_s12, %s6996_s12   ;;  %s5125_s11 = sphi %s5205_s11, %s6995_s11   ;;  %s5121_s10 = sphi %s5203_s10, %s6994_s10   ;;  %s5117_s30 = sphi %s5201_s30, %s6993_s30  }
   0xe   : > { %p4475_p0 = scmp.ge.s32.totalorder %s5129_s12, 1  ;;  %p49_p1 = scmp.eq.s32.totalorder %s5225_s16, 0 }
   0xf   : > { %p253_p2 = scmp.lt.s32.totalorder %s5129_s12, 3  ;;  %s5131_s18 = smov [#allocation5]  }
  0x10   : > { %s266_s19 = sshll.u32 %s5131_s18, 4  ;;  %s6971_s3 = sld [smem:[#allocation22_spill]]  ;;  %s267_s19 = int_to_ptr.vmem [resolvable:$true] %s266_s19 }
  0x11   : > { %p5230_p3 = pnand %p4475_p0, %p253_p2  ;;  %s5132_s24 = smov [#allocation8]  }
  0x12   : > { %s292_s25 = sshll.u32 %s5132_s24, 4  ;;  %s5133_s26 = smov 768   ;;  %s293_s25 = int_to_ptr.vmem [resolvable:$true] %s292_s25 }
  0x13   : > { %s264_s15 = sshll.u32 %s6969_s1, 4  ;;  %p4578_p4 = pneg %p5230_p3  ;;  %s265_s15 = int_to_ptr.hbm [resolvable:$true] %s264_s15 }
  0x14   : > { %s5134_s27 = smov 48   ;;  %s6963_s28 = smov 128  }
  0x15   : > { %p5242_p6 = pnand %p4578_p4, %p49_p1  ;;  %s6964_s29 = smov 8  }
  0x16   : > { %s290_s22 = sshll.u32 %s6971_s3, 4  ;;  %s322_s18 = sshll.u32 %s6959_s6, 4  ;;  %s291_s22 = int_to_ptr.hbm [resolvable:$true] %s290_s22  ;;  %s323_s18 = int_to_ptr.hbm [resolvable:$true] %s322_s18 }
  0x17   : > { %4581 = dma.hbm_to_vmem [thread:$0]  (!%p5242_p6), %s265_s15, 12288, %s267_s19, [#allocation6], %s5133_s26, %s5133_s26, %s5134_s27  }
  0x18   : > { %4587 = dma.hbm_to_vmem [thread:$0]  (!%p5242_p6), %s291_s22, 4096, %s293_s25, [#allocation9], %s6963_s28, %s6963_s28, %s6964_s29  }
  0x19   : > { %s5137_s20 = smov [#allocation11]   ;;  %s6973_s2 = sld [smem:[#allocation21_spill]] }
  0x1a   : > { %s324_s21 = sshll.u32 %s5137_s20, 4  ;;  %s5138_s19 = smov [#allocation7]   ;;  %s325_s21 = int_to_ptr.vmem [resolvable:$true] %s324_s21 }
  0x1b   : > { %4593 = dma.hbm_to_vmem [thread:$0]  (!%p5242_p6), %s323_s18, 128, %s325_s21, [#allocation12]  }
  0x1c   : > { %s281_s26 = sshll.u32 %s5138_s19, 4  ;;  %s6974_s5 = sld [smem:[#allocation23_spill]]  ;;  %s282_s26 = int_to_ptr.vmem [resolvable:$true] %s281_s26 }
  0x1d   : > { %s5139_s1 = smov [#allocation10]   ;;  %s333_s20 = sshll.u32 %s6960_s7, 4  ;;  %s334_s20 = int_to_ptr.hbm [resolvable:$true] %s333_s20 }
  0x1e   : > { %s309_s13 = sshll.u32 %s5139_s1, 4  ;;  %s5140_s21 = smov 1024   ;;  %s310_s13 = int_to_ptr.vmem [resolvable:$true] %s309_s13 }
  0x1f   : > { %s279_s15 = sshll.u32 %s6973_s2, 4  ;;  %s5141_s24 = smov 64   ;;  %s280_s15 = int_to_ptr.hbm [resolvable:$true] %s279_s15 }
  0x20   : > { %4584 = dma.hbm_to_vmem [thread:$0]  (!%p5242_p6), %s280_s15, 96, %s282_s26, [#allocation6]  }
  0x21   : > { %s5142_s15 = smov [#allocation13]   ;;  %s4474_s26 = sadd.s32 4294967294, %s5129_s12  }
  0x22   : > { %s307_s25 = sshll.u32 %s6974_s5, 4  ;;  %s335_s19 = sshll.u32 %s5142_s15, 4  ;;  %s308_s25 = int_to_ptr.hbm [resolvable:$true] %s307_s25  ;;  %s336_s19 = int_to_ptr.vmem [resolvable:$true] %s335_s19 }
  0x23   : > { %4590 = dma.hbm_to_vmem [thread:$0]  (!%p5242_p6), %s308_s25, 16384, %s310_s13, [#allocation9], %s5140_s21, %s5140_s21, %s5141_s24  }
  0x24   : > { %4596 = dma.hbm_to_vmem [thread:$0]  (!%p5242_p6), %s334_s20, 16384, %s336_s19, [#allocation12], %s6963_s28, %s6963_s28, %s6964_s29  }
  0x25   : > { %s5278_s27 = sadd.s32 1, %s5129_s12   ;;  %s35_s25 = sadd.s32 1, %s5125_s11 }
  0x26   : > { %s32_s22 = ssub.s32 %s5129_s12, %s5278_s27  ;;  %p42_p8 = scmp.ne.s32.totalorder %s5125_s11, %s5121_s10 }
  0x27   : > { %p33_p7 = scmp.eq.s32.totalorder %s32_s22, 0  ;;  %p43_p9 = scmp.eq.s32.totalorder %s5129_s12, 0 }
  0x28   : > { %p48_p10 = scmp.ne.s32.totalorder %s5121_s10, %s5117_s30  ;;  %p240_p13 = scmp.eq.s32.totalorder %s5225_s16, 1 }
  0x29   : > { %s5289_s1 = scalar_select %p33_p7, %s5125_s11, %s35_s25  }
  0x2a   : > { %p5291_p11 = por %p43_p9, %p42_p8  ;;  %p5297_p12 = por %p49_p1, %p48_p10 }
  0x2b   : > { %p246_p0 = scmp.eq.s32.totalorder %s4474_s26, 1  ;;  %p4611_p2 = scmp.lt.s32.totalorder %s5129_s12, 2 }
  0x2c   : > { %s352_s14 = sand.u32 1, %s5125_s11   ;;  %p5304_p4 = por %p240_p13, %p42_p8 }
  0x2d   : > { %p5308_p6 = por %p246_p0, %p48_p10  ;;  %s4483_s21 = sshll.u32 %s352_s14, 4 }
  0x2e   : > { %s4548_s24 = sshll.u32 %s5129_s12, 4  ;;  %s356_s25 = scalar_lea.vmem [#allocation2], %s4483_s21 }
  0x2f   : > { %s361_s22 = scalar_lea.hbm %s6953_s0, %s4548_s24  ;;  %s364_s28 = sshll.u32 %s356_s25, 4  ;;  %s365_s28 = int_to_ptr.vmem [resolvable:$true] %s364_s28 }
  0x30   : > { %s362_s29 = sshll.u32 %s361_s22, 4  ;;  %p5318_p7 = pnand %p4611_p2, %p5291_p11  ;;  %s363_s29 = int_to_ptr.hbm [resolvable:$true] %s362_s29 }
  0x31   : > { %s353_s2 = scalar_lea.sflag [#allocation3], %s352_s14  ;;  %s5021_s3 = sshra.s32 %s363_s29, 4  ;;  %s5022_s3 = int_to_ptr.hbm [resolvable:$true] %s5021_s3 }
  0x32   : > { %s5023_s5 = scalar_lea.hbm %s5022_s3, 16  ;;  %p5025_p9 = pneg %p5318_p7 }
  0x33   : > { %p5024_p8 = scmp.ne.s32.totalorder %s5022_s3, %s5023_s5  ;;  %s5028_s15 = scalar_lea.hbm %s6953_s0, 32 }
  0x34   : > { %p5029_p11 = scmp.lt.s32.totalorder %s5022_s3, %s6953_s0  ;;  %p5030_p0 = scmp.lt.s32.totalorder %s5028_s15, %s5023_s5 }
  0x35   : > { %p5026_p10 = pnand %p5025_p9, %p5024_p8 }
  0x36   : > { %p5031_p2 = por %p5030_p0, %p5029_p11 }
  0x37   : > { %p5027_p13 = pneg %p5026_p10 }
  0x39   : > { %p5032_p5 = pnand %p5031_p2, %p5027_p13 }
  0x3b   : > { %5035 = shalt.err (!%p5032_p5)
}
  0x3c   : > { %s6980_s14 = smov 8   ;;  %s6981_s22 = smov 128  }
  0x3d   : > { %4600 = dma.hbm_to_vmem [thread:$0]  (!%p5318_p7), %s363_s29, 256, %s365_s28, %s353_s2, %s6981_s22, %s6981_s22, %s6980_s14  }
  0x3e   : > { %376 = sbr.rel (%p5230_p3) target bundleno = 2159 (0x86f), region = 56  ;;  %s5338_s25 = sand.u32 (!%p5230_p3), 1, %s5121_s10  }
  0x3f   : > { %s4487_s3 = sshll.u32 (!%p5230_p3), %s5338_s25, 4  ;;  %s379_s5 = scalar_lea.sflag (!%p5230_p3), [#allocation3], %s5338_s25 }
  0x40   : > { %s5344_s21 = scalar_lea.vmem (!%p5230_p3), [#allocation2], %s4487_s3 }
  0x43   : > { %5096 = dma.done.wait (%p5297_p12), %s379_s5, 256  }
  0x44   : > { %5098 = vsyncadd (%p5297_p12), %s379_s5, 4294967040 }
  0x45   : > { %5100 = dma.done.wait (%p49_p1), [#allocation6], 12384  }
  0x46   : > { %5102 = vsyncadd (%p49_p1), [#allocation6], 4294954912 }
  0x47   : > { %5104 = dma.done.wait (%p49_p1), [#allocation9], 20480  }
  0x48   : > { %5106 = vsyncadd (%p49_p1), [#allocation9], 4294946816 }
  0x49   : > { %5108 = dma.done.wait (%p49_p1), [#allocation12], 16512  }
  0x4a   : > { %5110 = vsyncadd (%p49_p1), [#allocation12], 4294950784  ;;  %v5363_v0 = vld [vmem:[%s5344_s21] sm:$0xff]  ;;  %v5367_v1 = vld [vmem:[%s5344_s21 + $0x8] sm:$0xff]  ;;  %v5143_v2 = vmov 128.0   ;;  %s5144_s2 = smov 64  }
  0x4b   : > { %450 = vadd.xlane.f32.xlu0 %v5363_v0  ;;  %4733 = vrcp.f32 %v5143_v2  ;;  %v587_v5 = vld [vmem:[#allocation5 + $0x2d0] sm:$0xff]  ;;  %v588_v6 = vld [vmem:[#allocation5 + $0x2d8] sm:$0xff]  ;;  %v581_v7 = vld [vmem:[#allocation5 + $0x2a0] sm:$0xff]  ;;  %s5145_s17 = smov 96   ;;  %s5146_s28 = smov 32   ;;  %vm786_vm7 = vcmask 1047556  }
  0x4c   : > { %607 = vmatpush.msra.mxu0 %v587_v5  ;;  %630 = vmatpush.msra.mxu1 %v588_v6  ;;  %v582_v8 = vld [vmem:[#allocation5 + $0x2a8] sm:$0xff]  ;;  %v575_v9 = vld [vmem:[#allocation5 + $0x270] sm:$0xff]  ;;  %v576_v10 = vld [vmem:[#allocation5 + $0x278] sm:$0xff]  ;;  %vm2210_vm8 = vcmask 261120   ;;  %vm2491_vm9 = vcmask 130048   ;;  %vm3398_vm10 = vcmask 523264  }
  0x4d   : > { %v569_v12 = vld [vmem:[#allocation5 + $0x240] sm:$0xff]  ;;  %v570_v13 = vld [vmem:[#allocation5 + $0x248] sm:$0xff]  ;;  %v563_v16 = vld [vmem:[#allocation5 + $0x210] sm:$0xff]  ;;  %vm3401_vm11 = vcmask 785408   ;;  %s4549_s15 = sshll.u32 %s5225_s16, 4  ;;  %s447_s19 = scalar_lea.vmem [#allocation14], %s4487_s3 }
  0x4e   : > { %608 = vmatpush.msra.mxu0 %v581_v7  ;;  %631 = vmatpush.msra.mxu1 %v582_v8  ;;  %v589_v14 = vld [vmem:[#allocation5 + $0x2e0] sm:$0xff]  ;;  %v590_v15 = vld [vmem:[#allocation5 + $0x2e8] sm:$0xff]  ;;  %v564_v17 = vld [vmem:[#allocation5 + $0x218] sm:$0xff]  ;;  %s4340_s22 = scalar_lea.hbm %s6962_s9, %s4549_s15  ;;  %s4341_s5 = sshll.u32 %s447_s19, 4  ;;  %s4342_s5 = int_to_ptr.vmem [resolvable:$true] %s4341_s5 }
  0x4f   : > { %653 = vmatpush.msra.mxu2 %v589_v14  ;;  %676 = vmatpush.msra.mxu3 %v590_v15  ;;  %v583_v18 = vld [vmem:[#allocation5 + $0x2b0] sm:$0xff]  ;;  %v557_v20 = vld [vmem:[#allocation5 + $0x1e0] sm:$0xff]  ;;  %v584_v21 = vld [vmem:[#allocation5 + $0x2b8] sm:$0xff]  ;;  %s4329_s16 = scalar_lea.sflag [#allocation4], %s5338_s25  ;;  %s5071_s29 = scalar_lea.hbm %s6962_s9, 32 }
  0x50   : > { %609 = vmatpush.msra.mxu0 %v575_v9  ;;  %632 = vmatpush.msra.mxu1 %v576_v10  ;;  %v558_v22 = vld [vmem:[#allocation5 + $0x1e8] sm:$0xff]  ;;  %v577_v23 = vld [vmem:[#allocation5 + $0x280] sm:$0xff]  ;;  %v571_v25 = vld [vmem:[#allocation5 + $0x250] sm:$0xff] }
  0x51   : > { %v4734_v3 = vpop.eup %4733  ;;  %654 = vmatpush.msra.mxu2 %v583_v18  ;;  %677 = vmatpush.msra.mxu3 %v584_v21  ;;  %v578_v24 = vld [vmem:[#allocation5 + $0x288] sm:$0xff]  ;;  %v572_v26 = vld [vmem:[#allocation5 + $0x258] sm:$0xff]  ;;  %v551_v27 = vld [vmem:[#allocation5 + $0x1b0] sm:$0xff] }
  0x52   : > { %v455_v4 = vmul.f32 128.0, %v4734_v3  ;;  %610 = vmatpush.msra.mxu0 %v569_v12  ;;  %633 = vmatpush.msra.mxu1 %v570_v13  ;;  %v552_v28 = vld [vmem:[#allocation5 + $0x1b8] sm:$0xff]  ;;  %vm459_vm0 = vweird.f32 %v4734_v3  ;;  %v545_v30 = vld [vmem:[#allocation5 + $0x180] sm:$0xff]  ;;  %v546_v31 = vld [vmem:[#allocation5 + $0x188] sm:$0xff] }
  0x53   : > { %452 = vadd.xlane.f32.xlu0 %v5367_v1  ;;  %655 = vmatpush.msra.mxu2 %v577_v23  ;;  %v539_v32 = vld [vmem:[#allocation5 + $0x150] sm:$0xff]  ;;  %v540_v33 = vld [vmem:[#allocation5 + $0x158] sm:$0xff]  ;;  %v533_v35 = vld [vmem:[#allocation5 + $0x120] sm:$0xff] }
  0x54   : > { %v456_v11 = vsub.f32 1.0, %v455_v4  ;;  %611 = vmatpush.msra.mxu0 %v563_v16  ;;  %634 = vmatpush.msra.mxu1 %v564_v17  ;;  %v534_v36 = vld [vmem:[#allocation5 + $0x128] sm:$0xff]  ;;  %v527_v39 = vld [vmem:[#allocation5 + $0xf0] sm:$0xff]  ;;  %v528_v40 = vld [vmem:[#allocation5 + $0xf8] sm:$0xff] }
  0x55   : > { %678 = vmatpush.msra.mxu3 %v578_v24  ;;  %656 = vmatpush.msra.mxu2 %v571_v25  ;;  %v521_v47 = vld [vmem:[#allocation5 + $0xc0] sm:$0xff]  ;;  %v522_v48 = vld [vmem:[#allocation5 + $0xc8] sm:$0xff]  ;;  %v515_v51 = vld [vmem:[#allocation5 + $0x90] sm:$0xff] }
  0x56   : > { %v457_v19 = vmul.f32 %v4734_v3, %v456_v11  ;;  %612 = vmatpush.msra.mxu0 %v557_v20  ;;  %635 = vmatpush.msra.mxu1 %v558_v22  ;;  %v565_v49 = vld [vmem:[#allocation5 + $0x220] sm:$0xff]  ;;  %v566_v50 = vld [vmem:[#allocation5 + $0x228] sm:$0xff]  ;;  %v516_v52 = vld [vmem:[#allocation5 + $0x98] sm:$0xff] }
  0x57   : > { %679 = vmatpush.msra.mxu3 %v572_v26  ;;  %657 = vmatpush.msra.mxu2 %v565_v49  ;;  %v559_v53 = vld [vmem:[#allocation5 + $0x1f0] sm:$0xff]  ;;  %v560_v54 = vld [vmem:[#allocation5 + $0x1f8] sm:$0xff]  ;;  %v509_v55 = vld [vmem:[#allocation5 + $0x60] sm:$0xff] }
  0x58   : > { %v458_v29 = vadd.f32 %v4734_v3, %v457_v19  ;;  %613 = vmatpush.msra.mxu0 %v551_v27  ;;  %636 = vmatpush.msra.mxu1 %v552_v28  ;;  %v510_v56 = vld [vmem:[#allocation5 + $0x68] sm:$0xff]  ;;  %v553_v57 = vld [vmem:[#allocation5 + $0x1c0] sm:$0xff]  ;;  %v503_v59 = vld [vmem:[#allocation5 + $0x30] sm:$0xff] }
  0x59   : > { %680 = vmatpush.msra.mxu3 %v566_v50  ;;  %658 = vmatpush.msra.mxu2 %v559_v53  ;;  %v554_v58 = vld [vmem:[#allocation5 + $0x1c8] sm:$0xff]  ;;  %v504_v60 = vld [vmem:[#allocation5 + $0x38] sm:$0xff]  ;;  %v547_v61 = vld [vmem:[#allocation5 + $0x190] sm:$0xff] }
  0x5a   : > { %v5370_v34 = vsel %vm459_vm0, %v4734_v3, %v458_v29  ;;  %614 = vmatpush.msra.mxu0 %v545_v30  ;;  %637 = vmatpush.msra.mxu1 %v546_v31  ;;  %v548_v62 = vld [vmem:[#allocation5 + $0x198] sm:$0xff]  ;;  %v497_v63 = vld [vmem:[#allocation5] sm:$0xff]  ;;  %v542_v2 = vld [vmem:[#allocation5 + $0x168] sm:$0xff] }
  0x5b   : > { %681 = vmatpush.msra.mxu3 %v560_v54  ;;  %659 = vmatpush.msra.mxu2 %v553_v57  ;;  %v591_v3 = vld [vmem:[#allocation5 + $0x2f0] sm:$0xff]  ;;  %v592_v4 = vld [vmem:[#allocation5 + $0x2f8] sm:$0xff]  ;;  %v585_v7 = vld [vmem:[#allocation5 + $0x2c0] sm:$0xff] }
  0x5c   : > { %615 = vmatpush.msra.mxu0 %v539_v32  ;;  %638 = vmatpush.msra.mxu1 %v540_v33  ;;  %v535_v5 = vld [vmem:[#allocation5 + $0x130] sm:$0xff]  ;;  %v536_v6 = vld [vmem:[#allocation5 + $0x138] sm:$0xff]  ;;  %v586_v8 = vld [vmem:[#allocation5 + $0x2c8] sm:$0xff] }
  0x5d   : > { %682 = vmatpush.msra.mxu3 %v554_v58  ;;  %660 = vmatpush.msra.mxu2 %v547_v61  ;;  %v529_v9 = vld [vmem:[#allocation5 + $0x100] sm:$0xff]  ;;  %v530_v10 = vld [vmem:[#allocation5 + $0x108] sm:$0xff]  ;;  %v579_v11 = vld [vmem:[#allocation5 + $0x290] sm:$0xff] }
  0x5e   : > { %616 = vmatpush.msra.mxu0 %v533_v35  ;;  %639 = vmatpush.msra.mxu1 %v534_v36  ;;  %v580_v12 = vld [vmem:[#allocation5 + $0x298] sm:$0xff]  ;;  %v523_v13 = vld [vmem:[#allocation5 + $0xd0] sm:$0xff]  ;;  %v573_v15 = vld [vmem:[#allocation5 + $0x260] sm:$0xff] }
  0x5f   : > { %683 = vmatpush.msra.mxu3 %v548_v62  ;;  %v524_v14 = vld [vmem:[#allocation5 + $0xd8] sm:$0xff]  ;;  %v574_v16 = vld [vmem:[#allocation5 + $0x268] sm:$0xff]  ;;  %v517_v17 = vld [vmem:[#allocation5 + $0xa0] sm:$0xff] }
  0x60   : > { %617 = vmatpush.msra.mxu0 %v527_v39  ;;  %640 = vmatpush.msra.mxu1 %v528_v40  ;;  %v518_v18 = vld [vmem:[#allocation5 + $0xa8] sm:$0xff]  ;;  %v567_v19 = vld [vmem:[#allocation5 + $0x230] sm:$0xff]  ;;  %v568_v20 = vld [vmem:[#allocation5 + $0x238] sm:$0xff] }
  0x61   : > { %684 = vmatpush.msra.mxu3 %v542_v2  ;;  %v511_v21 = vld [vmem:[#allocation5 + $0x70] sm:$0xff]  ;;  %v512_v22 = vld [vmem:[#allocation5 + $0x78] sm:$0xff]  ;;  %v561_v23 = vld [vmem:[#allocation5 + $0x200] sm:$0xff] }
  0x62   : > { %618 = vmatpush.msra.mxu0 %v521_v47  ;;  %641 = vmatpush.msra.mxu1 %v522_v48  ;;  %v562_v24 = vld [vmem:[#allocation5 + $0x208] sm:$0xff]  ;;  %v505_v25 = vld [vmem:[#allocation5 + $0x40] sm:$0xff]  ;;  %v555_v27 = vld [vmem:[#allocation5 + $0x1d0] sm:$0xff] }
  0x63   : > { %685 = vmatpush.msra.mxu3 %v536_v6  ;;  %v506_v26 = vld [vmem:[#allocation5 + $0x48] sm:$0xff]  ;;  %v556_v28 = vld [vmem:[#allocation5 + $0x1d8] sm:$0xff]  ;;  %v499_v29 = vld [vmem:[#allocation5 + $0x10] sm:$0xff] }
  0x64   : > { %619 = vmatpush.msra.mxu0 %v515_v51  ;;  %642 = vmatpush.msra.mxu1 %v516_v52  ;;  %v500_v30 = vld [vmem:[#allocation5 + $0x18] sm:$0xff]  ;;  %v549_v31 = vld [vmem:[#allocation5 + $0x1a0] sm:$0xff]  ;;  %v550_v32 = vld [vmem:[#allocation5 + $0x1a8] sm:$0xff] }
  0x65   : > { %686 = vmatpush.msra.mxu3 %v530_v10  ;;  %v543_v33 = vld [vmem:[#allocation5 + $0x170] sm:$0xff]  ;;  %v544_v35 = vld [vmem:[#allocation5 + $0x178] sm:$0xff]  ;;  %v537_v36 = vld [vmem:[#allocation5 + $0x140] sm:$0xff] }
  0x66   : > { %620 = vmatpush.msra.mxu0 %v509_v55  ;;  %643 = vmatpush.msra.mxu1 %v510_v56  ;;  %v532_v39 = vld [vmem:[#allocation5 + $0x118] sm:$0xff]  ;;  %v525_v40 = vld [vmem:[#allocation5 + $0xe0] sm:$0xff]  ;;  %v514_v50 = vld [vmem:[#allocation5 + $0x88] sm:$0xff] }
  0x67   : > { %687 = vmatpush.msra.mxu3 %v524_v14  ;;  %v520_v47 = vld [vmem:[#allocation5 + $0xb8] sm:$0xff]  ;;  %v513_v48 = vld [vmem:[#allocation5 + $0x80] sm:$0xff]  ;;  %v507_v51 = vld [vmem:[#allocation5 + $0x50] sm:$0xff] }
  0x68   : > { %621 = vmatpush.msra.mxu0 %v503_v59  ;;  %644 = vmatpush.msra.mxu1 %v504_v60  ;;  %v508_v52 = vld [vmem:[#allocation5 + $0x58] sm:$0xff]  ;;  %v501_v53 = vld [vmem:[#allocation5 + $0x20] sm:$0xff]  ;;  %v502_v54 = vld [vmem:[#allocation5 + $0x28] sm:$0xff] }
  0x69   : > { %688 = vmatpush.msra.mxu3 %v518_v18 }
  0x6a   : > { %622 = vmatpush.msra.mxu0 %v497_v63 }
  0x6b   : > { %689 = vmatpush.msra.mxu3 %v512_v22 }
  0x6c   : > { %699 = vmatpush.msrb.mxu0 %v591_v3 }
  0x6d   : > { %690 = vmatpush.msra.mxu3 %v506_v26 }
  0x6e   : > { %700 = vmatpush.msrb.mxu0 %v585_v7 }
  0x6f   : > { %691 = vmatpush.msra.mxu3 %v500_v30 }
  0x70   : > { %701 = vmatpush.msrb.mxu0 %v579_v11 }
  0x72   : > { %702 = vmatpush.msrb.mxu0 %v573_v15 }
  0x74   : > { %703 = vmatpush.msrb.mxu0 %v567_v19 }
  0x76   : > { %704 = vmatpush.msrb.mxu0 %v561_v23 }
  0x78   : > { %705 = vmatpush.msrb.mxu0 %v555_v27 }
  0x7a   : > { %706 = vmatpush.msrb.mxu0 %v549_v31 }
  0x7c   : > { %707 = vmatpush.msrb.mxu0 %v543_v33 }
  0x7e   : > { %708 = vmatpush.msrb.mxu0 %v537_v36 }
  0xbe   : > { %v451_v37 = vpop.xlane.xlu0 %450 }
  0xbf   : > { %v461_v38 = vmul.f32 %v5370_v34, %v451_v37  ;;  %v538_v37 = vld [vmem:[#allocation5 + $0x148] sm:$0xff] }
  0xc1   : > { %v5374_v41 = vsub.f32 %v5363_v0, %v461_v38  ;;  %v498_v0 = vld [vmem:[#allocation5 + $0x8] sm:$0xff]  ;;  %v531_v38 = vld [vmem:[#allocation5 + $0x110] sm:$0xff] }
  0xc2   : > { %645 = vmatpush.msra.mxu1 %v498_v0  ;;  %709 = vmatpush.msrb.mxu0 %v531_v38 }
  0xc3   : > { %v465_v42 = vmul.f32 %v5374_v41, %v5374_v41 }
  0xc4   : > { %722 = vmatpush.msrb.mxu1 %v592_v4  ;;  %710 = vmatpush.msrb.mxu0 %v525_v40 }
  0xc5   : > { %467 = vadd.xlane.f32.xlu1 %v465_v42  ;;  %v526_v42 = vld [vmem:[#allocation5 + $0xe8] sm:$0xff] }
  0xc6   : > { %v453_v43 = vpop.xlane.xlu0 %452  ;;  %723 = vmatpush.msrb.mxu1 %v586_v8 }
  0xc7   : > { %v462_v44 = vmul.f32 %v5370_v34, %v453_v43 }
  0xc8   : > { %724 = vmatpush.msrb.mxu1 %v580_v12 }
  0xc9   : > { %v5380_v45 = vsub.f32 %v5367_v1, %v462_v44  ;;  %v541_v1 = vld [vmem:[#allocation5 + $0x160] sm:$0xff] }
  0xca   : > { %661 = vmatpush.msra.mxu2 %v541_v1  ;;  %725 = vmatpush.msrb.mxu1 %v574_v16 }
  0xcb   : > { %v466_v46 = vmul.f32 %v5380_v45, %v5380_v45 }
  0xcc   : > { %662 = vmatpush.msra.mxu2 %v535_v5  ;;  %726 = vmatpush.msrb.mxu1 %v568_v20 }
  0xcd   : > { %469 = vadd.xlane.f32.xlu1 %v466_v46  ;;  %v519_v46 = vld [vmem:[#allocation5 + $0xb0] sm:$0xff] }
  0xce   : > { %663 = vmatpush.msra.mxu2 %v529_v9  ;;  %727 = vmatpush.msrb.mxu1 %v562_v24 }
  0xcf   : > { %711 = vmatpush.msrb.mxu0 %v519_v46 }
  0xd0   : > { %664 = vmatpush.msra.mxu2 %v523_v13  ;;  %728 = vmatpush.msrb.mxu1 %v556_v28 }
  0xd1   : > { %712 = vmatpush.msrb.mxu0 %v513_v48 }
  0xd2   : > { %665 = vmatpush.msra.mxu2 %v517_v17  ;;  %729 = vmatpush.msrb.mxu1 %v550_v32 }
  0xd3   : > { %713 = vmatpush.msrb.mxu0 %v507_v51 }
  0xd4   : > { %666 = vmatpush.msra.mxu2 %v511_v21  ;;  %730 = vmatpush.msrb.mxu1 %v544_v35 }
  0xd5   : > { %714 = vmatpush.msrb.mxu0 %v501_v53  ;;  %v5147_v53 = vmov 1983009808  }
  0xd6   : > { %667 = vmatpush.msra.mxu2 %v505_v25  ;;  %731 = vmatpush.msrb.mxu1 %v538_v37 }
  0xd8   : > { %668 = vmatpush.msra.mxu2 %v499_v29  ;;  %732 = vmatpush.msrb.mxu1 %v532_v39 }
  0xda   : > { %733 = vmatpush.msrb.mxu1 %v526_v42 }
  0xdc   : > { %734 = vmatpush.msrb.mxu1 %v520_v47 }
  0xde   : > { %735 = vmatpush.msrb.mxu1 %v514_v50 }
  0xe0   : > { %736 = vmatpush.msrb.mxu1 %v508_v52 }
  0xe2   : > { %737 = vmatpush.msrb.mxu1 %v502_v54  ;;  %v791_v54 = vunpack.c.l.s4 %v5147_v53 }
 0x138   : > { %v468_v43 = vpop.xlane.xlu1 %467 }
 0x139   : > { %v471_v44 = vmul.f32 %v468_v43, %v5370_v34 }
 0x13b   : > { %v473_v49 = vadd.f32 1e-05, %v471_v44 }
 0x13d   : > { %4735 = vrsqrt.f32 %v473_v49  ;;  %vm481_vm2 = vweird.f32 %v473_v49 }
 0x140   : > { %v470_v55 = vpop.xlane.xlu1 %469 }
 0x141   : > { %v472_v56 = vmul.f32 %v470_v55, %v5370_v34 }
 0x143   : > { %v4736_v57 = vpop.eup %4735  ;;  %v474_v58 = vadd.f32 1e-05, %v472_v56  ;;  %v5470_v56 = vunpack.c.0.s8 %v791_v54 }
 0x144   : > { %v476_v59 = vmul.f32 %v4736_v57, %v473_v49  ;;  %vm482_vm1 = vweird.f32 %v4736_v57 }
 0x145   : > { %4737 = vrsqrt.f32 %v474_v58  ;;  %vm483_vm3 = vmor %vm481_vm2, %vm482_vm1  ;;  %vm491_vm4 = vweird.f32 %v474_v58 }
 0x146   : > { %v477_v60 = vmul.f32 %v4736_v57, %v476_v59 }
 0x148   : > { %v478_v61 = vmul.f32 0.5, %v477_v60 }
 0x14a   : > { %v479_v62 = vsub.f32 1.5, %v478_v61 }
 0x14b   : > { %v4738_v63 = vpop.eup %4737 }
 0x14c   : > { %v480_v0 = vmul.f32 %v4736_v57, %v479_v62  ;;  %v486_v1 = vmul.f32 %v4738_v63, %v474_v58  ;;  %vm492_vm5 = vweird.f32 %v4738_v63 }
 0x14d   : > { %vm493_vm6 = vmor %vm491_vm4, %vm492_vm5 }
 0x14e   : > { %v484_v2 = vsel %vm483_vm3, %v4736_v57, %v480_v0  ;;  %v487_v3 = vmul.f32 %v4738_v63, %v486_v1  ;;  %v5148_v1 = vmov 1934713408  }
 0x14f   : > { %v495_v4 = vmul.f32 %v484_v2, %v5374_v41  ;;  %v593_v41 = vld [vmem:[#allocation7] sm:$0x3f]  ;;  %v839_v2 = vunpack.c.l.s4 %v5148_v1 }
 0x150   : > { %v488_v5 = vmul.f32 0.5, %v487_v3  ;;  %v595_v10 = vperm.slane %v593_v41, 0  ;;  %v596_v11 = vperm.slane %v593_v41, 1  ;;  %v597_v21 = vperm.slane %v593_v41, 2 }
 0x151   : > { %623 = vmatmul.f32.vlgmr.msra.gmra.mxu0 %v495_v4  ;;  %646 = vmatmul.f32.vlgmr.msra.gmra.mxu1 %v495_v4  ;;  %v599_v22 = vperm.slane %v593_v41, 4  ;;  %v600_v23 = vperm.slane %v593_v41, 5 }
 0x152   : > { %v489_v6 = vsub.f32 1.5, %v488_v5  ;;  %669 = vmatmul.f32.vlgmr.msra.gmra.mxu2 %v495_v4  ;;  %692 = vmatmul.f32.vlgmr.msra.gmra.mxu3 %v495_v4 }
 0x154   : > { %v490_v7 = vmul.f32 %v4738_v63, %v489_v6 }
 0x156   : > { %v494_v8 = vsel %vm493_vm6, %v4738_v63, %v490_v7 }
 0x157   : > { %v496_v9 = vmul.f32 %v494_v8, %v5380_v45  ;;  %v598_v45 = vperm.slane %v593_v41, 3 }
 0x159   : > { %626 = vmatmul.f32.gmra.mxu0 %v496_v9  ;;  %649 = vmatmul.f32.gmra.mxu1 %v496_v9 }
 0x15a   : > { %672 = vmatmul.f32.gmra.mxu2 %v496_v9  ;;  %695 = vmatmul.f32.gmra.mxu3 %v496_v9 }
 0x161   : > { %715 = vmatmul.f32.vlgmr.msrb.gmra.mxu0 %v495_v4  ;;  %738 = vmatmul.f32.vlgmr.msrb.gmra.mxu1 %v495_v4 }
 0x169   : > { %718 = vmatmul.f32.gmra.mxu0 %v496_v9  ;;  %741 = vmatmul.f32.gmra.mxu1 %v496_v9 }
 0x1ce   : > { %v624_v12 = vpop.f32.mrf.mxu0  ;;  %v647_v13 = vpop.f32.mrf.mxu1 }
 0x1cf   : > { %v5388_v14 = vadd.f32 %v624_v12, %v595_v10  ;;  %v5390_v15 = vadd.f32 %v647_v13, %v596_v11 }
 0x1d1   : > { %773 = vrot.lane.b32.xlu0 %v5390_v15, %s5144_s2  ;;  %747 = vrot.lane.b32.xlu2 %v5388_v14, %s5145_s17  ;;  %v788_v57 = vrot.slane %v5388_v14, 4  ;;  %v812_v5 = vrot.slane %v5390_v15, 4 }
 0x1d2   : > { %753 = vrot.lane.b32.xlu1 %v5388_v14, %s5144_s2 }
 0x1d5   : > { %v693_v16 = vpop.f32.mrf.mxu3  ;;  %v670_v20 = vpop.f32.mrf.mxu2 }
 0x1d6   : > { %v627_v17 = vpop.f32.mrf.mxu0  ;;  %v650_v18 = vpop.f32.mrf.mxu1  ;;  %v5398_v19 = vadd.f32 %v693_v16, %v598_v45  ;;  %v5406_v26 = vadd.f32 %v670_v20, %v597_v21  ;;  %v5489_v16 = vunpack.c.0.s8 %v839_v2 }
 0x1d7   : > { %v5428_v33 = vadd.f32 %v627_v17, %v595_v10  ;;  %v5436_v35 = vadd.f32 %v650_v18, %v596_v11 }
 0x1d8   : > { %v1276_v3 = vrot.slane %v5406_v26, 4  ;;  %v1300_v6 = vrot.slane %v5398_v19, 4 }
 0x1d9   : > { %1262 = vrot.lane.b32.xlu0 %v5398_v19, %s5144_s2  ;;  %759 = vrot.lane.b32.xlu2 %v5388_v14, %s5146_s28  ;;  %v900_v12 = vrot.slane %v5428_v33, 4  ;;  %v924_v13 = vrot.slane %v5436_v35, 4 }
 0x1da   : > { %767 = vrot.lane.b32.xlu1 %v5390_v15, %s5145_s17 }
 0x1dd   : > { %v673_v29 = vpop.f32.mrf.mxu2  ;;  %v696_v30 = vpop.f32.mrf.mxu3 }
 0x1de   : > { %v716_v24 = vpop.f32.mrf.mxu0  ;;  %v739_v25 = vpop.f32.mrf.mxu1  ;;  %v5418_v31 = vadd.f32 %v673_v29, %v597_v21  ;;  %v5420_v32 = vadd.f32 %v696_v30, %v598_v45 }
 0x1df   : > { %v5408_v27 = vadd.f32 %v716_v24, %v599_v22  ;;  %v5410_v28 = vadd.f32 %v739_v25, %v600_v23 }
 0x1e0   : > { %v1388_v20 = vrot.slane %v5418_v31, 4 }
 0x1e1   : > { %1268 = vrot.lane.b32.xlu0 %v5398_v19, %s5146_s28  ;;  %1236 = vrot.lane.b32.xlu2 %v5406_v26, %s5145_s17 }
 0x1e2   : > { %1256 = vrot.lane.b32.xlu1 %v5398_v19, %s5145_s17 }
 0x1e6   : > { %v719_v36 = vpop.f32.mrf.mxu0  ;;  %v742_v37 = vpop.f32.mrf.mxu1 }
 0x1e7   : > { %v5448_v38 = vadd.f32 %v719_v36, %v599_v22  ;;  %v5450_v39 = vadd.f32 %v742_v37, %v600_v23 }
 0x1e9   : > { %1242 = vrot.lane.b32.xlu2 %v5406_v26, %s5144_s2  ;;  %1250 = vrot.lane.b32.xlu0 %v5418_v31, %s5146_s28  ;;  %v5454_v40 = vpack.i.bf16 %v5448_v38, %v5450_v39 }
 0x1ea   : > { %1258 = vrot.lane.b32.xlu1 %v5420_v32, %s5145_s17 }
 0x1f1   : > { %1248 = vrot.lane.b32.xlu2 %v5406_v26, %s5146_s28  ;;  %1270 = vrot.lane.b32.xlu0 %v5420_v32, %s5146_s28 }
 0x1f2   : > { %749 = vrot.lane.b32.xlu1 %v5428_v33, %s5145_s17 }
 0x1f9   : > { %1238 = vrot.lane.b32.xlu2 %v5418_v31, %s5145_s17  ;;  %755 = vrot.lane.b32.xlu0 %v5428_v33, %s5144_s2 }
 0x1fa   : > { %769 = vrot.lane.b32.xlu1 %v5436_v35, %s5145_s17 }
 0x201   : > { %1244 = vrot.lane.b32.xlu2 %v5418_v31, %s5144_s2  ;;  %775 = vrot.lane.b32.xlu0 %v5436_v35, %s5144_s2 }
 0x209   : > { %1264 = vrot.lane.b32.xlu2 %v5420_v32, %s5144_s2  ;;  %4672 = vrot.lane.b32.xlu0 %v5454_v40, %s5145_s17 }
 0x211   : > { %779 = vrot.lane.b32.xlu2 %v5390_v15, %s5146_s28 }
 0x219   : > { %761 = vrot.lane.b32.xlu2 %v5428_v33, %s5146_s28 }
 0x221   : > { %781 = vrot.lane.b32.xlu2 %v5436_v35, %s5146_s28 }
 0x229   : > { %4677 = vrot.lane.b32.xlu2 %v5454_v40, %s5144_s2 }
 0x22b   : > { %v748_v42 = vpop.permute.xlu2 %747 }
 0x22c   : > { %v800_v43 = vrot.slane %v748_v42, 4 }
 0x233   : > { %v760_v44 = vpop.permute.xlu2 %759 }
 0x234   : > { %v798_v46 = vrot.slane %v760_v44, 4  ;;  %v801_v47 = vsel %vm786_vm7, %v760_v44, %v800_v43 }
 0x235   : > { %v809_v63 = vperm.slane %v801_v47, %v5470_v56 }
 0x236   : > { %v799_v48 = vsel %vm786_vm7, %v798_v46, %v748_v42 }
 0x237   : > { %v805_v7 = vperm.slane %v799_v48, %v5470_v56 }
 0x239   : > { %v834_v29 = vrot.slane %v805_v7, 4 }
 0x23b   : > { %v1237_v49 = vpop.permute.xlu2 %1236 }
 0x23c   : > { %v1288_v0 = vrot.slane %v1237_v49, 4 }
 0x243   : > { %v1243_v50 = vpop.permute.xlu2 %1242  ;;  %v774_v51 = vpop.permute.xlu0 %773 }
 0x244   : > { %v754_v52 = vpop.permute.xlu1 %753  ;;  %v1274_v10 = vrot.slane %v1243_v50, 4  ;;  %v810_v11 = vrot.slane %v774_v51, 4  ;;  %v1277_v45 = vsel %vm786_vm7, %v1243_v50, %v1276_v3  ;;  %v813_v22 = vsel %vm786_vm7, %v774_v51, %v812_v5 }
 0x245   : > { %v785_v55 = vrot.slane %v754_v52, 4  ;;  %v789_v61 = vsel %vm786_vm7, %v754_v52, %v788_v57  ;;  %v1285_v47 = vperm.slane %v1277_v45, %v5470_v56  ;;  %v5505_v50 = vperm.slane %v813_v22, %v5470_v56 }
 0x246   : > { %v797_v4 = vperm.slane %v789_v61, %v5470_v56  ;;  %v1275_v42 = vsel %vm786_vm7, %v1274_v10, %v5406_v26  ;;  %v811_v44 = vsel %vm786_vm7, %v810_v11, %v5390_v15 }
 0x247   : > { %v787_v62 = vsel %vm786_vm7, %v785_v55, %v5388_v14  ;;  %v846_v14 = vrot.slane %v809_v63, 4  ;;  %v1281_v15 = vperm.slane %v1275_v42, %v5470_v56  ;;  %v5518_v57 = vperm.slane %v811_v44, %v5470_v56 }
 0x248   : > { %v793_v8 = vperm.slane %v787_v62, %v5470_v56  ;;  %v848_v21 = vrot.slane %v797_v4, 4 }
 0x249   : > { %v847_v43 = vsel %vm786_vm7, %v846_v14, %v797_v4  ;;  %v1412_v4 = vrot.slane %v5420_v32, 4  ;;  %v860_v45 = vrot.slane %v5518_v57, 4 }
 0x24a   : > { %v836_v30 = vrot.slane %v793_v8, 4  ;;  %v835_v48 = vsel %vm786_vm7, %v834_v29, %v793_v8  ;;  %v5515_v55 = vperm.slane %v847_v43, %v5489_v16  ;;  %v1324_v8 = vrot.slane %v1281_v15, 4 }
 0x24b   : > { %v1249_v58 = vpop.permute.xlu2 %1248  ;;  %v1263_v59 = vpop.permute.xlu0 %1262 }
 0x24c   : > { %v5473_v60 = vpop.permute.xlu1 %767  ;;  %v1286_v9 = vrot.slane %v1249_v58, 4  ;;  %v1289_v41 = vsel %vm786_vm7, %v1249_v58, %v1288_v0  ;;  %v1298_v24 = vrot.slane %v1263_v59, 4  ;;  %v837_v54 = vsel %vm786_vm7, %v805_v7, %v836_v30 }
 0x24d   : > { %v1297_v23 = vperm.slane %v1289_v41, %v5470_v56  ;;  %v5521_v58 = vperm.slane %v835_v48, %v5489_v16  ;;  %v1301_v61 = vsel %vm786_vm7, %v1263_v59, %v1300_v6  ;;  %v5532_v5 = vperm.slane %v837_v54, %v5489_v16 }
 0x24e   : > { %v1287_v36 = vsel %vm786_vm7, %v1286_v9, %v1237_v49  ;;  %v849_v49 = vsel %vm786_vm7, %v809_v63, %v848_v21  ;;  %v1299_v53 = vsel %vm786_vm7, %v1298_v24, %v5398_v19  ;;  %v1336_v19 = vrot.slane %v1285_v47, 4 }
 0x24f   : > { %v1293_v52 = vperm.slane %v1287_v36, %v5470_v56  ;;  %v1334_v26 = vrot.slane %v1297_v23, 4  ;;  %v5527_v0 = vperm.slane %v849_v49, %v5489_v16  ;;  %v1305_v1 = vperm.slane %v1299_v53, %v5470_v56 }
 0x250   : > { %v872_v7 = vrot.slane %v5505_v50, 4  ;;  %v1337_v9 = vsel %vm786_vm7, %v1297_v23, %v1336_v19  ;;  %v1309_v41 = vperm.slane %v1301_v61, %v5470_v56  ;;  %v892_v14 = vrot.slane %v5515_v55, 4 }
 0x251   : > { %v1322_v59 = vrot.slane %v1293_v52, 4  ;;  %v1335_v6 = vsel %vm786_vm7, %v1334_v26, %v1285_v47  ;;  %v896_v21 = vrot.slane %v5527_v0, 4  ;;  %v1325_v22 = vsel %vm786_vm7, %v1293_v52, %v1324_v8 }
 0x252   : > { %v5545_v24 = vperm.slane %v1335_v6, %v5489_v16  ;;  %v888_v23 = vrot.slane %v5532_v5, 4  ;;  %v5550_v30 = vperm.slane %v1337_v9, %v5489_v16  ;;  %v824_v36 = vrot.slane %v5473_v60, 4 }
 0x253   : > { %v5491_v17 = vpop.permute.xlu2 %1238  ;;  %v1269_v18 = vpop.permute.xlu0 %1268  ;;  %v1323_v29 = vsel %vm786_vm7, %v1322_v59, %v1281_v15 }
 0x254   : > { %v1257_v25 = vpop.permute.xlu1 %1256  ;;  %v1310_v46 = vrot.slane %v1269_v18, 4  ;;  %v1400_v42 = vrot.slane %v5491_v17, 4  ;;  %v5560_v52 = vperm.slane %v1323_v29, %v5489_v16  ;;  %v1380_v26 = vrot.slane %v5545_v24, 4 }
 0x255   : > { %v1312_v37 = vrot.slane %v1257_v25, 4 }
 0x256   : > { %v1311_v62 = vsel %vm786_vm7, %v1310_v46, %v1257_v25  ;;  %v1348_v25 = vrot.slane %v1305_v1, 4  ;;  %v5556_v46 = vperm.slane %v1325_v22, %v5489_v16 }
 0x257   : > { %v1313_v51 = vsel %vm786_vm7, %v1269_v18, %v1312_v37  ;;  %v1317_v10 = vperm.slane %v1311_v62, %v5470_v56  ;;  %v1360_v37 = vrot.slane %v1309_v41, 4 }
 0x258   : > { %v1321_v63 = vperm.slane %v1313_v51, %v5470_v56 }
 0x259   : > { %v1349_v43 = vsel %vm786_vm7, %v1317_v10, %v1348_v25  ;;  %v1346_v47 = vrot.slane %v1317_v10, 4 }
 0x25a   : > { %v1358_v18 = vrot.slane %v1321_v63, 4  ;;  %v1361_v53 = vsel %vm786_vm7, %v1321_v63, %v1360_v37  ;;  %v5566_v61 = vperm.slane %v1349_v43, %v5489_v16 }
 0x25b   : > { %v1245_v2 = vpop.permute.xlu2 %1244  ;;  %v1251_v3 = vpop.permute.xlu0 %1250  ;;  %v1369_v10 = vperm.slane %v1361_v53, %v5489_v16 }
 0x25c   : > { %v1386_v44 = vrot.slane %v1245_v2, 4  ;;  %v1359_v48 = vsel %vm786_vm7, %v1358_v18, %v1309_v41  ;;  %v1259_v51 = vpop.permute.xlu1 %1258  ;;  %v1398_v49 = vrot.slane %v1251_v3, 4  ;;  %v1401_v15 = vsel %vm786_vm7, %v1251_v3, %v1400_v42 }
 0x25d   : > { %v1409_v62 = vperm.slane %v1401_v15, %v5470_v56  ;;  %v1365_v8 = vperm.slane %v1359_v48, %v5489_v16  ;;  %v1389_v63 = vsel %vm786_vm7, %v1245_v2, %v1388_v20  ;;  %v1424_v3 = vrot.slane %v1259_v51, 4 }
 0x25e   : > { %v1387_v9 = vsel %vm786_vm7, %v1386_v44, %v5418_v31  ;;  %v1347_v41 = vsel %vm786_vm7, %v1346_v47, %v1305_v1  ;;  %v1399_v18 = vsel %vm786_vm7, %v1398_v49, %v5491_v17  ;;  %v1376_v31 = vrot.slane %v5556_v46, 4 }
 0x25f   : > { %v1446_v22 = vrot.slane %v1409_v62, 4  ;;  %v1384_v20 = vrot.slane %v5550_v30, 4  ;;  %v1393_v1 = vperm.slane %v1387_v9, %v5470_v56  ;;  %v1397_v2 = vperm.slane %v1389_v63, %v5470_v56 }
 0x260   : > { %v1372_v42 = vrot.slane %v5560_v52, 4  ;;  %v5590_v17 = vperm.slane %v1347_v41, %v5489_v16  ;;  %v1405_v43 = vperm.slane %v1399_v18, %v5470_v56  ;;  %v1374_v44 = vrot.slane %v5566_v61, 4 }
 0x261   : > { %v1447_v47 = vsel %vm786_vm7, %v1446_v22, %v1397_v2  ;;  %v5602_v53 = vsel %vm786_vm7, %v5566_v61, %v1376_v31  ;;  %v1382_v15 = vrot.slane %v1369_v10, 4  ;;  %v1436_v9 = vrot.slane %v1393_v1, 4 }
 0x262   : > { %v1434_v41 = vrot.slane %v1405_v43, 4  ;;  %v1453_v18 = vperm.slane %v1447_v47, %v5489_v16 }
 0x263   : > { %v1265_v54 = vpop.permute.xlu2 %1264  ;;  %v1271_v6 = vpop.permute.xlu0 %1270 }
 0x264   : > { %v1410_v19 = vrot.slane %v1265_v54, 4  ;;  %v1413_v59 = vsel %vm786_vm7, %v1265_v54, %v1412_v4  ;;  %v1422_v29 = vrot.slane %v1271_v6, 4  ;;  %v1425_v37 = vsel %vm786_vm7, %v1271_v6, %v1424_v3 }
 0x265   : > { %v1421_v25 = vperm.slane %v1413_v59, %v5470_v56  ;;  %v1433_v49 = vperm.slane %v1425_v37, %v5470_v56  ;;  %v1378_v59 = vrot.slane %v1365_v8, 4  ;;  %v1448_v3 = vrot.slane %v1397_v2, 4 }
 0x266   : > { %v1411_v4 = vsel %vm786_vm7, %v1410_v19, %v5420_v32  ;;  %v5593_v32 = vsel %vm786_vm7, %v1365_v8, %v1380_v26  ;;  %v1423_v19 = vsel %vm786_vm7, %v1422_v29, %v1259_v51  ;;  %v1370_v51 = vrot.slane %v5590_v17, 4  ;;  %v5617_v29 = vpop.permute.xlu1 %749 }
 0x267   : > { %v1417_v48 = vperm.slane %v1411_v4, %v5470_v56  ;;  %v1472_v54 = vrot.slane %v1421_v25, 4  ;;  %v1536_v6 = vrot.slane %v5593_v32, 4  ;;  %v1470_v63 = vrot.slane %v1433_v49, 4 }
 0x268   : > { %v5608_v4 = vsel %vm786_vm7, %v1369_v10, %v1384_v20  ;;  %v1429_v31 = vperm.slane %v1423_v19, %v5470_v56  ;;  %v5615_v8 = vsel %vm786_vm7, %v1382_v15, %v5550_v30  ;;  %v5625_v20 = vsel %vm786_vm7, %v1378_v59, %v5545_v24 }
 0x269   : > { %v1460_v37 = vrot.slane %v1417_v48, 4  ;;  %v1471_v11 = vsel %vm786_vm7, %v1470_v63, %v1421_v25  ;;  %v1473_v2 = vsel %vm786_vm7, %v1433_v49, %v1472_v54  ;;  %v1437_v25 = vsel %vm786_vm7, %v1405_v43, %v1436_v9 }
 0x26a   : > { %v1477_v47 = vperm.slane %v1471_v11, %v5489_v16  ;;  %v1537_v15 = vsel %vm786_vm7, %v5608_v4, %v1536_v6  ;;  %v1435_v49 = vsel %vm786_vm7, %v1434_v41, %v1393_v1  ;;  %v1449_v54 = vsel %vm786_vm7, %v1409_v62, %v1448_v3 }
 0x26b   : > { %v780_v26 = vpop.permute.xlu2 %779  ;;  %v1492_v19 = vrot.slane %v1453_v18, 4  ;;  %v1481_v24 = vperm.slane %v1473_v2, %v5489_v16  ;;  %v1457_v62 = vperm.slane %v1449_v54, %v5489_v16  ;;  %v5649_v41 = vperm.slane %v1537_v15, %v5470_v56 }
 0x26c   : > { %v822_v22 = vrot.slane %v780_v26, 4  ;;  %v825_v10 = vsel %vm786_vm7, %v780_v26, %v824_v36  ;;  %v1458_v36 = vrot.slane %v1429_v31, 4  ;;  %v1461_v26 = vsel %vm786_vm7, %v1429_v31, %v1460_v37 }
 0x26d   : > { %v833_v43 = vperm.slane %v825_v10, %v5470_v56  ;;  %v1490_v9 = vrot.slane %v1477_v47, 4  ;;  %v5645_v63 = vsel %vm786_vm7, %v1477_v47, %v1492_v19  ;;  %v1469_v37 = vperm.slane %v1461_v26, %v5489_v16  ;;  %v756_v19 = vpop.permute.xlu0 %755 }
 0x26e   : > { %v823_v30 = vsel %vm786_vm7, %v822_v22, %v5473_v60  ;;  %v1445_v60 = vperm.slane %v1437_v25, %v5489_v16  ;;  %v5652_v22 = vperm.slane %v1435_v49, %v5489_v16  ;;  %v1459_v31 = vsel %vm786_vm7, %v1458_v36, %v1417_v48 }
 0x26f   : > { %v829_v6 = vperm.slane %v823_v30, %v5470_v56  ;;  %v1494_v2 = vrot.slane %v1481_v24, 4  ;;  %v870_v10 = vrot.slane %v833_v43, 4  ;;  %v5658_v25 = vsel %vm786_vm7, %v1370_v51, %v5560_v52 }
 0x270   : > { %v1488_v47 = vrot.slane %v1445_v60, 4  ;;  %v912_v30 = vrot.slane %v5617_v29, 4  ;;  %v1648_v54 = vrot.slane %v5645_v63, 4  ;;  %v1496_v3 = vrot.slane %v1457_v62, 4 }
 0x271   : > { %v858_v15 = vrot.slane %v829_v6, 4  ;;  %v1491_v49 = vsel %vm786_vm7, %v1490_v9, %v1453_v18  ;;  %v861_v48 = vsel %vm786_vm7, %v829_v6, %v860_v45  ;;  %v5670_v51 = vsel %vm786_vm7, %v5590_v17, %v1372_v42  ;;  %v5680_v9 = vpop.permute.xlu1 %769 }
 0x272   : > { %v1484_v36 = vrot.slane %v5652_v22, 4  ;;  %v1465_v26 = vperm.slane %v1459_v31, %v5489_v16  ;;  %v5675_v59 = vsel %vm786_vm7, %v1469_v37, %v1488_v47  ;;  %v873_v18 = vsel %vm786_vm7, %v833_v43, %v872_v7 }
 0x273   : > { %v1495_v45 = vsel %vm786_vm7, %v1494_v2, %v1457_v62  ;;  %v1497_v52 = vsel %vm786_vm7, %v1481_v24, %v1496_v3  ;;  %v871_v42 = vsel %vm786_vm7, %v870_v10, %v5505_v50  ;;  %v898_v17 = vrot.slane %v756_v19, 4  ;;  %v762_v6 = vpop.permute.xlu2 %761 }
 0x274   : > { %v1636_v1 = vrot.slane %v1491_v49, 4  ;;  %v1649_v31 = vsel %vm786_vm7, %v1497_v52, %v1648_v54  ;;  %v859_v47 = vsel %vm786_vm7, %v858_v15, %v5518_v57  ;;  %v869_v11 = vperm.slane %v861_v48, %v5489_v16 }
 0x275   : > { %v1486_v7 = vrot.slane %v1469_v37, 4  ;;  %v881_v43 = vperm.slane %v873_v18, %v5489_v16  ;;  %v936_v62 = vrot.slane %v5680_v9, 4  ;;  %v5696_v50 = vsel %vm786_vm7, %v1374_v44, %v5556_v46 }
 0x276   : > { %v1482_v24 = vrot.slane %v1465_v26, 4  ;;  %v1622_v3 = vrot.slane %v5675_v59, 4  ;;  %v877_v2 = vperm.slane %v871_v42, %v5489_v16  ;;  %v910_v10 = vrot.slane %v762_v6, 4 }
 0x277   : > { %v1634_v57 = vrot.slane %v1495_v45, 4  ;;  %v1646_v54 = vrot.slane %v1497_v52, 4  ;;  %v5701_v37 = vperm.slane %v1649_v31, %v5470_v56  ;;  %v5704_v15 = vperm.slane %v859_v47, %v5489_v16 }
 0x278   : > { %v5707_v48 = vsel %vm786_vm7, %v1495_v45, %v1636_v1  ;;  %v886_v61 = vrot.slane %v869_v11, 4  ;;  %v5712_v46 = vsel %vm786_vm7, %v869_v11, %v888_v23  ;;  %v899_v44 = vsel %vm786_vm7, %v898_v17, %v5428_v33 }
 0x279   : > { %v894_v18 = vrot.slane %v881_v43, 4  ;;  %v901_v52 = vsel %vm786_vm7, %v756_v19, %v900_v12  ;;  %v913_v42 = vsel %vm786_vm7, %v762_v6, %v912_v30  ;;  %v5721_v31 = vsel %vm786_vm7, %v1486_v7, %v1445_v60  ;;  %v776_v12 = vpop.permute.xlu0 %775 }
 0x27a   : > { %v890_v1 = vrot.slane %v877_v2, 4  ;;  %v5726_v45 = vsel %vm786_vm7, %v877_v2, %v892_v14  ;;  %v5731_v23 = vsel %vm786_vm7, %v881_v43, %v896_v21  ;;  %v911_v33 = vsel %vm786_vm7, %v910_v10, %v5617_v29 }
 0x27b   : > { %v882_v11 = vrot.slane %v5704_v15, 4  ;;  %v1022_v60 = vrot.slane %v5712_v46, 4  ;;  %v905_v30 = vperm.slane %v899_v44, %v5470_v56  ;;  %v1610_v19 = vrot.slane %v5721_v31, 4 }
 0x27c   : > { %v909_v14 = vperm.slane %v901_v52, %v5470_v56  ;;  %v921_v17 = vperm.slane %v913_v42, %v5470_v56  ;;  %v5743_v21 = vsel %vm786_vm7, %v1482_v24, %v5652_v22  ;;  %v5746_v6 = vsel %vm786_vm7, %v1465_v26, %v1484_v36 }
 0x27d   : > { %v917_v29 = vperm.slane %v911_v33, %v5470_v56  ;;  %v922_v47 = vrot.slane %v776_v12, 4  ;;  %v1611_v7 = vsel %vm786_vm7, %v1610_v19, %v5743_v21  ;;  %v1623_v43 = vsel %vm786_vm7, %v1622_v3, %v5746_v6 }
 0x27e   : > { %v5755_v2 = vsel %vm786_vm7, %v886_v61, %v5532_v5  ;;  %v5759_v22 = vsel %vm786_vm7, %v894_v18, %v5527_v0  ;;  %v5762_v36 = vperm.slane %v1611_v7, %v5470_v56  ;;  %v5765_v26 = vperm.slane %v1623_v43, %v5470_v56  ;;  %v782_v61 = vpop.permute.xlu2 %781 }
 0x27f   : > { %v1046_v24 = vrot.slane %v5731_v23, 4  ;;  %v925_v3 = vsel %vm786_vm7, %v776_v12, %v924_v13  ;;  %v1635_v10 = vsel %vm786_vm7, %v1634_v57, %v1491_v49  ;;  %v1647_v5 = vsel %vm786_vm7, %v1646_v54, %v5645_v63 }
 0x280   : > { %v958_v0 = vrot.slane %v921_v17, 4  ;;  %v1641_v44 = vperm.slane %v1635_v10, %v5470_v56  ;;  %v1653_v18 = vperm.slane %v1647_v5, %v5470_v56  ;;  %v1658_v52 = vrot.slane %v5765_v26, 4 }
 0x281   : > { %v948_v42 = vrot.slane %v905_v30, 4  ;;  %v960_v33 = vrot.slane %v909_v14, 4  ;;  %v946_v19 = vrot.slane %v917_v29, 4  ;;  %v923_v7 = vsel %vm786_vm7, %v922_v47, %v5436_v35 }
 0x282   : > { %v1659_v13 = vsel %vm786_vm7, %v1658_v52, %v5762_v36  ;;  %v1682_v49 = vrot.slane %v1653_v18, 4  ;;  %v934_v57 = vrot.slane %v782_v61, 4  ;;  %v937_v63 = vsel %vm786_vm7, %v782_v61, %v936_v62 }
 0x283   : > { %v949_v54 = vsel %vm786_vm7, %v917_v29, %v948_v42  ;;  %v961_v12 = vsel %vm786_vm7, %v921_v17, %v960_v33  ;;  %v933_v43 = vperm.slane %v925_v3, %v5470_v56  ;;  %v1665_v10 = vperm.slane %v1659_v13, %v5489_v16 }
 0x284   : > { %v5788_v5 = vsel %vm786_vm7, %v890_v1, %v5515_v55  ;;  %v959_v35 = vsel %vm786_vm7, %v958_v0, %v909_v14  ;;  %v5792_v47 = vperm.slane %v923_v7, %v5470_v56  ;;  %v1683_v52 = vsel %vm786_vm7, %v1682_v49, %v1641_v44 }
 0x285   : > { %v947_v62 = vsel %vm786_vm7, %v946_v19, %v905_v30  ;;  %v1689_v29 = vperm.slane %v1683_v52, %v5489_v16  ;;  %v945_v17 = vperm.slane %v937_v63, %v5470_v56  ;;  %v1708_v3 = vrot.slane %v1665_v10, 4 }
 0x286   : > { %v5799_v61 = vperm.slane %v949_v54, %v5489_v16  ;;  %v5802_v55 = vperm.slane %v961_v12, %v5489_v16  ;;  %v935_v1 = vsel %vm786_vm7, %v934_v57, %v5680_v9  ;;  %v1498_v14 = vrot.slane %v5696_v50, 4 }
 0x287   : > { %v5808_v0 = vperm.slane %v959_v35, %v5489_v16  ;;  %v984_v30 = vrot.slane %v933_v43, 4  ;;  %v1706_v42 = vrot.slane %v1689_v29, 4  ;;  %v1034_v33 = vrot.slane %v5759_v22, 4 }
 0x288   : > { %v1047_v19 = vsel %vm786_vm7, %v1046_v24, %v5726_v45  ;;  %v5814_v7 = vperm.slane %v947_v62, %v5489_v16  ;;  %v1709_v13 = vsel %vm786_vm7, %v1689_v29, %v1708_v3  ;;  %v972_v9 = vrot.slane %v5792_v47, 4 }
 0x289   : > { %v1707_v49 = vsel %vm786_vm7, %v1706_v42, %v1665_v10  ;;  %v941_v57 = vperm.slane %v935_v1, %v5470_v56  ;;  %v985_v63 = vsel %vm786_vm7, %v945_v17, %v984_v30  ;;  %4499 = vmatpush.xpose.msk.msrb.mxu3 %vm2210_vm8, %v1709_v13  ;;  %v1008_v54 = vrot.slane %v5802_v55, 4 }
 0x28a   : > { %v1660_v12 = vrot.slane %v5762_v36, 4  ;;  %v1684_v24 = vrot.slane %v1641_v44, 4  ;;  %4495 = vmatpush.xpose.msk.msrb.mxu2 %vm2210_vm8, %v1707_v49  ;;  %v1499_v35 = vsel %vm786_vm7, %v1498_v14, %v5658_v25  ;;  %v1000_v52 = vrot.slane %v5799_v61, 4 }
 0x28b   : > { %v982_v29 = vrot.slane %v945_v17, 4  ;;  %v5833_v30 = vperm.slane %v985_v63, %v5489_v16  ;;  %v6982_v36 = vrot.slane %v5602_v53, 4  ;;  %v970_v14 = vrot.slane %v941_v57, 4 }
 0x28c   : > { %v5840_v42 = vperm.slane %v1499_v35, %v5470_v56  ;;  %v6983_v17 = vrot.slane %v5615_v8, 4  ;;  %v973_v3 = vsel %vm786_vm7, %v941_v57, %v972_v9  ;;  %v6984_v63 = vrot.slane %v5608_v4, 4 }
 0x28d   : > { %v1511_v44 = vsel %vm786_vm7, %v6982_v36, %v5670_v51  ;;  %v1661_v36 = vsel %vm786_vm7, %v5765_v26, %v1660_v12  ;;  %v1685_v35 = vsel %vm786_vm7, %v1653_v18, %v1684_v24  ;;  %v983_v62 = vsel %vm786_vm7, %v982_v29, %v933_v43 }
 0x28e   : > { %v1517_v13 = vperm.slane %v1511_v44, %v5470_v56  ;;  %v1523_v49 = vsel %vm786_vm7, %v6983_v17, %v5625_v20  ;;  %v1535_v1 = vsel %vm786_vm7, %v6984_v63, %v5593_v32  ;;  %v1669_v9 = vperm.slane %v1661_v36, %v5489_v16 }
 0x28f   : > { %v5857_v44 = vperm.slane %v1523_v49, %v5470_v56  ;;  %v1541_v10 = vperm.slane %v1535_v1, %v5470_v56  ;;  %v5865_v32 = vsel %vm786_vm7, %v882_v11, %v5521_v58  ;;  %v6985_v4 = vrot.slane %v5521_v58, 4 }
 0x290   : > { %v1546_v17 = vrot.slane %v1517_v13, 4  ;;  %v1010_v18 = vrot.slane %v5755_v2, 4  ;;  %v1693_v12 = vperm.slane %v1685_v35, %v5489_v16  ;;  %v1035_v24 = vsel %vm786_vm7, %v1034_v33, %v5788_v5 }
 0x291   : > { %v5871_v26 = vsel %vm786_vm7, %v5704_v15, %v6985_v4  ;;  %v1570_v57 = vrot.slane %v1541_v10, 4  ;;  %v5888_v1 = vperm.slane %v973_v3, %v5489_v16  ;;  %v971_v3 = vsel %vm786_vm7, %v970_v14, %v5792_v47 }
 0x292   : > { %v1547_v43 = vsel %vm786_vm7, %v1546_v17, %v5840_v42  ;;  %v1011_v58 = vsel %vm786_vm7, %v1010_v18, %v5865_v32  ;;  %v1023_v15 = vsel %vm786_vm7, %v1022_v60, %v5871_v26  ;;  %v5900_v17 = vperm.slane %v1035_v24, %v5470_v56 }
 0x293   : > { %v1553_v29 = vperm.slane %v1547_v43, %v5489_v16  ;;  %v1571_v49 = vsel %vm786_vm7, %v1570_v57, %v5857_v44  ;;  %v5893_v33 = vperm.slane %v1011_v58, %v5470_v56  ;;  %v5896_v63 = vperm.slane %v1023_v15, %v5470_v56 }
 0x294   : > { %v1577_v36 = vperm.slane %v1571_v49, %v5489_v16  ;;  %v5903_v60 = vperm.slane %v1047_v19, %v5470_v56  ;;  %v1710_v4 = vrot.slane %v1693_v12, 4  ;;  %v1712_v43 = vrot.slane %v1669_v9, 4 }
 0x295   : > { %v1596_v35 = vrot.slane %v1553_v29, 4  ;;  %v1058_v18 = vrot.slane %v5896_v63, 4  ;;  %v989_v57 = vperm.slane %v983_v62, %v5489_v16  ;;  %v1006_v24 = vrot.slane %v5833_v30, 4 }
 0x296   : > { %v1594_v58 = vrot.slane %v1577_v36, 4  ;;  %v1082_v49 = vrot.slane %v5903_v60, 4  ;;  %v5914_v19 = vsel %vm786_vm7, %v5833_v30, %v1008_v54  ;;  %v1713_v14 = vsel %vm786_vm7, %v1693_v12, %v1712_v43 }
 0x297   : > { %v1597_v15 = vsel %vm786_vm7, %v1577_v36, %v1596_v35  ;;  %v1059_v47 = vsel %vm786_vm7, %v1058_v18, %v5893_v33  ;;  %v977_v62 = vperm.slane %v971_v3, %v5489_v16  ;;  %v5928_v54 = vsel %vm786_vm7, %v5888_v1, %v1000_v52 }
 0x298   : > { %4500 = vmatpush.xpose.msk.msrb.mxu3 %vm2210_vm8, %v1597_v15  ;;  %v1595_v11 = vsel %vm786_vm7, %v1594_v58, %v1553_v29  ;;  %v1065_v36 = vperm.slane %v1059_v47, %v5489_v16  ;;  %v1083_v35 = vsel %vm786_vm7, %v1082_v49, %v5900_v17  ;;  %v1711_v30 = vsel %vm786_vm7, %v1710_v4, %v1669_v9 }
 0x299   : > { %4496 = vmatpush.xpose.msk.msrb.mxu2 %vm2210_vm8, %v1595_v11  ;;  %v1089_v12 = vperm.slane %v1083_v35, %v5489_v16  ;;  %v1548_v3 = vrot.slane %v5840_v42, 4  ;;  %v998_v29 = vrot.slane %v5888_v1, 4  ;;  %v1002_v18 = vrot.slane %v989_v57, 4 }
 0x29a   : > { %v1108_v43 = vrot.slane %v1065_v36, 4  ;;  %v1572_v58 = vrot.slane %v5857_v44, 4  ;;  %v6986_v15 = vrot.slane %v5808_v0, 4  ;;  %v5944_v9 = vsel %vm786_vm7, %v1006_v24, %v5802_v55 }
 0x29b   : > { %v1106_v11 = vrot.slane %v1089_v12, 4  ;;  %v1549_v42 = vsel %vm786_vm7, %v1517_v13, %v1548_v3  ;;  %v994_v4 = vrot.slane %v977_v62, 4  ;;  %v1134_v1 = vrot.slane %v5928_v54, 4 }
 0x29c   : > { %4507 = vmatpush.xpose.msk.msra.mxu3 %vm2210_vm8, %v1713_v14  ;;  %v5940_v52 = vsel %vm786_vm7, %v989_v57, %v6986_v15  ;;  %v1109_v49 = vsel %vm786_vm7, %v1089_v12, %v1108_v43  ;;  %v1557_v47 = vperm.slane %v1549_v42, %v5489_v16  ;;  %v1512_v44 = vrot.slane %v5670_v51, 4 }
 0x29d   : > { %4503 = vmatpush.xpose.msk.msra.mxu2 %vm2210_vm8, %v1711_v30  ;;  %v1107_v14 = vsel %vm786_vm7, %v1106_v11, %v1065_v36  ;;  %4501 = vmatmul.msk.f32.vlgmr.msrb.gmra.mxu3 %vm2210_vm8, %v1109_v49  ;;  %v1573_v57 = vsel %vm786_vm7, %v1541_v10, %v1572_v58  ;;  %v6987_v55 = vrot.slane %v5743_v21, 4  ;;  %v5960_v24 = vsel %vm786_vm7, %v1002_v18, %v5808_v0 }
 0x29e   : > { %v1146_v35 = vrot.slane %v5944_v9, 4  ;;  %v1158_v30 = vrot.slane %v5914_v19, 4  ;;  %4497 = vmatmul.msk.f32.vlgmr.msrb.gmra.mxu2 %vm2210_vm8, %v1107_v14  ;;  %v1581_v51 = vperm.slane %v1573_v57, %v5489_v16  ;;  %v6988_v36 = vrot.slane %v5746_v6, 4 }
 0x29f   : > { %v1613_v13 = vsel %vm786_vm7, %v5721_v31, %v6987_v55  ;;  %v5972_v31 = vperm.slane %v5707_v48, %v5470_v56  ;;  %v1694_v0 = vrot.slane %v5701_v37, 4  ;;  %v1600_v10 = vrot.slane %v1557_v47, 4 }
 0x2a0   : > { %v1625_v21 = vsel %vm786_vm7, %v5675_v59, %v6988_v36  ;;  %v1598_v12 = vrot.slane %v1581_v51, 4  ;;  %v5976_v3 = vperm.slane %v1613_v13, %v5470_v56  ;;  %v6989_v43 = vrot.slane %v5658_v25, 4 }
 0x2a1   : > { %v5979_v18 = vperm.slane %v1625_v21, %v5470_v56  ;;  %v1695_v59 = vsel %vm786_vm7, %v1694_v0, %v5972_v31  ;;  %v1601_v48 = vsel %vm786_vm7, %v1581_v51, %v1600_v10  ;;  %v1513_v15 = vsel %vm786_vm7, %v5602_v53, %v1512_v44 }
 0x2a2   : > { %v1501_v6 = vsel %vm786_vm7, %v5696_v50, %v6989_v43  ;;  %v1599_v11 = vsel %vm786_vm7, %v1598_v12, %v1557_v47  ;;  %v1701_v25 = vperm.slane %v1695_v59, %v5489_v16  ;;  %4508 = vmatpush.xpose.msk.msra.mxu3 %vm2210_vm8, %v1601_v48  ;;  %v5998_v50 = vperm.slane %v1513_v15, %v5470_v56 }
 0x2a3   : > { %v5989_v58 = vperm.slane %v1501_v6, %v5470_v56  ;;  %v1670_v42 = vrot.slane %v5979_v18, 4  ;;  %v1060_v49 = vrot.slane %v5893_v33, 4  ;;  %4504 = vmatpush.xpose.msk.msra.mxu2 %vm2210_vm8, %v1599_v11  ;;  %v6990_v14 = vrot.slane %v5625_v20, 4 }
 0x2a4   : > { %v1582_v47 = vrot.slane %v5649_v41, 4  ;;  %v6991_v44 = vrot.slane %v5814_v7, 4  ;;  %v1714_v13 = vrot.slane %v1701_v25, 4  ;;  %v1558_v51 = vrot.slane %v5998_v50, 4 }
 0x2a5   : > { %v1525_v53 = vsel %vm786_vm7, %v5615_v8, %v6990_v14  ;;  %v1671_v55 = vsel %vm786_vm7, %v1670_v42, %v5976_v3  ;;  %v6021_v8 = vsel %vm786_vm7, %v994_v4, %v5814_v7  ;;  %v6025_v36 = vsel %vm786_vm7, %v998_v29, %v5799_v61 }
 0x2a6   : > { %v6010_v57 = vsel %vm786_vm7, %v977_v62, %v6991_v44  ;;  %v6015_v33 = vperm.slane %v1525_v53, %v5470_v56  ;;  %v1677_v20 = vperm.slane %v1671_v55, %v5489_v16  ;;  %v1084_v21 = vrot.slane %v5900_v17, 4 }
 0x2a7   : > { %v1135_v62 = vsel %vm786_vm7, %v1134_v1, %v6010_v57  ;;  %v1559_v0 = vsel %vm786_vm7, %v1558_v51, %v5989_v58  ;;  %v1122_v12 = vrot.slane %v6025_v36, 4  ;;  %v1147_v1 = vsel %vm786_vm7, %v1146_v35, %v5960_v24 }
 0x2a8   : > { %v1583_v10 = vsel %vm786_vm7, %v1582_v47, %v6015_v33  ;;  %v1715_v7 = vsel %vm786_vm7, %v1714_v13, %v1677_v20  ;;  %v1716_v4 = vrot.slane %v1677_v20, 4  ;;  %v1565_v43 = vperm.slane %v1559_v0, %v5489_v16 }
 0x2a9   : > { %v1589_v61 = vperm.slane %v1583_v10, %v5489_v16  ;;  %4511 = vmatpush.xpose.msk.msrb.mxu2 %vm2210_vm8, %v1715_v7  ;;  %v1123_v17 = vsel %vm786_vm7, %v1122_v12, %v6021_v8  ;;  %v1141_v29 = vperm.slane %v1135_v62, %v5470_v56  ;;  %v1159_v6 = vsel %vm786_vm7, %v1158_v30, %v5940_v52 }
 0x2aa   : > { %v1717_v59 = vsel %vm786_vm7, %v1701_v25, %v1716_v4  ;;  %v1604_v15 = vrot.slane %v1565_v43, 4  ;;  %v1129_v11 = vperm.slane %v1123_v17, %v5470_v56  ;;  %v1153_v42 = vperm.slane %v1147_v1, %v5470_v56 }
 0x2ab   : > { %v1602_v48 = vrot.slane %v1589_v61, 4  ;;  %4515 = vmatpush.xpose.msk.msrb.mxu3 %vm2210_vm8, %v1717_v59  ;;  %v1165_v14 = vperm.slane %v1159_v6, %v5470_v56  ;;  %v1170_v53 = vrot.slane %v1141_v29, 4  ;;  %v1061_v47 = vsel %vm786_vm7, %v5896_v63, %v1060_v49 }
 0x2ac   : > { %v1048_v35 = vrot.slane %v5726_v45, 4  ;;  %v1069_v25 = vperm.slane %v1061_v47, %v5489_v16  ;;  %v1085_v44 = vsel %vm786_vm7, %v5903_v60, %v1084_v21  ;;  %v1672_v20 = vrot.slane %v5976_v3, 4 }
 0x2ad   : > { %v1603_v30 = vsel %vm786_vm7, %v1602_v48, %v1565_v43  ;;  %v1171_v55 = vsel %vm786_vm7, %v1170_v53, %v1129_v11  ;;  %v1194_v13 = vrot.slane %v1165_v14, 4  ;;  %v1093_v51 = vperm.slane %v1085_v44, %v5489_v16 }
 0x2ae   : > { %4512 = vmatpush.xpose.msk.msrb.mxu2 %vm2210_vm8, %v1603_v30  ;;  %v1605_v63 = vsel %vm786_vm7, %v1589_v61, %v1604_v15  ;;  %v1177_v45 = vperm.slane %v1171_v55, %v5489_v16  ;;  %v1696_v49 = vrot.slane %v5972_v31, 4  ;;  %v1112_v62 = vrot.slane %v1069_v25, 4 }
 0x2af   : > { %4516 = vmatpush.xpose.msk.msrb.mxu3 %vm2210_vm8, %v1605_v63  ;;  %v1195_v60 = vsel %vm786_vm7, %v1194_v13, %v1153_v42  ;;  %v1110_v21 = vrot.slane %v1093_v51, 4  ;;  %v1673_v0 = vsel %vm786_vm7, %v5979_v18, %v1672_v20  ;;  %v1560_v10 = vrot.slane %v5989_v58, 4 }
 0x2b0   : > { %v1036_v12 = vrot.slane %v5788_v5, 4  ;;  %v1049_v3 = vsel %vm786_vm7, %v5731_v23, %v1048_v35  ;;  %v1201_v7 = vperm.slane %v1195_v60, %v5489_v16  ;;  %v1220_v4 = vrot.slane %v1177_v45, 4 }
 0x2b1   : > { %v1012_v31 = vrot.slane %v5865_v32, 4  ;;  %v1111_v43 = vsel %vm786_vm7, %v1110_v21, %v1069_v25  ;;  %v1113_v61 = vsel %vm786_vm7, %v1093_v51, %v1112_v62  ;;  %v1584_v17 = vrot.slane %v6015_v33, 4 }
 0x2b2   : > { %v1218_v1 = vrot.slane %v1201_v7, 4  ;;  %v1221_v18 = vsel %vm786_vm7, %v1201_v7, %v1220_v4  ;;  %v1681_v58 = vperm.slane %v1673_v0, %v5489_v16  ;;  %v1697_v5 = vsel %vm786_vm7, %v5701_v37, %v1696_v49 }
 0x2b3   : > { %v1057_v23 = vperm.slane %v1049_v3, %v5470_v56  ;;  %v1024_v6 = vrot.slane %v5871_v26, 4  ;;  %4502 = vmatmul.msk.f32.gmra.mxu3 %vm2210_vm8, %v1221_v18  ;;  %v1561_v32 = vsel %vm786_vm7, %v5998_v50, %v1560_v10  ;;  %v1172_v59 = vrot.slane %v1129_v11, 4 }
 0x2b4   : > { %v1037_v33 = vsel %vm786_vm7, %v5759_v22, %v1036_v12  ;;  %v1219_v48 = vsel %vm786_vm7, %v1218_v1, %v1177_v45  ;;  %v1196_v15 = vrot.slane %v1153_v42, 4  ;;  %v1705_v37 = vperm.slane %v1697_v5, %v5489_v16 }
 0x2b5   : > { %4498 = vmatmul.msk.f32.gmra.mxu2 %vm2210_vm8, %v1219_v48  ;;  %v1013_v53 = vsel %vm786_vm7, %v5755_v2, %v1012_v31  ;;  %v1136_v26 = vrot.slane %v6010_v57, 4  ;;  %v1720_v47 = vrot.slane %v1681_v58, 4  ;;  %v1569_v35 = vperm.slane %v1561_v32, %v5489_v16 }
 0x2b6   : > { %v1585_v50 = vsel %vm786_vm7, %v5649_v41, %v1584_v17  ;;  %v1173_v22 = vsel %vm786_vm7, %v1141_v29, %v1172_v59  ;;  %v1025_v11 = vsel %vm786_vm7, %v5712_v46, %v1024_v6  ;;  %v1045_v42 = vperm.slane %v1037_v33, %v5470_v56 }
 0x2b7   : > { %v1094_v30 = vrot.slane %v1057_v23, 4  ;;  %v1197_v25 = vsel %vm786_vm7, %v1165_v14, %v1196_v15  ;;  %v1021_v2 = vperm.slane %v1013_v53, %v5470_v56  ;;  %v1033_v57 = vperm.slane %v1025_v11, %v5470_v56 }
 0x2b8   : > { %v1160_v44 = vrot.slane %v5940_v52, 4  ;;  %v1718_v55 = vrot.slane %v1705_v37, 4  ;;  %v1593_v13 = vperm.slane %v1585_v50, %v5489_v16  ;;  %v1124_v29 = vrot.slane %v6021_v8, 4 }
 0x2b9   : > { %v1095_v41 = vsel %vm786_vm7, %v1094_v30, %v1045_v42  ;;  %v1181_v46 = vperm.slane %v1173_v22, %v5489_v16  ;;  %v1070_v51 = vrot.slane %v1033_v57, 4  ;;  %v1721_v14 = vsel %vm786_vm7, %v1705_v37, %v1720_v47 }
 0x2ba   : > { %v1101_v20 = vperm.slane %v1095_v41, %v5489_v16  ;;  %v1608_v63 = vrot.slane %v1569_v35, 4  ;;  %v1205_v45 = vperm.slane %v1197_v25, %v5489_v16  ;;  %v1137_v52 = vsel %vm786_vm7, %v5928_v54, %v1136_v26 }
 0x2bb   : > { %4509 = vmatmul.msk.f32.vlgmr.msra.gmra.mxu3 %vm2210_vm8, %v1113_v61  ;;  %v1071_v49 = vsel %vm786_vm7, %v1070_v51, %v1021_v2  ;;  %v1072_v62 = vrot.slane %v1021_v2, 4  ;;  %v1096_v60 = vrot.slane %v1045_v42, 4  ;;  %v1148_v21 = vrot.slane %v5960_v24, 4 }
 0x2bc   : > { %4523 = vmatpush.xpose.msk.msra.mxu3 %vm2210_vm8, %v1721_v14  ;;  %v1114_v8 = vrot.slane %v1101_v20, 4  ;;  %v1719_v0 = vsel %vm786_vm7, %v1718_v55, %v1681_v58  ;;  %v1606_v10 = vrot.slane %v1593_v13, 4  ;;  %v1077_v12 = vperm.slane %v1071_v49, %v5489_v16 }
 0x2bd   : > { %4505 = vmatmul.msk.f32.vlgmr.msra.gmra.mxu2 %vm2210_vm8, %v1111_v43  ;;  %v1161_v3 = vsel %vm786_vm7, %v5914_v19, %v1160_v44  ;;  %v1224_v54 = vrot.slane %v1181_v46, 4  ;;  %v1073_v7 = vsel %vm786_vm7, %v1033_v57, %v1072_v62  ;;  %v1097_v4 = vsel %vm786_vm7, %v1057_v23, %v1096_v60 }
 0x2be   : > { %4519 = vmatpush.xpose.msk.msra.mxu2 %vm2210_vm8, %v1719_v0  ;;  %v1609_v31 = vsel %vm786_vm7, %v1593_v13, %v1608_v63  ;;  %v1115_v24 = vsel %vm786_vm7, %v1114_v8, %v1077_v12  ;;  %v1116_v43 = vrot.slane %v1077_v12, 4  ;;  %v1145_v61 = vperm.slane %v1137_v52, %v5470_v56 }
 0x2bf   : > { %v1222_v17 = vrot.slane %v1205_v45, 4  ;;  %v1125_v19 = vsel %vm786_vm7, %v6025_v36, %v1124_v29  ;;  %v1081_v1 = vperm.slane %v1073_v7, %v5489_v16  ;;  %v1105_v18 = vperm.slane %v1097_v4, %v5489_v16 }
 0x2c0   : > { %4524 = vmatpush.xpose.msk.msra.mxu3 %vm2210_vm8, %v1609_v31  ;;  %v1607_v58 = vsel %vm786_vm7, %v1606_v10, %v1569_v35  ;;  %v1117_v5 = vsel %vm786_vm7, %v1101_v20, %v1116_v43  ;;  %v1169_v23 = vperm.slane %v1161_v3, %v5470_v56  ;;  %v1225_v6 = vsel %vm786_vm7, %v1205_v45, %v1224_v54 }
 0x2c1   : > { %v1149_v32 = vsel %vm786_vm7, %v5944_v9, %v1148_v21  ;;  %v1118_v59 = vrot.slane %v1105_v18, 4  ;;  %v1120_v33 = vrot.slane %v1081_v1, 4  ;;  %v1133_v36 = vperm.slane %v1125_v19, %v5470_v56 }
 0x2c2   : > { %4520 = vmatpush.xpose.msk.msra.mxu2 %vm2210_vm8, %v1607_v58  ;;  %v1182_v48 = vrot.slane %v1145_v61, 4  ;;  %v1223_v15 = vsel %vm786_vm7, %v1222_v17, %v1181_v46  ;;  %v1157_v26 = vperm.slane %v1149_v32, %v5470_v56  ;;  %v1206_v47 = vrot.slane %v1169_v23, 4 }
 0x2c3   : > { %4510 = vmatmul.msk.f32.gmra.mxu3 %vm2210_vm8, %v1225_v6  ;;  %v1119_v37 = vsel %vm786_vm7, %v1118_v59, %v1081_v1  ;;  %v1121_v53 = vsel %vm786_vm7, %v1105_v18, %v1120_v33  ;;  %v1184_v25 = vrot.slane %v1133_v36, 4  ;;  %v4686_v32 = vpack.i.bf16 %v5408_v27, %v5410_v28 }
 0x2c4   : > { %v1183_v9 = vsel %vm786_vm7, %v1182_v48, %v1133_v36  ;;  %v1207_v35 = vsel %vm786_vm7, %v1206_v47, %v1157_v26  ;;  %v1208_v57 = vrot.slane %v1157_v26, 4  ;;  %v6230_v26 = vpop.permute.xlu0 %4672 }
 0x2c5   : > { %4506 = vmatmul.msk.f32.gmra.mxu2 %vm2210_vm8, %v1223_v15  ;;  %v1189_v50 = vperm.slane %v1183_v9, %v5489_v16  ;;  %v1213_v22 = vperm.slane %v1207_v35, %v5489_v16  ;;  %v1185_v44 = vsel %vm786_vm7, %v1145_v61, %v1184_v25  ;;  %v6235_v9 = vpop.permute.xlu2 %4677 }
 0x2c6   : > { %v1209_v55 = vsel %vm786_vm7, %v1169_v23, %v1208_v57  ;;  %v1193_v13 = vperm.slane %v1185_v44, %v5489_v16 }
 0x2c7   : > { %v1228_v11 = vrot.slane %v1189_v50, 4  ;;  %v1226_v42 = vrot.slane %v1213_v22, 4  ;;  %v1217_v41 = vperm.slane %v1209_v55, %v5489_v16 }
 0x2c8   : > { %v1232_v29 = vrot.slane %v1193_v13, 4 }
 0x2c9   : > { %v1229_v30 = vsel %vm786_vm7, %v1213_v22, %v1228_v11  ;;  %v1227_v2 = vsel %vm786_vm7, %v1226_v42, %v1189_v50  ;;  %v1230_v46 = vrot.slane %v1217_v41, 4 }
 0x2ca   : > { %v1233_v51 = vsel %vm786_vm7, %v1217_v41, %v1232_v29 }
 0x2cb   : > { %4517 = vmatmul.msk.f32.vlgmr.msrb.gmra.mxu3 %vm2210_vm8, %v1117_v5  ;;  %v1231_v20 = vsel %vm786_vm7, %v1230_v46, %v1193_v13 }
 0x2cd   : > { %4513 = vmatmul.msk.f32.vlgmr.msrb.gmra.mxu2 %vm2210_vm8, %v1115_v24 }
 0x2d3   : > { %4518 = vmatmul.msk.f32.gmra.mxu3 %vm2210_vm8, %v1229_v30 }
 0x2d5   : > { %4514 = vmatmul.msk.f32.gmra.mxu2 %vm2210_vm8, %v1227_v2 }
 0x2db   : > { %4525 = vmatmul.msk.f32.vlgmr.msra.gmra.mxu3 %vm2210_vm8, %v1121_v53 }
 0x2dd   : > { %4521 = vmatmul.msk.f32.vlgmr.msra.gmra.mxu2 %vm2210_vm8, %v1119_v37 }
 0x2e3   : > { %4526 = vmatmul.msk.f32.gmra.mxu3 %vm2210_vm8, %v1233_v51 }
 0x2e5   : > { %4522 = vmatmul.msk.f32.gmra.mxu2 %vm2210_vm8, %v1231_v20 }
 0x320   : > { %v2275_v14 = vpop.f32.mrf.mxu3 }
 0x321   : > { %v6169_v63 = vpop.f32.mrf.mxu2  ;;  %v2498_v45 = vsel %vm2491_vm9, %v2275_v14, -inf }
 0x322   : > { %v2492_v52 = vsel %vm2491_vm9, %v6169_v63, -inf  ;;  %2499 = vmax.xlane.f32.xlu1 %v2498_v45 }
 0x323   : > { %2493 = vmax.xlane.f32.xlu2 %v2492_v52 }
 0x336   : > { %v6174_v49 = vpop.f32.mrf.mxu3 }
 0x337   : > { %v2501_v8 = vsel %vm2491_vm9, %v6174_v49, -inf }
 0x338   : > { %v6178_v62 = vpop.f32.mrf.mxu2  ;;  %2502 = vmax.xlane.f32.xlu0 %v2501_v8 }
 0x339   : > { %v2495_v60 = vsel %vm2491_vm9, %v6178_v62, -inf }
 0x33a   : > { %2496 = vmax.xlane.f32.xlu1 %v2495_v60 }
 0x33e   : > { %v2345_v21 = vpop.f32.mrf.mxu3 }
 0x33f   : > { %v2510_v0 = vsel %vm2491_vm9, %v2345_v21, -inf }
 0x340   : > { %v2310_v10 = vpop.f32.mrf.mxu2  ;;  %2511 = vmax.xlane.f32.xlu0 %v2510_v0 }
 0x341   : > { %v2504_v12 = vsel %vm2491_vm9, %v2310_v10, -inf }
 0x342   : > { %2505 = vmax.xlane.f32.xlu1 %v2504_v12 }
 0x346   : > { %v6184_v3 = vpop.f32.mrf.mxu3 }
 0x347   : > { %v2513_v54 = vsel %vm2491_vm9, %v6184_v3, -inf }
 0x348   : > { %v6188_v7 = vpop.f32.mrf.mxu2  ;;  %2514 = vmax.xlane.f32.xlu2 %v2513_v54 }
 0x349   : > { %v2507_v4 = vsel %vm2491_vm9, %v6188_v7, -inf }
 0x34a   : > { %2508 = vmax.xlane.f32.xlu0 %v2507_v4 }
 0x34e   : > { %v6192_v31 = vpop.f32.mrf.mxu3 }
 0x34f   : > { %v2522_v24 = vsel %vm2491_vm9, %v6192_v31, -inf }
 0x350   : > { %v6196_v43 = vpop.f32.mrf.mxu2  ;;  %2523 = vmax.xlane.f32.xlu2 %v2522_v24 }
 0x351   : > { %v2516_v61 = vsel %vm2491_vm9, %v6196_v43, -inf }
 0x352   : > { %2517 = vmax.xlane.f32.xlu0 %v2516_v61 }
 0x356   : > { %v6200_v17 = vpop.f32.mrf.mxu3 }
 0x357   : > { %v2525_v19 = vsel %vm2491_vm9, %v6200_v17, -inf }
 0x358   : > { %v6204_v1 = vpop.f32.mrf.mxu2  ;;  %2526 = vmax.xlane.f32.xlu1 %v2525_v19 }
 0x359   : > { %v2519_v18 = vsel %vm2491_vm9, %v6204_v1, -inf }
 0x35a   : > { %2520 = vmax.xlane.f32.xlu2 %v2519_v18 }
 0x35e   : > { %v6208_v58 = vpop.f32.mrf.mxu3 }
 0x35f   : > { %v2534_v5 = vsel %vm2491_vm9, %v6208_v58, -inf }
 0x360   : > { %v6212_v23 = vpop.f32.mrf.mxu2  ;;  %2535 = vmax.xlane.f32.xlu1 %v2534_v5 }
 0x361   : > { %v2528_v6 = vsel %vm2491_vm9, %v6212_v23, -inf }
 0x362   : > { %2529 = vmax.xlane.f32.xlu2 %v2528_v6  ;;  %v4679_v6 = vunpack.i.l.bf16 %v6235_v9 }
 0x366   : > { %4687 = vrot.lane.b32.xlu0 %v4686_v32, %s5144_s2  ;;  %v6226_v36 = vpop.f32.mrf.mxu3 }
 0x367   : > { %v2537_v48 = vsel %vm2491_vm9, %v6226_v36, -inf }
 0x368   : > { %v6219_v59 = vpop.f32.mrf.mxu2 }
 0x369   : > { %v2531_v33 = vsel %vm2491_vm9, %v6219_v59, -inf }
 0x36a   : > { %2532 = vmax.xlane.f32.xlu1 %v2531_v33 }
 0x37a   : > { %4692 = vrot.lane.b32.xlu2 %v5454_v40, %s5146_s28 }
 0x383   : > { %4682 = vrot.lane.b32.xlu1 %v4686_v32, %s5145_s17 }
 0x390   : > { %2538 = vmax.xlane.f32.xlu0 %v2537_v48 }
 0x395   : > { %v2500_v15 = vpop.xlane.xlu1 %2499 }
 0x396   : > { %v2542_v37 = vsub.f32 %v2275_v14, %v2500_v15  ;;  %v2494_v22 = vpop.xlane.xlu2 %2493 }
 0x397   : > { %v2540_v13 = vsub.f32 %v6169_v63, %v2494_v22 }
 0x398   : > { %v2560_v53 = vmul.f32 1.442695, %v2542_v37 }
 0x399   : > { %v2556_v45 = vmul.f32 1.442695, %v2540_v13  ;;  %v4674_v13 = vunpack.i.l.bf16 %v6230_v26 }
 0x39a   : > { %4739 = vpow2.f32 %v2560_v53 }
 0x3a0   : > { %v6233_v47 = vpop.eup %4739 }
 0x3a1   : > { %v2594_v35 = vsel %vm2491_vm9, %v6233_v47, 0.0 }
 0x3a4   : > { %4697 = vrot.lane.b32.xlu0 %v4686_v32, %s5146_s28 }
 0x3ab   : > { %v2503_v40 = vpop.xlane.xlu0 %2502 }
 0x3ac   : > { %v2543_v52 = vsub.f32 %v6174_v49, %v2503_v40  ;;  %v1876_v40 = vrot.slane %v5448_v38, 4 }
 0x3ad   : > { %v2497_v50 = vpop.xlane.xlu1 %2496  ;;  %2595 = vadd.xlane.f32.xlu1 %v2594_v35  ;;  %v1898_v35 = vrot.slane %v4679_v6, 4 }
 0x3ae   : > { %v2541_v57 = vsub.f32 %v6178_v62, %v2497_v50  ;;  %v2562_v60 = vmul.f32 1.442695, %v2543_v52 }
 0x3b0   : > { %v2558_v41 = vmul.f32 1.442695, %v2541_v57 }
 0x3b3   : > { %v2512_v11 = vpop.xlane.xlu0 %2511 }
 0x3b4   : > { %v2546_v42 = vsub.f32 %v2345_v21, %v2512_v11 }
 0x3b5   : > { %v2506_v30 = vpop.xlane.xlu1 %2505 }
 0x3b6   : > { %v2544_v25 = vsub.f32 %v2310_v10, %v2506_v30  ;;  %v2568_v2 = vmul.f32 1.442695, %v2546_v42  ;;  %v1900_v30 = vrot.slane %v5450_v39, 4 }
 0x3b8   : > { %v2564_v44 = vmul.f32 1.442695, %v2544_v25  ;;  %4741 = vpow2.f32 %v2568_v2 }
 0x3ba   : > { %4743 = vpow2.f32 %v2564_v44  ;;  %v1899_v44 = vsel %vm786_vm7, %v1898_v35, %v5450_v39 }
 0x3bb   : > { %v2515_v55 = vpop.xlane.xlu2 %2514  ;;  %4745 = vpow2.f32 %v2558_v41 }
 0x3bc   : > { %v2547_v21 = vsub.f32 %v6184_v3, %v2515_v55  ;;  %v1901_v55 = vsel %vm786_vm7, %v4679_v6, %v1900_v30 }
 0x3bd   : > { %v2509_v29 = vpop.xlane.xlu0 %2508  ;;  %v1909_v39 = vperm.slane %v1901_v55, %v5470_v56 }
 0x3be   : > { %v6241_v46 = vpop.eup %4741  ;;  %v2545_v51 = vsub.f32 %v6188_v7, %v2509_v29  ;;  %v2570_v54 = vmul.f32 1.442695, %v2547_v21 }
 0x3bf   : > { %v2606_v20 = vsel %vm2491_vm9, %v6241_v46, 0.0 }
 0x3c0   : > { %v6246_v14 = vpop.eup %4743  ;;  %v2566_v8 = vmul.f32 1.442695, %v2545_v51  ;;  %2607 = vadd.xlane.f32.xlu2 %v2606_v20  ;;  %v1905_v51 = vperm.slane %v1899_v44, %v5470_v56 }
 0x3c1   : > { %v2600_v63 = vsel %vm2491_vm9, %v6246_v14, 0.0  ;;  %v6252_v10 = vpop.eup %4745 }
 0x3c2   : > { %4747 = vpow2.f32 %v2566_v8  ;;  %2601 = vadd.xlane.f32.xlu1 %v2600_v63  ;;  %v2591_v7 = vsel %vm2491_vm9, %v6252_v10, 0.0 }
 0x3c3   : > { %v2524_v62 = vpop.xlane.xlu2 %2523  ;;  %4749 = vpow2.f32 %v2556_v45 }
 0x3c4   : > { %4751 = vpow2.f32 %v2562_v60  ;;  %v2550_v32 = vsub.f32 %v6192_v31, %v2524_v62 }
 0x3c5   : > { %v2518_v0 = vpop.xlane.xlu0 %2517  ;;  %4753 = vpow2.f32 %v2570_v54 }
 0x3c6   : > { %v2548_v49 = vsub.f32 %v6196_v43, %v2518_v0  ;;  %v4680_v43 = vunpack.i.h.bf16 %v6235_v9  ;;  %v2576_v50 = vmul.f32 1.442695, %v2550_v32 }
 0x3c8   : > { %v6254_v12 = vpop.eup %4747  ;;  %v2572_v61 = vmul.f32 1.442695, %v2548_v49  ;;  %v1874_v37 = vrot.slane %v4680_v43, 4  ;;  %v1877_v25 = vsel %vm786_vm7, %v4680_v43, %v1876_v40 }
 0x3c9   : > { %v2603_v4 = vsel %vm2491_vm9, %v6254_v12, 0.0  ;;  %v6261_v24 = vpop.eup %4749  ;;  %v1885_v41 = vperm.slane %v1877_v25, %v5470_v56 }
 0x3ca   : > { %2592 = vadd.xlane.f32.xlu1 %v2591_v7  ;;  %2604 = vadd.xlane.f32.xlu2 %v2603_v4  ;;  %v2588_v18 = vsel %vm2491_vm9, %v6261_v24, 0.0  ;;  %v6265_v5 = vpop.eup %4751  ;;  %4755 = vpow2.f32 %v2572_v61  ;;  %v1875_v2 = vsel %vm786_vm7, %v1874_v37, %v5448_v38  ;;  %v1948_v4 = vrot.slane %v1905_v51, 4 }
 0x3cb   : > { %v2527_v3 = vpop.xlane.xlu1 %2526  ;;  %v2597_v33 = vsel %vm2491_vm9, %v6265_v5, 0.0  ;;  %v6272_v48 = vpop.eup %4753  ;;  %v1881_v38 = vperm.slane %v1875_v2, %v5470_v56  ;;  %v1936_v62 = vrot.slane %v1885_v41, 4 }
 0x3cc   : > { %v2609_v9 = vsel %vm2491_vm9, %v6272_v48, 0.0  ;;  %v2551_v20 = vsub.f32 %v6200_v17, %v2527_v3  ;;  %v1960_v3 = vrot.slane %v1909_v39, 4 }
 0x3cd   : > { %v2521_v19 = vpop.xlane.xlu2 %2520  ;;  %v1924_v17 = vrot.slane %v1881_v38, 4 }
 0x3ce   : > { %2589 = vadd.xlane.f32.xlu0 %v2588_v18  ;;  %v2549_v29 = vsub.f32 %v6204_v1, %v2521_v19  ;;  %v2578_v61 = vmul.f32 1.442695, %v2551_v20 }
 0x3d0   : > { %v6278_v11 = vpop.eup %4755  ;;  %v2574_v60 = vmul.f32 1.442695, %v2549_v29 }
 0x3d2   : > { %2598 = vadd.xlane.f32.xlu2 %v2597_v33 }
 0x3d3   : > { %v2536_v15 = vpop.xlane.xlu1 %2535 }
 0x3d4   : > { %v2554_v53 = vsub.f32 %v6208_v58, %v2536_v15  ;;  %v4675_v58 = vunpack.i.h.bf16 %v6230_v26  ;;  %v1912_v26 = vrot.slane %v4674_v13, 4 }
 0x3d5   : > { %v2530_v22 = vpop.xlane.xlu2 %2529 }
 0x3d6   : > { %v2584_v31 = vmul.f32 1.442695, %v2554_v53  ;;  %v2552_v42 = vsub.f32 %v6212_v23, %v2530_v22  ;;  %2610 = vadd.xlane.f32.xlu0 %v2609_v9  ;;  %v2612_v23 = vsel %vm2491_vm9, %v6278_v11, 0.0  ;;  %v1888_v63 = vrot.slane %v4675_v58, 4 }
 0x3d8   : > { %4757 = vpow2.f32 %v2584_v31  ;;  %v2580_v57 = vmul.f32 1.442695, %v2552_v42 }
 0x3d9   : > { %4759 = vpow2.f32 %v2576_v50 }
 0x3da   : > { %4761 = vpow2.f32 %v2580_v57  ;;  %2613 = vadd.xlane.f32.xlu2 %v2612_v23 }
 0x3db   : > { %4763 = vpow2.f32 %v2574_v60 }
 0x3dd   : > { %v4693_v45 = vpop.permute.xlu2 %4692  ;;  %v2533_v52 = vpop.xlane.xlu1 %2532 }
 0x3de   : > { %v6298_v8 = vpop.eup %4757  ;;  %v4695_v1 = vunpack.i.h.bf16 %v4693_v45  ;;  %v4694_v0 = vunpack.i.l.bf16 %v4693_v45  ;;  %v2553_v54 = vsub.f32 %v6219_v59, %v2533_v52 }
 0x3df   : > { %v6300_v21 = vpop.eup %4759  ;;  %v2630_v49 = vsel %vm2491_vm9, %v6298_v8, 0.0 }
 0x3e0   : > { %v6305_v7 = vpop.eup %4761  ;;  %2631 = vadd.xlane.f32.xlu1 %v2630_v49  ;;  %v1886_v19 = vrot.slane %v4695_v1, 4  ;;  %v1889_v18 = vsel %vm786_vm7, %v4695_v1, %v1888_v63  ;;  %v1910_v43 = vrot.slane %v4694_v0, 4  ;;  %v1913_v6 = vsel %vm786_vm7, %v4694_v0, %v1912_v26 }
 0x3e1   : > { %v1897_v32 = vperm.slane %v1889_v18, %v5470_v56  ;;  %v1921_v59 = vperm.slane %v1913_v6, %v5470_v56  ;;  %v2582_v33 = vmul.f32 1.442695, %v2553_v54  ;;  %v2624_v15 = vsel %vm2491_vm9, %v6305_v7, 0.0  ;;  %v6332_v63 = vpop.eup %4763 }
 0x3e2   : > { %v1887_v37 = vsel %vm786_vm7, %v1886_v19, %v4675_v58  ;;  %v1911_v53 = vsel %vm786_vm7, %v1910_v43, %v4674_v13  ;;  %2625 = vadd.xlane.f32.xlu0 %v2624_v15  ;;  %v2618_v40 = vsel %vm2491_vm9, %v6300_v21, 0.0 }
 0x3e3   : > { %v1893_v35 = vperm.slane %v1887_v37, %v5470_v56  ;;  %v1917_v50 = vperm.slane %v1911_v53, %v5470_v56  ;;  %v1934_v22 = vrot.slane %v1897_v32, 4  ;;  %v1937_v9 = vsel %vm786_vm7, %v1897_v32, %v1936_v62 }
 0x3e4   : > { %v1945_v31 = vperm.slane %v1937_v9, %v5489_v16  ;;  %v1958_v42 = vrot.slane %v1921_v59, 4  ;;  %v1961_v30 = vsel %vm786_vm7, %v1921_v59, %v1960_v3  ;;  %4765 = vpow2.f32 %v2582_v33 }
 0x3e5   : > { %v1922_v25 = vrot.slane %v1893_v35, 4  ;;  %v1925_v58 = vsel %vm786_vm7, %v1893_v35, %v1924_v17  ;;  %v1935_v2 = vsel %vm786_vm7, %v1934_v22, %v1885_v41  ;;  %v1946_v57 = vrot.slane %v1917_v50, 4 }
 0x3e6   : > { %v1933_v44 = vperm.slane %v1925_v58, %v5489_v16  ;;  %v1941_v55 = vperm.slane %v1935_v2, %v5489_v16  ;;  %v1949_v23 = vsel %vm786_vm7, %v1917_v50, %v1948_v4  ;;  %v1959_v13 = vsel %vm786_vm7, %v1958_v42, %v1909_v39 }
 0x3e7   : > { %v1923_v29 = vsel %vm786_vm7, %v1922_v25, %v1881_v38  ;;  %v1947_v20 = vsel %vm786_vm7, %v1946_v57, %v1905_v51  ;;  %v1957_v45 = vperm.slane %v1949_v23, %v5489_v16  ;;  %v1965_v52 = vperm.slane %v1959_v13, %v5489_v16 }
 0x3e8   : > { %v1929_v41 = vperm.slane %v1923_v29, %v5489_v16  ;;  %v1953_v26 = vperm.slane %v1947_v20, %v5489_v16  ;;  %v1969_v62 = vperm.slane %v1961_v30, %v5489_v16  ;;  %v1976_v60 = vrot.slane %v1933_v44, 4 }
 0x3e9   : > { %v1974_v1 = vrot.slane %v1957_v45, 4  ;;  %v1978_v0 = vrot.slane %v1965_v52, 4  ;;  %v1980_v39 = vrot.slane %v1941_v55, 4  ;;  %v1984_v54 = vrot.slane %v1945_v31, 4 }
 0x3ea   : > { %v6337_v38 = vpop.eup %4765  ;;  %v1970_v51 = vrot.slane %v1953_v26, 4  ;;  %v1972_v49 = vrot.slane %v1929_v41, 4  ;;  %v6340_v17 = vsel %vm786_vm7, %v1957_v45, %v1976_v60  ;;  %v1982_v4 = vrot.slane %v1969_v62, 4  ;;  %2619 = vadd.xlane.f32.xlu0 %v2618_v40 }
 0x3eb   : > { %4767 = vpow2.f32 %v2578_v61  ;;  %v1975_v3 = vsel %vm786_vm7, %v1974_v1, %v1933_v44  ;;  %v1985_v19 = vsel %vm786_vm7, %v1969_v62, %v1984_v54  ;;  %v2110_v18 = vrot.slane %v6340_v17, 4 }
 0x3ec   : > { %v1981_v43 = vsel %vm786_vm7, %v1965_v52, %v1980_v39  ;;  %v1983_v6 = vsel %vm786_vm7, %v1982_v4, %v1945_v31  ;;  %v2134_v32 = vrot.slane %v1985_v19, 4  ;;  %v2627_v59 = vsel %vm2491_vm9, %v6337_v38, 0.0 }
 0x3ed   : > { %v2122_v33 = vrot.slane %v1983_v6, 4  ;;  %2628 = vadd.xlane.f32.xlu1 %v2627_v59  ;;  %v1971_v15 = vsel %vm786_vm7, %v1970_v51, %v1929_v41  ;;  %v1973_v61 = vsel %vm786_vm7, %v1953_v26, %v1972_v49  ;;  %v1979_v37 = vsel %vm786_vm7, %v1978_v0, %v1941_v55  ;;  %v4688_v49 = vpop.permute.xlu0 %4687 }
 0x3ee   : > { %v2098_v53 = vrot.slane %v1975_v3, 4  ;;  %v2111_v40 = vsel %vm786_vm7, %v2110_v18, %v1973_v61  ;;  %v2135_v22 = vsel %vm786_vm7, %v2134_v32, %v1981_v43  ;;  %v2615_v25 = vsel %vm2491_vm9, %v6332_v63, 0.0 }
 0x3ef   : > { %v2117_v35 = vperm.slane %v2111_v40, %v5470_v56  ;;  %v2123_v50 = vsel %vm786_vm7, %v2122_v33, %v1979_v37  ;;  %v2141_v42 = vperm.slane %v2135_v22, %v5470_v56  ;;  %v2124_v32 = vrot.slane %v1979_v37, 4 }
 0x3f0   : > { %v2099_v9 = vsel %vm786_vm7, %v2098_v53, %v1971_v15  ;;  %v2129_v31 = vperm.slane %v2123_v50, %v5470_v56  ;;  %v2136_v59 = vrot.slane %v1981_v43, 4  ;;  %v2100_v53 = vrot.slane %v1971_v15, 4 }
 0x3f1   : > { %v6359_v30 = vpop.eup %4767  ;;  %v2105_v58 = vperm.slane %v2099_v9, %v5470_v56  ;;  %v2146_v2 = vrot.slane %v2117_v35, 4  ;;  %v2170_v57 = vrot.slane %v2141_v42, 4  ;;  %v2125_v50 = vsel %vm786_vm7, %v1983_v6, %v2124_v32 }
 0x3f2   : > { %2616 = vadd.xlane.f32.xlu0 %v2615_v25  ;;  %v2172_v44 = vrot.slane %v2129_v31, 4  ;;  %v2621_v13 = vsel %vm2491_vm9, %v6359_v30, 0.0  ;;  %v2137_v9 = vsel %vm786_vm7, %v1985_v19, %v2136_v59  ;;  %v4690_v25 = vunpack.i.h.bf16 %v4688_v49 }
 0x3f3   : > { %v2147_v55 = vsel %vm786_vm7, %v2146_v2, %v2105_v58  ;;  %v2148_v23 = vrot.slane %v2105_v58, 4  ;;  %v2171_v20 = vsel %vm786_vm7, %v2170_v57, %v2129_v31  ;;  %v2101_v31 = vsel %vm786_vm7, %v1975_v3, %v2100_v53 }
 0x3f4   : > { %v2153_v29 = vperm.slane %v2147_v55, %v5489_v16  ;;  %v2173_v45 = vsel %vm786_vm7, %v2141_v42, %v2172_v44  ;;  %v2177_v52 = vperm.slane %v2171_v20, %v5489_v16  ;;  %v2133_v42 = vperm.slane %v2125_v50, %v5470_v56 }
 0x3f5   : > { %2622 = vadd.xlane.f32.xlu1 %v2621_v13  ;;  %v2149_v41 = vsel %vm786_vm7, %v2117_v35, %v2148_v23  ;;  %v2181_v62 = vperm.slane %v2173_v45, %v5489_v16  ;;  %v2112_v35 = vrot.slane %v1973_v61, 4  ;;  %v2145_v43 = vperm.slane %v2137_v9, %v5470_v56  ;;  %v4683_v55 = vpop.permute.xlu1 %4682 }
 0x3f6   : > { %v2157_v26 = vperm.slane %v2149_v41, %v5489_v16  ;;  %v2196_v60 = vrot.slane %v2153_v29, 4  ;;  %v2194_v1 = vrot.slane %v2177_v52, 4  ;;  %v4689_v15 = vunpack.i.l.bf16 %v4688_v49 }
 0x3f7   : > { %v2198_v0 = vrot.slane %v2181_v62, 4  ;;  %v2113_v37 = vsel %vm786_vm7, %v6340_v17, %v2112_v35  ;;  %v2184_v6 = vrot.slane %v2133_v42, 4  ;;  %v1762_v58 = vrot.slane %v4690_v25, 4 }
 0x3f8   : > { %v2197_v39 = vsel %vm786_vm7, %v2177_v52, %v2196_v60  ;;  %v2200_v54 = vrot.slane %v2157_v26, 4  ;;  %v2195_v51 = vsel %vm786_vm7, %v2194_v1, %v2153_v29  ;;  %v2121_v61 = vperm.slane %v2113_v37, %v5470_v56 }
 0x3f9   : > { %2717 = vmatpush.msra.mxu1 %v2197_v39  ;;  %2688 = vmatpush.msra.mxu0 %v2195_v51  ;;  %v2199_v4 = vsel %vm786_vm7, %v2198_v0, %v2157_v26  ;;  %v2182_v2 = vrot.slane %v2145_v43, 4  ;;  %v1764_v3 = vrot.slane %v5408_v27, 4  ;;  %v1788_v57 = vrot.slane %v5410_v28, 4 }
 0x3fa   : > { %v2201_v18 = vsel %vm786_vm7, %v2181_v62, %v2200_v54  ;;  %2746 = vmatpush.msrb.mxu2 %v2199_v4  ;;  %v1786_v44 = vrot.slane %v4689_v15, 4  ;;  %v2158_v29 = vrot.slane %v2121_v61, 4  ;;  %v2185_v20 = vsel %vm786_vm7, %v2145_v43, %v2184_v6 }
 0x3fb   : > { %2775 = vmatpush.msrb.mxu3 %v2201_v18  ;;  %v1765_v13 = vsel %vm786_vm7, %v4690_v25, %v1764_v3  ;;  %v1763_v45 = vsel %vm786_vm7, %v1762_v58, %v5408_v27  ;;  %v1789_v52 = vsel %vm786_vm7, %v4689_v15, %v1788_v57  ;;  %v2183_v41 = vsel %vm786_vm7, %v2182_v2, %v2133_v42 }
 0x3fc   : > { %v4685_v26 = vunpack.i.h.bf16 %v4683_v55  ;;  %v4684_v62 = vunpack.i.l.bf16 %v4683_v55  ;;  %v1773_v60 = vperm.slane %v1765_v13, %v5470_v56  ;;  %v1787_v1 = vsel %vm786_vm7, %v1786_v44, %v5410_v28 }
 0x3fd   : > { %v6405_v39 = vperm.slane %v2185_v20, %v5489_v16  ;;  %v1769_v54 = vperm.slane %v1763_v45, %v5470_v56  ;;  %v1797_v27 = vperm.slane %v1789_v52, %v5470_v56  ;;  %v6411_v49 = vperm.slane %v2183_v41, %v5489_v16 }
 0x3fe   : > { %v1793_v4 = vperm.slane %v1787_v1, %v5470_v56  ;;  %v1776_v18 = vrot.slane %v4685_v26, 4  ;;  %v1800_v32 = vrot.slane %v4684_v62, 4 }
 0x3ff   : > { %v2206_v35 = vrot.slane %v6405_v39, 4  ;;  %v1812_v50 = vrot.slane %v1769_v54, 4  ;;  %v1848_v9 = vrot.slane %v1797_v27, 4 }
 0x400   : > { %v1836_v15 = vrot.slane %v1793_v4, 4 }
 0x403   : > { %v2539_v33 = vpop.xlane.xlu0 %2538 }
 0x404   : > { %v2555_v40 = vsub.f32 %v6226_v36, %v2539_v33  ;;  %v2109_v36 = vperm.slane %v2101_v31, %v5470_v56  ;;  %v2202_v31 = vrot.slane %v6411_v49, 4 }
 0x406   : > { %v2586_v22 = vmul.f32 1.442695, %v2555_v40  ;;  %v2160_v23 = vrot.slane %v2109_v36, 4  ;;  %v2159_v51 = vsel %vm786_vm7, %v2158_v29, %v2109_v36 }
 0x407   : > { %v6418_v40 = vperm.slane %v2159_v51, %v5489_v16 }
 0x408   : > { %4769 = vpow2.f32 %v2586_v22  ;;  %v2161_v0 = vsel %vm786_vm7, %v2121_v61, %v2160_v23  ;;  %v1824_v22 = vrot.slane %v1773_v60, 4 }
 0x409   : > { %v6415_v28 = vperm.slane %v2161_v0, %v5489_v16  ;;  %v2204_v57 = vrot.slane %v6418_v40, 4  ;;  %v6441_v45 = vsel %vm786_vm7, %v2202_v31, %v6418_v40 }
 0x40b   : > { %v2208_v6 = vrot.slane %v6415_v28, 4  ;;  %v6431_v3 = vsel %vm786_vm7, %v2206_v35, %v6415_v28 }
 0x40e   : > { %v6388_v19 = vpop.eup %4769 }
 0x40f   : > { %v2633_v17 = vsel %vm2491_vm9, %v6388_v19, 0.0 }
 0x410   : > { %2634 = vadd.xlane.f32.xlu2 %v2633_v17 }
 0x416   : > { %v4698_v59 = vpop.permute.xlu0 %4697 }
 0x417   : > { %v4700_v33 = vunpack.i.h.bf16 %v4698_v59  ;;  %v4699_v53 = vunpack.i.l.bf16 %v4698_v59 }
 0x419   : > { %v1774_v42 = vrot.slane %v4700_v33, 4  ;;  %v1777_v25 = vsel %vm786_vm7, %v4700_v33, %v1776_v18  ;;  %v1798_v37 = vrot.slane %v4699_v53, 4  ;;  %v1801_v43 = vsel %vm786_vm7, %v4699_v53, %v1800_v32 }
 0x41a   : > { %v1785_v36 = vperm.slane %v1777_v25, %v5470_v56  ;;  %v1809_v61 = vperm.slane %v1801_v43, %v5470_v56 }
 0x41b   : > { %v1775_v58 = vsel %vm786_vm7, %v1774_v42, %v4685_v26  ;;  %v1799_v2 = vsel %vm786_vm7, %v1798_v37, %v4684_v62 }
 0x41c   : > { %v1781_v44 = vperm.slane %v1775_v58, %v5470_v56  ;;  %v1822_v55 = vrot.slane %v1785_v36, 4  ;;  %v1805_v17 = vperm.slane %v1799_v2, %v5470_v56  ;;  %v1825_v23 = vsel %vm786_vm7, %v1785_v36, %v1824_v22 }
 0x41d   : > { %v1833_v13 = vperm.slane %v1825_v23, %v5489_v16  ;;  %v1846_v29 = vrot.slane %v1809_v61, 4  ;;  %v1849_v20 = vsel %vm786_vm7, %v1809_v61, %v1848_v9 }
 0x41e   : > { %v1810_v52 = vrot.slane %v1781_v44, 4  ;;  %v1813_v41 = vsel %vm786_vm7, %v1781_v44, %v1812_v50  ;;  %v1823_v26 = vsel %vm786_vm7, %v1822_v55, %v1773_v60  ;;  %v1834_v62 = vrot.slane %v1805_v17, 4 }
 0x41f   : > { %v1821_v1 = vperm.slane %v1813_v41, %v5489_v16  ;;  %v1829_v0 = vperm.slane %v1823_v26, %v5489_v16  ;;  %v1837_v51 = vsel %vm786_vm7, %v1805_v17, %v1836_v15  ;;  %v1847_v18 = vsel %vm786_vm7, %v1846_v29, %v1797_v27 }
 0x420   : > { %v1811_v32 = vsel %vm786_vm7, %v1810_v52, %v1769_v54  ;;  %v1835_v59 = vsel %vm786_vm7, %v1834_v62, %v1793_v4  ;;  %v1845_v33 = vperm.slane %v1837_v51, %v5489_v16  ;;  %v1853_v53 = vperm.slane %v1847_v18, %v5489_v16  ;;  %v2596_v9 = vpop.xlane.xlu1 %2595 }
 0x421   : > { %v1817_v35 = vperm.slane %v1811_v32, %v5489_v16  ;;  %v1841_v60 = vperm.slane %v1835_v59, %v5489_v16  ;;  %v1857_v50 = vperm.slane %v1849_v20, %v5489_v16  ;;  %v1864_v22 = vrot.slane %v1821_v1, 4 }
 0x422   : > { %v1862_v31 = vrot.slane %v1845_v33, 4  ;;  %v1866_v42 = vrot.slane %v1853_v53, 4  ;;  %v1868_v25 = vrot.slane %v1829_v0, 4  ;;  %v1872_v27 = vrot.slane %v1833_v13, 4 }
 0x423   : > { %v1858_v37 = vrot.slane %v1841_v60, 4  ;;  %v1860_v54 = vrot.slane %v1817_v35, 4  ;;  %v1865_v4 = vsel %vm786_vm7, %v1845_v33, %v1864_v22  ;;  %v1870_v43 = vrot.slane %v1857_v50, 4 }
 0x424   : > { %v1873_v15 = vsel %vm786_vm7, %v1857_v50, %v1872_v27  ;;  %4771 = vrcp.f32 %v2596_v9  ;;  %v1863_v36 = vsel %vm786_vm7, %v1862_v31, %v1821_v1  ;;  %v1867_v61 = vsel %vm786_vm7, %v1866_v42, %v1829_v0 }
 0x425   : > { %v1871_v58 = vsel %vm786_vm7, %v1870_v43, %v1833_v13  ;;  %v2022_v2 = vrot.slane %v1873_v15, 4  ;;  %v1859_v44 = vsel %vm786_vm7, %v1858_v37, %v1817_v35  ;;  %v1861_v55 = vsel %vm786_vm7, %v1841_v60, %v1860_v54 }
 0x426   : > { %v2010_v17 = vrot.slane %v1871_v58, 4  ;;  %v1869_v23 = vsel %vm786_vm7, %v1853_v53, %v1868_v25  ;;  %v1986_v29 = vrot.slane %v1863_v36, 4  ;;  %v1988_v20 = vrot.slane %v1859_v44, 4 }
 0x427   : > { %v1998_v52 = vrot.slane %v1865_v4, 4  ;;  %v2000_v41 = vrot.slane %v1861_v55, 4  ;;  %v2012_v26 = vrot.slane %v1867_v61, 4  ;;  %v2023_v62 = vsel %vm786_vm7, %v2022_v2, %v1869_v23 }
 0x428   : > { %v1987_v1 = vsel %vm786_vm7, %v1986_v29, %v1859_v44  ;;  %v2011_v0 = vsel %vm786_vm7, %v2010_v17, %v1867_v61  ;;  %v2024_v13 = vrot.slane %v1869_v23, 4  ;;  %v2029_v51 = vperm.slane %v2023_v62, %v5470_v56 }
 0x429   : > { %v1993_v18 = vperm.slane %v1987_v1, %v5470_v56  ;;  %v1999_v32 = vsel %vm786_vm7, %v1998_v52, %v1861_v55  ;;  %v2017_v59 = vperm.slane %v2011_v0, %v5470_v56  ;;  %v1989_v33 = vsel %vm786_vm7, %v1863_v36, %v1988_v20 }
 0x42a   : > { %v4772_v53 = vpop.eup %4771  ;;  %v2005_v35 = vperm.slane %v1999_v32, %v5470_v56  ;;  %v2058_v60 = vrot.slane %v2029_v51, 4  ;;  %v1997_v50 = vperm.slane %v1989_v33, %v5470_v56  ;;  %v2001_v22 = vsel %vm786_vm7, %v1865_v4, %v2000_v41 }
 0x42b   : > { %v2654_v9 = vmul.f32 %v4772_v53, %v6233_v47  ;;  %v2036_v31 = vrot.slane %v1993_v18, 4  ;;  %v2060_v42 = vrot.slane %v2017_v59, 4  ;;  %v2009_v25 = vperm.slane %v2001_v22, %v5470_v56 }
 0x42c   : > { %v2034_v27 = vrot.slane %v2005_v35, 4  ;;  %v2059_v37 = vsel %vm786_vm7, %v2058_v60, %v2017_v59  ;;  %v2013_v54 = vsel %vm786_vm7, %v1871_v58, %v2012_v26  ;;  %v2025_v43 = vsel %vm786_vm7, %v1873_v15, %v2024_v13 }
 0x42d   : > { %v2065_v36 = vperm.slane %v2059_v37, %v5489_v16  ;;  %v2037_v61 = vsel %vm786_vm7, %v2005_v35, %v2036_v31  ;;  %v2061_v2 = vsel %vm786_vm7, %v2029_v51, %v2060_v42  ;;  %v2021_v4 = vperm.slane %v2013_v54, %v5470_v56 }
 0x42e   : > { %v2035_v47 = vsel %vm786_vm7, %v2034_v27, %v1993_v18  ;;  %v2045_v44 = vperm.slane %v2037_v61, %v5489_v16  ;;  %v2069_v55 = vperm.slane %v2061_v2, %v5489_v16  ;;  %v2033_v17 = vperm.slane %v2025_v43, %v5470_v56 }
 0x42f   : > { %v2041_v58 = vperm.slane %v2035_v47, %v5489_v16  ;;  %v2082_v23 = vrot.slane %v2065_v36, 4  ;;  %v2046_v15 = vrot.slane %v2009_v25, 4  ;;  %v2048_v29 = vrot.slane %v1997_v50, 4 }
 0x430   : > { %v2086_v20 = vrot.slane %v2069_v55, 4  ;;  %v2088_v52 = vrot.slane %v2045_v44, 4  ;;  %v2070_v41 = vrot.slane %v2033_v17, 4  ;;  %v2072_v26 = vrot.slane %v2021_v4, 4 }
 0x431   : > { %v2083_v62 = vsel %vm786_vm7, %v2082_v23, %v2041_v58  ;;  %v2084_v1 = vrot.slane %v2041_v58, 4  ;;  %v2047_v0 = vsel %vm786_vm7, %v2046_v15, %v1997_v50  ;;  %v2049_v13 = vsel %vm786_vm7, %v2009_v25, %v2048_v29 }
 0x432   : > { %2689 = vmatpush.msra.mxu0 %v2083_v62  ;;  %v2087_v51 = vsel %vm786_vm7, %v2086_v20, %v2045_v44  ;;  %v2089_v18 = vsel %vm786_vm7, %v2069_v55, %v2088_v52  ;;  %v2053_v32 = vperm.slane %v2047_v0, %v5489_v16  ;;  %v2071_v59 = vsel %vm786_vm7, %v2070_v41, %v2021_v4 }
 0x433   : > { %2747 = vmatpush.msrb.mxu2 %v2087_v51  ;;  %v2085_v33 = vsel %vm786_vm7, %v2065_v36, %v2084_v1  ;;  %v2077_v53 = vperm.slane %v2071_v59, %v5489_v16  ;;  %v2057_v35 = vperm.slane %v2049_v13, %v5489_v16  ;;  %v2608_v60 = vpop.xlane.xlu2 %2607  ;;  %v2073_v50 = vsel %vm786_vm7, %v2033_v17, %v2072_v26 }
 0x434   : > { %2804 = vmatpush.msrb.mxu0 %v6441_v45  ;;  %2718 = vmatpush.msra.mxu1 %v2085_v33  ;;  %v2209_v22 = vsel %vm786_vm7, %v6405_v39, %v2208_v6  ;;  %v2092_v31 = vrot.slane %v2053_v32, 4  ;;  %4773 = vrcp.f32 %v2608_v60  ;;  %v2205_v42 = vsel %vm786_vm7, %v6411_v49, %v2204_v57 }
 0x435   : > { %2862 = vmatpush.msra.mxu2 %v6431_v3  ;;  %2776 = vmatpush.msrb.mxu3 %v2089_v18  ;;  %v2090_v45 = vrot.slane %v2077_v53, 4  ;;  %v2081_v3 = vperm.slane %v2073_v50, %v5489_v16  ;;  %v2602_v25 = vpop.xlane.xlu1 %2601  ;;  %v2096_v27 = vrot.slane %v2057_v35, 4 }
 0x436   : > { %4529 = vmatmul.msk.f32.vlgmr.msra.gmra.mxu1 %vm2491_vm9, %v2654_v9  ;;  %4775 = vrcp.f32 %v2602_v25  ;;  %v2093_v39 = vsel %vm786_vm7, %v2077_v53, %v2092_v31 }
 0x437   : > { %2833 = vmatpush.msrb.mxu1 %v2205_v42  ;;  %2891 = vmatpush.msra.mxu3 %v2209_v22  ;;  %v2091_v28 = vsel %vm786_vm7, %v2090_v45, %v2053_v32  ;;  %v2094_v6 = vrot.slane %v2081_v3, 4  ;;  %v2097_v9 = vsel %vm786_vm7, %v2081_v3, %v2096_v27 }
 0x438   : > { %2805 = vmatpush.msrb.mxu0 %v2091_v28 }
 0x439   : > { %2834 = vmatpush.msrb.mxu1 %v2093_v39  ;;  %v2095_v40 = vsel %vm786_vm7, %v2094_v6, %v2057_v35  ;;  %2892 = vmatpush.msra.mxu3 %v2097_v9 }
 0x43a   : > { %v4774_v49 = vpop.eup %4773  ;;  %2863 = vmatpush.msra.mxu2 %v2095_v40 }
 0x43b   : > { %v2658_v57 = vmul.f32 %v4774_v49, %v6241_v46 }
 0x43c   : > { %v4776_v37 = vpop.eup %4775 }
 0x43d   : > { %v2656_v54 = vmul.f32 %v4776_v37, %v6246_v14  ;;  %v2605_v43 = vpop.xlane.xlu2 %2604  ;;  %4533 = vmatmul.msk.f32.vlgmr.msrb.gmra.mxu3 %vm2491_vm9, %v2658_v57  ;;  %v2593_v2 = vpop.xlane.xlu1 %2592 }
 0x43e   : > { %4777 = vrcp.f32 %v2605_v43 }
 0x43f   : > { %4531 = vmatmul.msk.f32.vlgmr.msrb.gmra.mxu2 %vm2491_vm9, %v2656_v54 }
 0x441   : > { %v2590_v36 = vpop.xlane.xlu0 %2589 }
 0x442   : > { %4779 = vrcp.f32 %v2590_v36 }
 0x444   : > { %v4778_v61 = vpop.eup %4777 }
 0x445   : > { %v2599_v4 = vpop.xlane.xlu2 %2598  ;;  %v2657_v47 = vmul.f32 %v4778_v61, %v6254_v12 }
 0x446   : > { %4781 = vrcp.f32 %v2599_v4 }
 0x447   : > { %4783 = vrcp.f32 %v2593_v2  ;;  %4532 = vmatmul.msk.f32.gmra.mxu2 %vm2491_vm9, %v2657_v47 }
 0x448   : > { %v4780_v44 = vpop.eup %4779 }
 0x449   : > { %v2652_v46 = vmul.f32 %v4780_v44, %v6261_v24  ;;  %v2611_v14 = vpop.xlane.xlu0 %2610 }
 0x44a   : > { %4785 = vrcp.f32 %v2611_v14 }
 0x44b   : > { %4527 = vmatmul.msk.f32.vlgmr.msra.gmra.mxu0 %vm2491_vm9, %v2652_v46 }
 0x44c   : > { %v4782_v55 = vpop.eup %4781 }
 0x44d   : > { %v2614_v17 = vpop.xlane.xlu2 %2613  ;;  %v2655_v58 = vmul.f32 %v4782_v55, %v6265_v5  ;;  %v4784_v23 = vpop.eup %4783 }
 0x44e   : > { %4787 = vrcp.f32 %v2614_v17  ;;  %v2653_v12 = vmul.f32 %v4784_v23, %v6252_v10 }
 0x44f   : > { %4530 = vmatmul.msk.f32.gmra.mxu1 %vm2491_vm9, %v2655_v58 }
 0x450   : > { %v4786_v15 = vpop.eup %4785 }
 0x451   : > { %v2659_v29 = vmul.f32 %v4786_v15, %v6272_v48 }
 0x453   : > { %4528 = vmatmul.msk.f32.gmra.mxu0 %vm2491_vm9, %v2653_v12  ;;  %4534 = vmatmul.msk.f32.gmra.mxu3 %vm2491_vm9, %v2659_v29  ;;  %v2632_v24 = vpop.xlane.xlu1 %2631 }
 0x454   : > { %4789 = vrcp.f32 %v2632_v24  ;;  %v4788_v20 = vpop.eup %4787 }
 0x455   : > { %v2626_v52 = vpop.xlane.xlu0 %2625  ;;  %v2660_v5 = vmul.f32 %v4788_v20, %v6278_v11 }
 0x456   : > { %4791 = vrcp.f32 %v2626_v52 }
 0x45a   : > { %v4790_v41 = vpop.eup %4789 }
 0x45b   : > { %v2666_v26 = vmul.f32 %v4790_v41, %v6298_v8  ;;  %4535 = vmatmul.msk.f32.vlgmr.msrb.gmra.mxu0 %vm2491_vm9, %v2660_v5 }
 0x45c   : > { %v4792_v62 = vpop.eup %4791 }
 0x45d   : > { %4541 = vmatmul.msk.f32.vlgmr.msra.gmra.mxu3 %vm2491_vm9, %v2666_v26  ;;  %v2664_v10 = vmul.f32 %v4792_v62, %v6305_v7  ;;  %v2620_v48 = vpop.xlane.xlu0 %2619 }
 0x45e   : > { %4793 = vrcp.f32 %v2620_v48 }
 0x45f   : > { %4539 = vmatmul.msk.f32.vlgmr.msra.gmra.mxu2 %vm2491_vm9, %v2664_v10 }
 0x460   : > { %v2629_v1 = vpop.xlane.xlu1 %2628 }
 0x461   : > { %4795 = vrcp.f32 %v2629_v1 }
 0x464   : > { %v4794_v0 = vpop.eup %4793 }
 0x465   : > { %v2662_v13 = vmul.f32 %v4794_v0, %v6300_v21  ;;  %v2617_v11 = vpop.xlane.xlu0 %2616 }
 0x466   : > { %4797 = vrcp.f32 %v2617_v11 }
 0x467   : > { %v4796_v51 = vpop.eup %4795  ;;  %4537 = vmatmul.msk.f32.vlgmr.msrb.gmra.mxu1 %vm2491_vm9, %v2662_v13 }
 0x468   : > { %v2623_v8 = vpop.xlane.xlu1 %2622  ;;  %v2665_v18 = vmul.f32 %v4796_v51, %v6337_v38 }
 0x469   : > { %4799 = vrcp.f32 %v2623_v8 }
 0x46a   : > { %4540 = vmatmul.msk.f32.gmra.mxu2 %vm2491_vm9, %v2665_v18 }
 0x46c   : > { %v4798_v7 = vpop.eup %4797 }
 0x46d   : > { %v2661_v32 = vmul.f32 %v4798_v7, %v6332_v63 }
 0x46f   : > { %v4800_v59 = vpop.eup %4799  ;;  %4536 = vmatmul.msk.f32.gmra.mxu0 %vm2491_vm9, %v2661_v32 }
 0x470   : > { %v2663_v33 = vmul.f32 %v4800_v59, %v6359_v30 }
 0x472   : > { %4538 = vmatmul.msk.f32.gmra.mxu1 %vm2491_vm9, %v2663_v33 }
 0x483   : > { %v2635_v21 = vpop.xlane.xlu2 %2634 }
 0x484   : > { %4801 = vrcp.f32 %v2635_v21 }
 0x48a   : > { %v4802_v53 = vpop.eup %4801 }
 0x48b   : > { %v2667_v35 = vmul.f32 %v4802_v53, %v6388_v19 }
 0x48d   : > { %4542 = vmatmul.msk.f32.gmra.mxu3 %vm2491_vm9, %v2667_v35 }
 0x4b3   : > { %v2720_v22 = vpop.f32.mrf.mxu1 }
 0x4b4   : > { %v2914_v30 = vrot.slane %v2720_v22, 4 }
 0x4c0   : > { %v2778_v60 = vpop.f32.mrf.mxu3 }
 0x4c1   : > { %v2912_v45 = vrot.slane %v2778_v60, 4  ;;  %v2915_v28 = vsel %vm786_vm7, %v2778_v60, %v2914_v30 }
 0x4c2   : > { %v2749_v50 = vpop.f32.mrf.mxu2  ;;  %v2923_v57 = vperm.slane %v2915_v28, %v5470_v56 }
 0x4c3   : > { %v2900_v42 = vrot.slane %v2749_v50, 4  ;;  %v2913_v19 = vsel %vm786_vm7, %v2912_v45, %v2720_v22 }
 0x4c4   : > { %v2919_v49 = vperm.slane %v2913_v19, %v5470_v56  ;;  %v2960_v47 = vrot.slane %v2923_v57, 4 }
 0x4c6   : > { %v2948_v61 = vrot.slane %v2919_v49, 4 }
 0x4c8   : > { %v2691_v38 = vpop.f32.mrf.mxu0 }
 0x4c9   : > { %v2902_v63 = vrot.slane %v2691_v38, 4  ;;  %v2901_v25 = vsel %vm786_vm7, %v2900_v42, %v2691_v38 }
 0x4ca   : > { %v6553_v39 = vpop.f32.mrf.mxu2  ;;  %v2907_v6 = vperm.slane %v2901_v25, %v5470_v56 }
 0x4cb   : > { %v2903_v27 = vsel %vm786_vm7, %v2749_v50, %v2902_v63 }
 0x4cc   : > { %v2911_v9 = vperm.slane %v2903_v27, %v5470_v56  ;;  %v6558_v40 = vpop.f32.mrf.mxu1  ;;  %v2950_v43 = vrot.slane %v2907_v6, 4  ;;  %v2949_v46 = vsel %vm786_vm7, %v2948_v61, %v2907_v6 }
 0x4cd   : > { %v2955_v52 = vperm.slane %v2949_v46, %v5489_v16 }
 0x4ce   : > { %v2962_v36 = vrot.slane %v2911_v9, 4  ;;  %v2951_v17 = vsel %vm786_vm7, %v2919_v49, %v2950_v43  ;;  %v2961_v58 = vsel %vm786_vm7, %v2960_v47, %v2911_v9 }
 0x4cf   : > { %v2959_v26 = vperm.slane %v2951_v17, %v5489_v16  ;;  %v2967_v62 = vperm.slane %v2961_v58, %v5489_v16  ;;  %v2998_v32 = vrot.slane %v2955_v52, 4 }
 0x4d0   : > { %v6546_v31 = vpop.f32.mrf.mxu0  ;;  %v2963_v23 = vsel %vm786_vm7, %v2923_v57, %v2962_v36 }
 0x4d1   : > { %v2971_v10 = vperm.slane %v2963_v23, %v5489_v16  ;;  %v3002_v53 = vrot.slane %v2959_v26, 4  ;;  %v3006_v35 = vrot.slane %v2967_v62, 4 }
 0x4d3   : > { %v3010_v38 = vrot.slane %v2971_v10, 4 }
 0x4d6   : > { %v6548_v3 = vpop.f32.mrf.mxu3 }
 0x4d8   : > { %v2807_v37 = vpop.f32.mrf.mxu0 }
 0x4d9   : > { %v2926_v2 = vrot.slane %v2807_v37, 4 }
 0x4e0   : > { %v2894_v54 = vpop.f32.mrf.mxu3 }
 0x4e1   : > { %v2936_v4 = vrot.slane %v2894_v54, 4 }
 0x4e2   : > { %v2865_v44 = vpop.f32.mrf.mxu2 }
 0x4e3   : > { %v2924_v14 = vrot.slane %v2865_v44, 4  ;;  %v2927_v55 = vsel %vm786_vm7, %v2865_v44, %v2926_v2 }
 0x4e4   : > { %v2935_v15 = vperm.slane %v2927_v55, %v5470_v56  ;;  %v2836_v12 = vpop.f32.mrf.mxu1 }
 0x4e5   : > { %v2925_v29 = vsel %vm786_vm7, %v2924_v14, %v2807_v37  ;;  %v2937_v24 = vsel %vm786_vm7, %v2936_v4, %v2836_v12  ;;  %v2938_v20 = vrot.slane %v2836_v12, 4 }
 0x4e6   : > { %v2931_v5 = vperm.slane %v2925_v29, %v5470_v56  ;;  %v2943_v41 = vperm.slane %v2937_v24, %v5470_v56  ;;  %v2986_v0 = vrot.slane %v2935_v15, 4 }
 0x4e7   : > { %v2939_v48 = vsel %vm786_vm7, %v2894_v54, %v2938_v20 }
 0x4e8   : > { %v2974_v1 = vrot.slane %v2931_v5, 4  ;;  %v2947_v13 = vperm.slane %v2939_v48, %v5470_v56  ;;  %v2972_v11 = vrot.slane %v2943_v41, 4 }
 0x4ea   : > { %v2973_v51 = vsel %vm786_vm7, %v2972_v11, %v2931_v5  ;;  %v2975_v8 = vsel %vm786_vm7, %v2943_v41, %v2974_v1  ;;  %v2984_v18 = vrot.slane %v2947_v13, 4  ;;  %v2987_v7 = vsel %vm786_vm7, %v2947_v13, %v2986_v0 }
 0x4eb   : > { %v2979_v59 = vperm.slane %v2973_v51, %v5489_v16  ;;  %v2983_v33 = vperm.slane %v2975_v8, %v5489_v16  ;;  %v2995_v21 = vperm.slane %v2987_v7, %v5489_v16 }
 0x4ec   : > { %v2985_v60 = vsel %vm786_vm7, %v2984_v18, %v2935_v15 }
 0x4ed   : > { %v2991_v50 = vperm.slane %v2985_v60, %v5489_v16  ;;  %v2996_v22 = vrot.slane %v2979_v59, 4  ;;  %v2999_v63 = vsel %vm786_vm7, %v2979_v59, %v2998_v32  ;;  %v3000_v45 = vrot.slane %v2983_v33, 4 }
 0x4ee   : > { %v3003_v42 = vsel %vm786_vm7, %v2983_v33, %v3002_v53  ;;  %v3008_v30 = vrot.slane %v2995_v21, 4  ;;  %v3011_v25 = vsel %vm786_vm7, %v2995_v21, %v3010_v38  ;;  %v3138_v27 = vrot.slane %v2999_v63, 4 }
 0x4ef   : > { %v2997_v19 = vsel %vm786_vm7, %v2996_v22, %v2955_v52  ;;  %v3001_v28 = vsel %vm786_vm7, %v3000_v45, %v2959_v26  ;;  %v3004_v6 = vrot.slane %v2991_v50, 4  ;;  %v3007_v9 = vsel %vm786_vm7, %v2991_v50, %v3006_v35 }
 0x4f0   : > { %v3124_v49 = vrot.slane %v3001_v28, 4  ;;  %v3126_v57 = vrot.slane %v2997_v19, 4  ;;  %v3136_v37 = vrot.slane %v3003_v42, 4  ;;  %v3139_v43 = vsel %vm786_vm7, %v3003_v42, %v3138_v27 }
 0x4f1   : > { %v3160_v36 = vrot.slane %v3011_v25, 4  ;;  %v3162_v61 = vrot.slane %v3007_v9, 4  ;;  %v3005_v47 = vsel %vm786_vm7, %v3004_v6, %v2967_v62  ;;  %v3009_v44 = vsel %vm786_vm7, %v3008_v30, %v2971_v10 }
 0x4f2   : > { %v3137_v54 = vsel %vm786_vm7, %v3136_v37, %v2999_v63  ;;  %v3127_v2 = vsel %vm786_vm7, %v3001_v28, %v3126_v57  ;;  %v3125_v46 = vsel %vm786_vm7, %v3124_v49, %v2997_v19  ;;  %v3147_v14 = vperm.slane %v3139_v43, %v5470_v56 }
 0x4f3   : > { %v3143_v4 = vperm.slane %v3137_v54, %v5470_v56  ;;  %v3131_v55 = vperm.slane %v3125_v46, %v5470_v56  ;;  %v3148_v17 = vrot.slane %v3009_v44, 4  ;;  %v3150_v58 = vrot.slane %v3005_v47, 4 }
 0x4f4   : > { %v3135_v23 = vperm.slane %v3127_v2, %v5470_v56  ;;  %v3161_v15 = vsel %vm786_vm7, %v3160_v36, %v3007_v9  ;;  %v3163_v12 = vsel %vm786_vm7, %v3011_v25, %v3162_v61  ;;  %v3184_v48 = vrot.slane %v3147_v14, 4 }
 0x4f5   : > { %v3172_v29 = vrot.slane %v3143_v4, 4  ;;  %v3149_v24 = vsel %vm786_vm7, %v3148_v17, %v3005_v47  ;;  %v3151_v20 = vsel %vm786_vm7, %v3009_v44, %v3150_v58  ;;  %v3167_v52 = vperm.slane %v3161_v15, %v5470_v56  ;;  %v2810_v44 = vpop.f32.mrf.mxu0 }
 0x4f6   : > { %v3155_v5 = vperm.slane %v3149_v24, %v5470_v56  ;;  %v3159_v41 = vperm.slane %v3151_v20, %v5470_v56  ;;  %v3171_v26 = vperm.slane %v3163_v12, %v5470_v56  ;;  %v3174_v0 = vrot.slane %v3131_v55, 4 }
 0x4f7   : > { %v3173_v62 = vsel %vm786_vm7, %v3172_v29, %v3131_v55  ;;  %v3196_v1 = vrot.slane %v3167_v52, 4  ;;  %v3186_v11 = vrot.slane %v3135_v23, 4  ;;  %v3185_v18 = vsel %vm786_vm7, %v3184_v48, %v3135_v23  ;;  %v2868_v29 = vpop.f32.mrf.mxu2 }
 0x4f8   : > { %v3179_v10 = vperm.slane %v3173_v62, %v5489_v16  ;;  %v3208_v13 = vrot.slane %v3171_v26, 4  ;;  %v3198_v51 = vrot.slane %v3155_v5, 4  ;;  %v3210_v8 = vrot.slane %v3159_v41, 4 }
 0x4f9   : > { %v3197_v7 = vsel %vm786_vm7, %v3196_v1, %v3155_v5  ;;  %v3175_v59 = vsel %vm786_vm7, %v3143_v4, %v3174_v0  ;;  %v3191_v33 = vperm.slane %v3185_v18, %v5489_v16  ;;  %v3187_v60 = vsel %vm786_vm7, %v3147_v14, %v3186_v11 }
 0x4fa   : > { %v3222_v32 = vrot.slane %v3179_v10, 4  ;;  %v3203_v21 = vperm.slane %v3197_v7, %v5489_v16  ;;  %v3209_v53 = vsel %vm786_vm7, %v3208_v13, %v3159_v41  ;;  %v3183_v35 = vperm.slane %v3175_v59, %v5489_v16 }
 0x4fb   : > { %v3215_v38 = vperm.slane %v3209_v53, %v5489_v16  ;;  %v3199_v50 = vsel %vm786_vm7, %v3167_v52, %v3198_v51  ;;  %v3211_v22 = vsel %vm786_vm7, %v3171_v26, %v3210_v8  ;;  %v3230_v42 = vrot.slane %v3191_v33, 4 }
 0x4fc   : > { %v3220_v63 = vrot.slane %v3203_v21, 4  ;;  %v3223_v45 = vsel %vm786_vm7, %v3203_v21, %v3222_v32  ;;  %v3195_v30 = vperm.slane %v3187_v60, %v5489_v16  ;;  %v3207_v27 = vperm.slane %v3199_v50, %v5489_v16 }
 0x4fd   : > { %v3228_v25 = vrot.slane %v3215_v38, 4  ;;  %v3219_v19 = vperm.slane %v3211_v22, %v5489_v16  ;;  %v3226_v28 = vrot.slane %v3183_v35, 4  ;;  %v3012_v6 = vrot.slane %v6553_v39, 4 }
 0x4fe   : > { %v3014_v9 = vrot.slane %v6546_v31, 4  ;;  %v3231_v49 = vsel %vm786_vm7, %v3215_v38, %v3230_v42  ;;  %v3234_v57 = vrot.slane %v3195_v30, 4  ;;  %v3224_v43 = vrot.slane %v3207_v27, 4 }
 0x4ff   : > { %v4701_v37 = vpack.i.bf16 %v3231_v49, %v3223_v45  ;;  %v3227_v54 = vsel %vm786_vm7, %v3207_v27, %v3226_v28  ;;  %v3232_v36 = vrot.slane %v3219_v19, 4  ;;  %v3026_v61 = vrot.slane %v6558_v40, 4 }
 0x500   : > { %v3024_v2 = vrot.slane %v6548_v3, 4  ;;  %v3235_v4 = vsel %vm786_vm7, %v3219_v19, %v3234_v57  ;;  %v6635_v47 = vsel %vm786_vm7, %v3220_v63, %v3179_v10  ;;  %v3225_v14 = vsel %vm786_vm7, %v3224_v43, %v3183_v35  ;;  %v2839_v10 = vpop.f32.mrf.mxu1 }
 0x501   : > { %4702 = vrot.lane.b32.xlu2 %v4701_v37, %s5146_s28  ;;  %v4711_v46 = vpack.i.bf16 %v3235_v4, %v3227_v54  ;;  %v3233_v55 = vsel %vm786_vm7, %v3232_v36, %v3195_v30  ;;  %v6641_v17 = vsel %vm786_vm7, %v3228_v25, %v3191_v33  ;;  %v3015_v58 = vsel %vm786_vm7, %v6553_v39, %v3014_v9 }
 0x502   : > { %v3027_v23 = vsel %vm786_vm7, %v6548_v3, %v3026_v61  ;;  %v4706_v15 = vpack.i.bf16 %v3233_v55, %v3225_v14  ;;  %v3013_v12 = vsel %vm786_vm7, %v3012_v6, %v6546_v31  ;;  %v3025_v24 = vsel %vm786_vm7, %v3024_v2, %v6558_v40 }
 0x503   : > { %4712 = vrot.lane.b32.xlu1 %v4711_v46, %s5145_s17  ;;  %v3038_v20 = vrot.slane %v2810_v44, 4  ;;  %v3023_v52 = vperm.slane %v3015_v58, %v5470_v56  ;;  %v3035_v39 = vperm.slane %v3027_v23, %v5470_v56  ;;  %v3019_v5 = vperm.slane %v3013_v12, %v5470_v56 }
 0x504   : > { %4707 = vrot.lane.b32.xlu0 %v4706_v15, %s5144_s2  ;;  %v3036_v3 = vrot.slane %v2868_v29, 4  ;;  %v3031_v41 = vperm.slane %v3025_v24, %v5470_v56  ;;  %v3050_v51 = vrot.slane %v2839_v10, 4 }
 0x505   : > { %v3039_v31 = vsel %vm786_vm7, %v2868_v29, %v3038_v20  ;;  %v3074_v26 = vrot.slane %v3023_v52, 4  ;;  %v3072_v62 = vrot.slane %v3035_v39, 4  ;;  %v3062_v48 = vrot.slane %v3019_v5, 4 }
 0x506   : > { %v3037_v40 = vsel %vm786_vm7, %v3036_v3, %v2810_v44  ;;  %v3060_v1 = vrot.slane %v3031_v41, 4  ;;  %v3047_v13 = vperm.slane %v3039_v31, %v5470_v56 }
 0x507   : > { %v3075_v0 = vsel %vm786_vm7, %v3035_v39, %v3074_v26  ;;  %v3063_v11 = vsel %vm786_vm7, %v3031_v41, %v3062_v48  ;;  %v3073_v8 = vsel %vm786_vm7, %v3072_v62, %v3023_v52  ;;  %v3043_v18 = vperm.slane %v3037_v40, %v5470_v56 }
 0x508   : > { %v3083_v32 = vperm.slane %v3075_v0, %v5489_v16  ;;  %v3061_v21 = vsel %vm786_vm7, %v3060_v1, %v3019_v5  ;;  %v3071_v53 = vperm.slane %v3063_v11, %v5489_v16  ;;  %v3098_v35 = vrot.slane %v3047_v13, 4 }
 0x509   : > { %v3079_v60 = vperm.slane %v3073_v8, %v5489_v16  ;;  %v3086_v22 = vrot.slane %v3043_v18, 4  ;;  %v3067_v30 = vperm.slane %v3061_v21, %v5489_v16 }
 0x50a   : > { %v3122_v25 = vrot.slane %v3083_v32, 4  ;;  %v3114_v19 = vrot.slane %v3071_v53, 4 }
 0x50b   : > { %v3118_v43 = vrot.slane %v3079_v60, 4  ;;  %v3110_v14 = vrot.slane %v3067_v30, 4 }
 0x510   : > { %v2897_v7 = vpop.f32.mrf.mxu3 }
 0x511   : > { %v3048_v59 = vrot.slane %v2897_v7, 4  ;;  %v3051_v33 = vsel %vm786_vm7, %v2897_v7, %v3050_v51 }
 0x512   : > { %v3059_v38 = vperm.slane %v3051_v33, %v5470_v56 }
 0x513   : > { %v3049_v50 = vsel %vm786_vm7, %v3048_v59, %v2839_v10 }
 0x514   : > { %v3055_v63 = vperm.slane %v3049_v50, %v5470_v56  ;;  %v3096_v45 = vrot.slane %v3059_v38, 4  ;;  %v3099_v42 = vsel %vm786_vm7, %v3059_v38, %v3098_v35 }
 0x515   : > { %v3107_v27 = vperm.slane %v3099_v42, %v5489_v16 }
 0x516   : > { %v3084_v28 = vrot.slane %v3055_v63, 4  ;;  %v3087_v6 = vsel %vm786_vm7, %v3055_v63, %v3086_v22  ;;  %v3097_v9 = vsel %vm786_vm7, %v3096_v45, %v3047_v13 }
 0x517   : > { %v3095_v49 = vperm.slane %v3087_v6, %v5489_v16  ;;  %v3103_v57 = vperm.slane %v3097_v9, %v5489_v16  ;;  %v3120_v37 = vrot.slane %v3107_v27, 4  ;;  %v3123_v54 = vsel %vm786_vm7, %v3107_v27, %v3122_v25 }
 0x518   : > { %v3085_v36 = vsel %vm786_vm7, %v3084_v28, %v3043_v18  ;;  %v3272_v61 = vrot.slane %v3123_v54, 4 }
 0x519   : > { %v3091_v2 = vperm.slane %v3085_v36, %v5489_v16  ;;  %v3112_v4 = vrot.slane %v3095_v49, 4  ;;  %v3115_v44 = vsel %vm786_vm7, %v3095_v49, %v3114_v19  ;;  %v3116_v46 = vrot.slane %v3103_v57, 4 }
 0x51a   : > { %v3119_v55 = vsel %vm786_vm7, %v3103_v57, %v3118_v43  ;;  %v3121_v58 = vsel %vm786_vm7, %v3120_v37, %v3083_v32  ;;  %v3248_v23 = vrot.slane %v3115_v44, 4 }
 0x51b   : > { %v3108_v15 = vrot.slane %v3091_v2, 4  ;;  %v3113_v12 = vsel %vm786_vm7, %v3112_v4, %v3071_v53  ;;  %v3117_v29 = vsel %vm786_vm7, %v3116_v46, %v3079_v60  ;;  %v3260_v24 = vrot.slane %v3121_v58, 4 }
 0x51c   : > { %v3236_v20 = vrot.slane %v3113_v12, 4  ;;  %v3262_v52 = vrot.slane %v3117_v29, 4  ;;  %v3273_v39 = vsel %vm786_vm7, %v3272_v61, %v3119_v55  ;;  %v3274_v5 = vrot.slane %v3119_v55, 4 }
 0x51d   : > { %v3261_v3 = vsel %vm786_vm7, %v3260_v24, %v3117_v29  ;;  %v3109_v41 = vsel %vm786_vm7, %v3108_v15, %v3067_v30  ;;  %v3111_v31 = vsel %vm786_vm7, %v3091_v2, %v3110_v14  ;;  %v3279_v26 = vperm.slane %v3273_v39, %v5470_v56 }
 0x51e   : > { %v3263_v62 = vsel %vm786_vm7, %v3121_v58, %v3262_v52  ;;  %v3275_v10 = vsel %vm786_vm7, %v3123_v54, %v3274_v5  ;;  %v3237_v48 = vsel %vm786_vm7, %v3236_v20, %v3109_v41  ;;  %v3238_v40 = vrot.slane %v3109_v41, 4  ;;  %v3425_v41 = vld [vmem:[#allocation8 + $0x78] sm:$0xff] }
 0x51f   : > { %v3271_v1 = vperm.slane %v3263_v62, %v5470_v56  ;;  %v3283_v0 = vperm.slane %v3275_v10, %v5470_v56  ;;  %v3243_v13 = vperm.slane %v3237_v48, %v5470_v56  ;;  %v3249_v11 = vsel %vm786_vm7, %v3248_v23, %v3111_v31  ;;  %3446 = vmatpush.msra.mxu0 %v3425_v41  ;;  %v3440_v62 = vld [vmem:[#allocation8 + $0xf0] sm:$0xff]  ;;  %v3423_v10 = vld [vmem:[#allocation8 + $0x68] sm:$0xff] }
 0x520   : > { %v3239_v51 = vsel %vm786_vm7, %v3113_v12, %v3238_v40  ;;  %v3250_v8 = vrot.slane %v3111_v31, 4  ;;  %v3255_v18 = vperm.slane %v3249_v11, %v5470_v56  ;;  %v3267_v7 = vperm.slane %v3261_v3, %v5470_v56  ;;  %v3441_v31 = vld [vmem:[#allocation8 + $0xf8] sm:$0xff]  ;;  %v3439_v48 = vld [vmem:[#allocation8 + $0xe8] sm:$0xff]  ;;  %v3422_v40 = vld [vmem:[#allocation8 + $0x60] sm:$0xff] }
 0x521   : > { %v3247_v32 = vperm.slane %v3239_v51, %v5470_v56  ;;  %v3286_v59 = vrot.slane %v3243_v13, 4  ;;  %v3322_v33 = vrot.slane %v3271_v1, 4  ;;  %v3308_v21 = vrot.slane %v3279_v26, 4  ;;  %3469 = vmatpush.msra.mxu1 %v3441_v31  ;;  %v3420_v11 = vld [vmem:[#allocation8 + $0x50] sm:$0xff]  ;;  %v4731_v31 = vld [vmem:[%s6957_s4] ss:$0 sm:$0xff] }
 0x522   : > { %v3251_v53 = vsel %vm786_vm7, %v3115_v44, %v3250_v8  ;;  %v3310_v35 = vrot.slane %v3267_v7, 4  ;;  %v3284_v38 = vrot.slane %v3255_v18, 4  ;;  %v3320_v60 = vrot.slane %v3283_v0, 4  ;;  %v3436_v51 = vld [vmem:[#allocation8 + $0xd0] sm:$0xff]  ;;  %v3419_v8 = vld [vmem:[#allocation8 + $0x48] sm:$0xff] }
 0x523   : > { %v3259_v50 = vperm.slane %v3251_v53, %v5470_v56  ;;  %v3287_v22 = vsel %vm786_vm7, %v3255_v18, %v3286_v59  ;;  %v3298_v63 = vrot.slane %v3247_v32, 4  ;;  %v3323_v45 = vsel %vm786_vm7, %v3283_v0, %v3322_v33  ;;  %3470 = vmatpush.msra.mxu1 %v3440_v62  ;;  %v3421_v0 = vld [vmem:[#allocation8 + $0x58] sm:$0xff]  ;;  %v3435_v18 = vld [vmem:[#allocation8 + $0xc8] sm:$0xff]  ;;  %v3432_v53 = vld [vmem:[#allocation8 + $0xb0] sm:$0xff] }
 0x524   : > { %v3295_v42 = vperm.slane %v3287_v22, %v5489_v16  ;;  %v3311_v30 = vsel %vm786_vm7, %v3279_v26, %v3310_v35  ;;  %v3331_v25 = vperm.slane %v3323_v45, %v5489_v16  ;;  %v3285_v27 = vsel %vm786_vm7, %v3284_v38, %v3243_v13  ;;  %v3424_v26 = vld [vmem:[#allocation8 + $0x70] sm:$0xff]  ;;  %v3437_v13 = vld [vmem:[#allocation8 + $0xd8] sm:$0xff]  ;;  %v3415_v35 = vld [vmem:[#allocation8 + $0x28] sm:$0xff] }
 0x525   : > { %v3299_v19 = vsel %vm786_vm7, %v3259_v50, %v3298_v63  ;;  %v3319_v28 = vperm.slane %v3311_v30, %v5489_v16  ;;  %v3291_v6 = vperm.slane %v3285_v27, %v5489_v16  ;;  %v3296_v56 = vrot.slane %v3259_v50, 4  ;;  %3447 = vmatpush.msra.mxu0 %v3424_v26  ;;  %3471 = vmatpush.msra.mxu1 %v3439_v48  ;;  %v3417_v59 = vld [vmem:[#allocation8 + $0x38] sm:$0xff]  ;;  %v3431_v38 = vld [vmem:[#allocation8 + $0xa8] sm:$0xff]  ;;  %v3430_v50 = vld [vmem:[#allocation8 + $0xa0] sm:$0xff] }
 0x526   : > { %v3307_v9 = vperm.slane %v3299_v19, %v5489_v16  ;;  %v3344_v49 = vrot.slane %v3331_v25, 4  ;;  %v3309_v57 = vsel %vm786_vm7, %v3308_v21, %v3267_v7  ;;  %v3321_v37 = vsel %vm786_vm7, %v3320_v60, %v3271_v1  ;;  %v3438_v1 = vld [vmem:[#allocation8 + $0xe0] sm:$0xff]  ;;  %v3433_v33 = vld [vmem:[#allocation8 + $0xb8] sm:$0xff]  ;;  %v3416_v21 = vld [vmem:[#allocation8 + $0x30] sm:$0xff] }
 0x527   : > { %v3336_v54 = vrot.slane %v3319_v28, 4  ;;  %v3297_v43 = vsel %vm786_vm7, %v3296_v56, %v3247_v32  ;;  %v3315_v36 = vperm.slane %v3309_v57, %v5489_v16  ;;  %v3327_v61 = vperm.slane %v3321_v37, %v5489_v16  ;;  %3448 = vmatpush.msra.mxu0 %v3423_v10  ;;  %3472 = vmatpush.msra.mxu1 %v3438_v1  ;;  %v3418_v7 = vld [vmem:[#allocation8 + $0x40] sm:$0xff]  ;;  %v3413_v22 = vld [vmem:[#allocation8 + $0x18] sm:$0xff]  ;;  %v3412_v45 = vld [vmem:[#allocation8 + $0x10] sm:$0xff] }
 0x528   : > { %v3345_v2 = vsel %vm786_vm7, %v3344_v49, %v3307_v9  ;;  %v3303_v4 = vperm.slane %v3297_v43, %v5489_v16  ;;  %v3334_v44 = vrot.slane %v3291_v6, 4  ;;  %v3338_v46 = vrot.slane %v3295_v42, 4  ;;  %v3434_v32 = vld [vmem:[#allocation8 + $0xc0] sm:$0xff]  ;;  %v3429_v63 = vld [vmem:[#allocation8 + $0x98] sm:$0xff]  ;;  %v3411_v30 = vld [vmem:[#allocation8 + $0x8] sm:$0xff] }
 0x529   : > { %v3337_v14 = vsel %vm786_vm7, %v3336_v54, %v3295_v42  ;;  %v3332_v55 = vrot.slane %v3315_v36, 4  ;;  %v3346_v58 = vrot.slane %v3307_v9, 4  ;;  %v3340_v15 = vrot.slane %v3327_v61, 4  ;;  %3449 = vmatpush.msra.mxu0 %v3422_v40  ;;  %3473 = vmatpush.msra.mxu1 %v3437_v13  ;;  %v3414_v60 = vld [vmem:[#allocation8 + $0x20] sm:$0xff]  ;;  %v3428_v42 = vld [vmem:[#allocation8 + $0x90] sm:$0xff] }
 0x52a   : > { %v4721_v23 = vpack.i.bf16 %v3345_v2, %v3337_v14  ;;  %v3342_v12 = vrot.slane %v3303_v4, 4  ;;  %v3339_v29 = vsel %vm786_vm7, %v3319_v28, %v3338_v46  ;;  %v3335_v20 = vsel %vm786_vm7, %v3315_v36, %v3334_v44  ;;  %v3410_v27 = vld [vmem:[#allocation8] sm:$0xff] }
 0x52b   : > { %v3347_v24 = vsel %vm786_vm7, %v3331_v25, %v3346_v58  ;;  %v6729_v39 = vsel %vm786_vm7, %v3332_v55, %v3291_v6  ;;  %v6733_v3 = vsel %vm786_vm7, %v3340_v15, %v3303_v4  ;;  %3450 = vmatpush.msra.mxu0 %v3421_v0  ;;  %3474 = vmatpush.msra.mxu1 %v3436_v51  ;;  %v3427_v25 = vld [vmem:[#allocation8 + $0x88] sm:$0xff]  ;;  %v3426_v19 = vld [vmem:[#allocation8 + $0x80] sm:$0xff] }
 0x52c   : > { %4722 = vrot.lane.b32.xlu2 %v4721_v23, %s5144_s2  ;;  %v3343_v52 = vsel %vm786_vm7, %v3327_v61, %v3342_v12  ;;  %v4726_v16 = vpack.i.bf16 %v3347_v24, %v3339_v29 }
 0x52d   : > { %v4716_v5 = vpack.i.bf16 %v3343_v52, %v3335_v20  ;;  %3451 = vmatpush.msra.mxu0 %v3420_v11  ;;  %3475 = vmatpush.msra.mxu1 %v3435_v18  ;;  %v4840_v11 = vld [vmem:[%s5344_s21 + $0x8] sm:$0xff] }
 0x52e   : > { %4727 = vrot.lane.b32.xlu1 %v4726_v16, %s5145_s17 }
 0x52f   : > { %4717 = vrot.lane.b32.xlu0 %v4716_v5, %s5146_s28  ;;  %3452 = vmatpush.msra.mxu0 %v3419_v8 }
 0x530   : > { %3476 = vmatpush.msra.mxu1 %v3434_v32 }
 0x531   : > { %3453 = vmatpush.msra.mxu0 %v3418_v7 }
 0x532   : > { %3477 = vmatpush.msra.mxu1 %v3433_v33  ;;  %v3655_v33 = vld [vmem:[#allocation10 + $0x3c8] sm:$0xff] }
 0x533   : > { %3454 = vmatpush.msra.mxu0 %v3417_v59  ;;  %v3654_v59 = vld [vmem:[#allocation10 + $0x3c0] sm:$0xff]  ;;  %3703 = vmatpush.msrb.mxu3 %v3655_v33  ;;  %v3552_v33 = vld [vmem:[#allocation10 + $0x90] sm:$0xff] }
 0x534   : > { %3478 = vmatpush.msra.mxu1 %v3432_v53  ;;  %3680 = vmatpush.msrb.mxu2 %v3654_v59  ;;  %v3657_v53 = vld [vmem:[#allocation10 + $0x3d8] sm:$0xff]  ;;  %v3551_v59 = vld [vmem:[#allocation10 + $0x88] sm:$0xff] }
 0x535   : > { %3455 = vmatpush.msra.mxu0 %v3416_v21  ;;  %v3656_v21 = vld [vmem:[#allocation10 + $0x3d0] sm:$0xff] }
 0x536   : > { %3479 = vmatpush.msra.mxu1 %v3431_v38  ;;  %v3647_v38 = vld [vmem:[#allocation10 + $0x388] sm:$0xff] }
 0x537   : > { %3456 = vmatpush.msra.mxu0 %v3415_v35  ;;  %v3646_v35 = vld [vmem:[#allocation10 + $0x380] sm:$0xff]  ;;  %3704 = vmatpush.msrb.mxu3 %v3647_v38  ;;  %v3544_v38 = vld [vmem:[#allocation10 + $0x50] sm:$0xff] }
 0x538   : > { %3480 = vmatpush.msra.mxu1 %v3430_v50  ;;  %v3649_v50 = vld [vmem:[#allocation10 + $0x398] sm:$0xff]  ;;  %3681 = vmatpush.msrb.mxu2 %v3646_v35  ;;  %v3543_v35 = vld [vmem:[#allocation10 + $0x48] sm:$0xff] }
 0x539   : > { %3457 = vmatpush.msra.mxu0 %v3414_v60  ;;  %v3648_v60 = vld [vmem:[#allocation10 + $0x390] sm:$0xff] }
 0x53a   : > { %3481 = vmatpush.msra.mxu1 %v3429_v63  ;;  %v3639_v63 = vld [vmem:[#allocation10 + $0x348] sm:$0xff] }
 0x53b   : > { %3458 = vmatpush.msra.mxu0 %v3413_v22  ;;  %v3638_v22 = vld [vmem:[#allocation10 + $0x340] sm:$0xff]  ;;  %3705 = vmatpush.msrb.mxu3 %v3639_v63  ;;  %v3535_v63 = vld [vmem:[#allocation10 + $0x8] sm:$0xff] }
 0x53c   : > { %3482 = vmatpush.msra.mxu1 %v3428_v42  ;;  %v3641_v42 = vld [vmem:[#allocation10 + $0x358] sm:$0xff]  ;;  %3682 = vmatpush.msrb.mxu2 %v3638_v22  ;;  %v3534_v22 = vld [vmem:[#allocation10] sm:$0xff] }
 0x53d   : > { %3459 = vmatpush.msra.mxu0 %v3412_v45  ;;  %v3640_v45 = vld [vmem:[#allocation10 + $0x350] sm:$0xff] }
 0x53e   : > { %3483 = vmatpush.msra.mxu1 %v3427_v25  ;;  %v3631_v25 = vld [vmem:[#allocation10 + $0x308] sm:$0xff] }
 0x53f   : > { %3460 = vmatpush.msra.mxu0 %v3411_v30  ;;  %v3630_v30 = vld [vmem:[#allocation10 + $0x300] sm:$0xff]  ;;  %3706 = vmatpush.msrb.mxu3 %v3631_v25 }
 0x540   : > { %3484 = vmatpush.msra.mxu1 %v3426_v19  ;;  %v3633_v19 = vld [vmem:[#allocation10 + $0x318] sm:$0xff]  ;;  %3683 = vmatpush.msrb.mxu2 %v3630_v30 }
 0x541   : > { %3461 = vmatpush.msra.mxu0 %v3410_v27  ;;  %v3632_v27 = vld [vmem:[#allocation10 + $0x310] sm:$0xff]  ;;  %v3537_v30 = vld [vmem:[#allocation10 + $0x18] sm:$0xff] }
 0x542   : > { %3749 = vmatpush.msrb.mxu1 %v3657_v53  ;;  %v3542_v53 = vld [vmem:[#allocation10 + $0x40] sm:$0xff] }
 0x543   : > { %3726 = vmatpush.msrb.mxu0 %v3656_v21  ;;  %v3553_v21 = vld [vmem:[#allocation10 + $0x98] sm:$0xff] }
 0x544   : > { %3750 = vmatpush.msrb.mxu1 %v3649_v50 }
 0x545   : > { %3727 = vmatpush.msrb.mxu0 %v3648_v60  ;;  %v3545_v60 = vld [vmem:[#allocation10 + $0x58] sm:$0xff] }
 0x546   : > { %3751 = vmatpush.msrb.mxu1 %v3641_v42  ;;  %v3536_v42 = vld [vmem:[#allocation10 + $0x10] sm:$0xff] }
 0x547   : > { %3728 = vmatpush.msrb.mxu0 %v3640_v45 }
 0x548   : > { %3752 = vmatpush.msrb.mxu1 %v3633_v19 }
 0x549   : > { %3729 = vmatpush.msrb.mxu0 %v3632_v27 }
 0x55b   : > { %v4703_v28 = vpop.permute.xlu2 %4702 }
 0x55c   : > { %v4705_v6 = vunpack.i.h.bf16 %v4703_v28  ;;  %v4704_v56 = vunpack.i.l.bf16 %v4703_v28 }
 0x55e   : > { %v3404_v54 = vsel %vm2210_vm8, %v6641_v17, %v4705_v6  ;;  %v3396_v43 = vsel %vm2210_vm8, %v6635_v47, %v4704_v56 }
 0x575   : > { %v4713_v9 = vpop.permute.xlu1 %4712 }
 0x576   : > { %v4708_v49 = vpop.permute.xlu0 %4707  ;;  %v4715_v36 = vunpack.i.h.bf16 %v4713_v9  ;;  %v4714_v61 = vunpack.i.l.bf16 %v4713_v9 }
 0x577   : > { %v4710_v57 = vunpack.i.h.bf16 %v4708_v49  ;;  %v4709_v37 = vunpack.i.l.bf16 %v4708_v49  ;;  %v3622_v49 = vld [vmem:[#allocation10 + $0x2c0] sm:$0xff] }
 0x578   : > { %3684 = vmatpush.msrb.mxu2 %v3622_v49  ;;  %v3658_v49 = vld [vmem:[#allocation10 + $0x3e0] sm:$0xff] }
 0x579   : > { %v3399_v2 = vsel %vm3398_vm10, %v3396_v43, %v4709_v37  ;;  %v3406_v4 = vsel %vm3398_vm10, %v3404_v54, %v4710_v57  ;;  %v3623_v57 = vld [vmem:[#allocation10 + $0x2c8] sm:$0xff]  ;;  %v3624_v37 = vld [vmem:[#allocation10 + $0x2d0] sm:$0xff]  ;;  %v3625_v54 = vld [vmem:[#allocation10 + $0x2d8] sm:$0xff] }
 0x57a   : > { %v3402_v44 = vsel %vm3401_vm11, %v3399_v2, %v4714_v61  ;;  %v3408_v46 = vsel %vm3401_vm11, %v3406_v4, %v4715_v36  ;;  %3707 = vmatpush.msrb.mxu3 %v3623_v57  ;;  %v3614_v43 = vld [vmem:[#allocation10 + $0x280] sm:$0xff]  ;;  %v3615_v36 = vld [vmem:[#allocation10 + $0x288] sm:$0xff]  ;;  %3730 = vmatpush.msrb.mxu0 %v3624_v37  ;;  %v3616_v61 = vld [vmem:[#allocation10 + $0x290] sm:$0xff] }
 0x57b   : > { %3462 = vmatmul.f32.vlgmr.msra.gmra.mxu0 %v3402_v44  ;;  %3485 = vmatmul.f32.vlgmr.msra.gmra.mxu1 %v3408_v46  ;;  %v3617_v2 = vld [vmem:[#allocation10 + $0x298] sm:$0xff]  ;;  %v3606_v4 = vld [vmem:[#allocation10 + $0x240] sm:$0xff]  ;;  %v3607_v44 = vld [vmem:[#allocation10 + $0x248] sm:$0xff] }
 0x57c   : > { %3753 = vmatpush.msrb.mxu1 %v3625_v54  ;;  %3685 = vmatpush.msrb.mxu2 %v3614_v43  ;;  %v3608_v46 = vld [vmem:[#allocation10 + $0x250] sm:$0xff]  ;;  %v3659_v57 = vld [vmem:[#allocation10 + $0x3e8] sm:$0xff]  ;;  %v3661_v54 = vld [vmem:[#allocation10 + $0x3f8] sm:$0xff] }
 0x57d   : > { %3708 = vmatpush.msrb.mxu3 %v3615_v36  ;;  %3731 = vmatpush.msrb.mxu0 %v3616_v61  ;;  %v3660_v37 = vld [vmem:[#allocation10 + $0x3f0] sm:$0xff]  ;;  %v3650_v43 = vld [vmem:[#allocation10 + $0x3a0] sm:$0xff]  ;;  %v3651_v36 = vld [vmem:[#allocation10 + $0x3a8] sm:$0xff] }
 0x57e   : > { %3754 = vmatpush.msrb.mxu1 %v3617_v2  ;;  %3686 = vmatpush.msrb.mxu2 %v3606_v4  ;;  %v3653_v61 = vld [vmem:[#allocation10 + $0x3b8] sm:$0xff]  ;;  %v3642_v2 = vld [vmem:[#allocation10 + $0x360] sm:$0xff]  ;;  %v3643_v4 = vld [vmem:[#allocation10 + $0x368] sm:$0xff] }
 0x57f   : > { %3709 = vmatpush.msrb.mxu3 %v3607_v44  ;;  %3732 = vmatpush.msrb.mxu0 %v3608_v46  ;;  %v3644_v44 = vld [vmem:[#allocation10 + $0x370] sm:$0xff]  ;;  %v3645_v46 = vld [vmem:[#allocation10 + $0x378] sm:$0xff] }
 0x586   : > { %v4723_v14 = vpop.permute.xlu2 %4722 }
 0x587   : > { %v4725_v47 = vunpack.i.h.bf16 %v4723_v14  ;;  %v4724_v29 = vunpack.i.l.bf16 %v4723_v14  ;;  %v3609_v14 = vld [vmem:[#allocation10 + $0x258] sm:$0xff] }
 0x588   : > { %3755 = vmatpush.msrb.mxu1 %v3609_v14  ;;  %v3634_v14 = vld [vmem:[#allocation10 + $0x320] sm:$0xff] }
 0x5a0   : > { %v4728_v55 = vpop.permute.xlu1 %4727 }
 0x5a1   : > { %v4718_v58 = vpop.permute.xlu0 %4717  ;;  %v4730_v15 = vunpack.i.h.bf16 %v4728_v55  ;;  %v4729_v12 = vunpack.i.l.bf16 %v4728_v55  ;;  %v3598_v55 = vld [vmem:[#allocation10 + $0x200] sm:$0xff] }
 0x5a2   : > { %v4720_v23 = vunpack.i.h.bf16 %v4718_v58  ;;  %v4719_v17 = vunpack.i.l.bf16 %v4718_v58  ;;  %v3599_v58 = vld [vmem:[#allocation10 + $0x208] sm:$0xff]  ;;  %3687 = vmatpush.msrb.mxu2 %v3598_v55 }
 0x5a3   : > { %3710 = vmatpush.msrb.mxu3 %v3599_v58  ;;  %v3635_v55 = vld [vmem:[#allocation10 + $0x328] sm:$0xff]  ;;  %v3636_v58 = vld [vmem:[#allocation10 + $0x330] sm:$0xff] }
 0x5a4   : > { %v3397_v24 = vsel %vm2210_vm8, %v6729_v39, %v4719_v17  ;;  %v3405_v20 = vsel %vm2210_vm8, %v6733_v3, %v4720_v23  ;;  %v4839_v3 = vld [vmem:[%s5344_s21] sm:$0xff]  ;;  %s4343_s21 = sshll.u32 %s4340_s22, 4  ;;  %s4344_s21 = int_to_ptr.hbm [resolvable:$true] %s4343_s21 }
 0x5a5   : > { %v3400_v52 = vsel %vm3398_vm10, %v3397_v24, %v4724_v29  ;;  %v3407_v16 = vsel %vm3398_vm10, %v3405_v20, %v4725_v47  ;;  %v3600_v23 = vld [vmem:[#allocation10 + $0x210] sm:$0xff]  ;;  %v3601_v17 = vld [vmem:[#allocation10 + $0x218] sm:$0xff]  ;;  %v3582_v24 = vld [vmem:[#allocation10 + $0x180] sm:$0xff]  ;;  %s5065_s3 = sshra.s32 %s4344_s21, 4  ;;  %s5066_s3 = int_to_ptr.hbm [resolvable:$true] %s5065_s3 }
 0x5a6   : > { %v3403_v5 = vsel %vm3401_vm11, %v3400_v52, %v4729_v12  ;;  %v3409_v41 = vsel %vm3401_vm11, %v3407_v16, %v4730_v15  ;;  %v3590_v15 = vld [vmem:[#allocation10 + $0x1c0] sm:$0xff]  ;;  %v3591_v12 = vld [vmem:[#allocation10 + $0x1c8] sm:$0xff]  ;;  %v3592_v47 = vld [vmem:[#allocation10 + $0x1d0] sm:$0xff]  ;;  %3733 = vmatpush.msrb.mxu0 %v3600_v23  ;;  %3756 = vmatpush.msrb.mxu1 %v3601_v17  ;;  %s5067_s2 = scalar_lea.hbm %s5066_s3, 16  ;;  %p5072_p12 = scmp.lt.s32.totalorder %s5066_s3, %s6962_s9 }
 0x5a7   : > { %3465 = vmatmul.f32.gmra.mxu0 %v3403_v5  ;;  %3488 = vmatmul.f32.gmra.mxu1 %v3409_v41  ;;  %v3593_v29 = vld [vmem:[#allocation10 + $0x1d8] sm:$0xff]  ;;  %v3583_v20 = vld [vmem:[#allocation10 + $0x188] sm:$0xff]  ;;  %v3584_v16 = vld [vmem:[#allocation10 + $0x190] sm:$0xff]  ;;  %p5068_p1 = scmp.ne.s32.totalorder %s5066_s3, %s5067_s2  ;;  %p5073_p7 = scmp.lt.s32.totalorder %s5071_s29, %s5067_s2 }
 0x5a8   : > { %3688 = vmatpush.msrb.mxu2 %v3590_v15  ;;  %3711 = vmatpush.msrb.mxu3 %v3591_v12  ;;  %v3585_v5 = vld [vmem:[#allocation10 + $0x198] sm:$0xff]  ;;  %v3626_v17 = vld [vmem:[#allocation10 + $0x2e0] sm:$0xff]  ;;  %v3627_v15 = vld [vmem:[#allocation10 + $0x2e8] sm:$0xff] }
 0x5a9   : > { %3734 = vmatpush.msrb.mxu0 %v3592_v47  ;;  %3757 = vmatpush.msrb.mxu1 %v3593_v29  ;;  %v3637_v23 = vld [vmem:[#allocation10 + $0x338] sm:$0xff]  ;;  %v3628_v12 = vld [vmem:[#allocation10 + $0x2f0] sm:$0xff]  ;;  %v3618_v29 = vld [vmem:[#allocation10 + $0x2a0] sm:$0xff]  ;;  %p5069_p3 = pnand %p5068_p1, %p5304_p4  ;;  %p5074_p8 = por %p5073_p7, %p5072_p12 }
 0x5aa   : > { %3689 = vmatpush.msrb.mxu2 %v3582_v24  ;;  %3712 = vmatpush.msrb.mxu3 %v3583_v20  ;;  %v3629_v47 = vld [vmem:[#allocation10 + $0x2f8] sm:$0xff]  ;;  %v3619_v24 = vld [vmem:[#allocation10 + $0x2a8] sm:$0xff] }
 0x5ab   : > { %3735 = vmatpush.msrb.mxu0 %v3584_v16  ;;  %3758 = vmatpush.msrb.mxu1 %v3585_v5  ;;  %v3621_v16 = vld [vmem:[#allocation10 + $0x2b8] sm:$0xff]  ;;  %p5070_p5 = pneg %p5069_p3 }
 0x5ad   : > { %p5075_p9 = pnand %p5074_p8, %p5070_p5 }
 0x5f8   : > { %v3463_v26 = vpop.f32.mrf.mxu0  ;;  %v3486_v62 = vpop.f32.mrf.mxu1 }
 0x5f9   : > { %v3464_v39 = vadd.f32 %v4731_v31, %v3463_v26  ;;  %v3575_v26 = vld [vmem:[#allocation10 + $0x148] sm:$0xff] }
 0x5fa   : > { %3713 = vmatpush.msrb.mxu3 %v3575_v26  ;;  %v3612_v26 = vld [vmem:[#allocation10 + $0x270] sm:$0xff] }
 0x5fb   : > { %v3487_v10 = vadd.f32 %v3486_v62, %v3464_v39  ;;  %v3576_v39 = vld [vmem:[#allocation10 + $0x150] sm:$0xff]  ;;  %v3577_v62 = vld [vmem:[#allocation10 + $0x158] sm:$0xff] }
 0x5fc   : > { %3736 = vmatpush.msrb.mxu0 %v3576_v39  ;;  %3759 = vmatpush.msrb.mxu1 %v3577_v62  ;;  %v3613_v39 = vld [vmem:[#allocation10 + $0x278] sm:$0xff] }
 0x5fd   : > { %v6756_v48 = vadd.f32 %v4839_v3, %v3487_v10  ;;  %v3566_v3 = vld [vmem:[#allocation10 + $0x100] sm:$0xff] }
 0x5ff   : > { %3494 = vadd.xlane.f32.xlu0 %v6756_v48 }
 0x624   : > { %v3466_v40 = vpop.f32.mrf.mxu0  ;;  %v3489_v0 = vpop.f32.mrf.mxu1 }
 0x625   : > { %v3467_v1 = vadd.f32 %v4731_v31, %v3466_v40  ;;  %v3574_v31 = vld [vmem:[#allocation10 + $0x140] sm:$0xff]  ;;  %v3567_v40 = vld [vmem:[#allocation10 + $0x108] sm:$0xff] }
 0x626   : > { %3690 = vmatpush.msrb.mxu2 %v3574_v31  ;;  %3714 = vmatpush.msrb.mxu3 %v3567_v40  ;;  %v3611_v31 = vld [vmem:[#allocation10 + $0x268] sm:$0xff]  ;;  %v3604_v40 = vld [vmem:[#allocation10 + $0x230] sm:$0xff] }
 0x627   : > { %v3490_v13 = vadd.f32 %v3489_v0, %v3467_v1  ;;  %v3568_v1 = vld [vmem:[#allocation10 + $0x110] sm:$0xff]  ;;  %v3569_v0 = vld [vmem:[#allocation10 + $0x118] sm:$0xff] }
 0x628   : > { %3691 = vmatpush.msrb.mxu2 %v3566_v3  ;;  %3737 = vmatpush.msrb.mxu0 %v3568_v1  ;;  %v3603_v3 = vld [vmem:[#allocation10 + $0x228] sm:$0xff]  ;;  %v3605_v1 = vld [vmem:[#allocation10 + $0x238] sm:$0xff] }
 0x629   : > { %v6760_v51 = vadd.f32 %v4840_v11, %v3490_v13  ;;  %v3558_v13 = vld [vmem:[#allocation10 + $0xc0] sm:$0xff]  ;;  %v3559_v11 = vld [vmem:[#allocation10 + $0xc8] sm:$0xff]  ;;  %3760 = vmatpush.msrb.mxu1 %v3569_v0 }
 0x62a   : > { %3692 = vmatpush.msrb.mxu2 %v3558_v13  ;;  %3715 = vmatpush.msrb.mxu3 %v3559_v11  ;;  %v3595_v0 = vld [vmem:[#allocation10 + $0x1e8] sm:$0xff]  ;;  %v3596_v13 = vld [vmem:[#allocation10 + $0x1f0] sm:$0xff]  ;;  %v3597_v11 = vld [vmem:[#allocation10 + $0x1f8] sm:$0xff] }
 0x62b   : > { %3496 = vadd.xlane.f32.xlu2 %v6760_v51 }
 0x62c   : > { %3716 = vmatpush.msrb.mxu3 %v3551_v59  ;;  %v3589_v59 = vld [vmem:[#allocation10 + $0x1b8] sm:$0xff] }
 0x62e   : > { %3717 = vmatpush.msrb.mxu3 %v3543_v35  ;;  %v3581_v35 = vld [vmem:[#allocation10 + $0x178] sm:$0xff] }
 0x630   : > { %3718 = vmatpush.msrb.mxu3 %v3535_v63  ;;  %v3572_v63 = vld [vmem:[#allocation10 + $0x130] sm:$0xff] }
 0x632   : > { %3795 = vmatpush.msra.mxu3 %v3659_v57  ;;  %v3556_v57 = vld [vmem:[#allocation10 + $0xb0] sm:$0xff] }
 0x634   : > { %3796 = vmatpush.msra.mxu3 %v3651_v36 }
 0x636   : > { %3797 = vmatpush.msra.mxu3 %v3643_v4  ;;  %v3539_v4 = vld [vmem:[#allocation10 + $0x28] sm:$0xff] }
 0x638   : > { %3798 = vmatpush.msra.mxu3 %v3635_v55  ;;  %v4055_v55 = vld [vmem:[#allocation13 + $0x178] sm:$0xff] }
 0x63a   : > { %3799 = vmatpush.msra.mxu3 %v3627_v15  ;;  %v4054_v15 = vld [vmem:[#allocation13 + $0x170] sm:$0xff] }
 0x63c   : > { %3800 = vmatpush.msra.mxu3 %v3619_v24  ;;  %v4053_v24 = vld [vmem:[#allocation13 + $0x168] sm:$0xff] }
 0x63e   : > { %3801 = vmatpush.msra.mxu3 %v3611_v31  ;;  %v4067_v31 = vld [vmem:[#allocation13 + $0x1d8] sm:$0xff] }
 0x640   : > { %3802 = vmatpush.msra.mxu3 %v3603_v3  ;;  %v4020_v3 = vld [vmem:[#allocation13 + $0x60] sm:$0xff] }
 0x642   : > { %3803 = vmatpush.msra.mxu3 %v3595_v0  ;;  %v4035_v0 = vld [vmem:[#allocation13 + $0xd8] sm:$0xff] }
 0x672   : > { %v3495_v8 = vpop.xlane.xlu0 %3494 }
 0x673   : > { %v3498_v18 = vmul.f32 %v3495_v8, %v5370_v34  ;;  %v3560_v8 = vld [vmem:[#allocation10 + $0xd0] sm:$0xff] }
 0x674   : > { %3738 = vmatpush.msrb.mxu0 %v3560_v8  ;;  %v3586_v8 = vld [vmem:[#allocation10 + $0x1a0] sm:$0xff] }
 0x675   : > { %v6765_v7 = vsub.f32 %v6756_v48, %v3498_v18  ;;  %v3561_v18 = vld [vmem:[#allocation10 + $0xd8] sm:$0xff] }
 0x676   : > { %3761 = vmatpush.msrb.mxu1 %v3561_v18  ;;  %3739 = vmatpush.msrb.mxu0 %v3552_v33  ;;  %v3587_v18 = vld [vmem:[#allocation10 + $0x1a8] sm:$0xff]  ;;  %v3578_v33 = vld [vmem:[#allocation10 + $0x160] sm:$0xff] }
 0x677   : > { %v3502_v32 = vmul.f32 %v6765_v7, %v6765_v7  ;;  %3804 = vmatpush.msra.mxu3 %v3587_v18  ;;  %v4034_v18 = vld [vmem:[#allocation13 + $0xd0] sm:$0xff] }
 0x678   : > { %3762 = vmatpush.msrb.mxu1 %v3553_v21  ;;  %3740 = vmatpush.msrb.mxu0 %v3544_v38  ;;  %v3579_v21 = vld [vmem:[#allocation10 + $0x168] sm:$0xff] }
 0x679   : > { %3504 = vadd.xlane.f32.xlu1 %v3502_v32  ;;  %v3550_v32 = vld [vmem:[#allocation10 + $0x80] sm:$0xff]  ;;  %3805 = vmatpush.msra.mxu3 %v3579_v21  ;;  %v4033_v21 = vld [vmem:[#allocation13 + $0xc8] sm:$0xff] }
 0x67a   : > { %3693 = vmatpush.msrb.mxu2 %v3550_v32  ;;  %3763 = vmatpush.msrb.mxu1 %v3545_v60  ;;  %v3588_v32 = vld [vmem:[#allocation10 + $0x1b0] sm:$0xff]  ;;  %v3570_v60 = vld [vmem:[#allocation10 + $0x120] sm:$0xff] }
 0x67b   : > { %3741 = vmatpush.msrb.mxu0 %v3536_v42  ;;  %v3562_v42 = vld [vmem:[#allocation10 + $0xe0] sm:$0xff] }
 0x67c   : > { %3694 = vmatpush.msrb.mxu2 %v3542_v53  ;;  %3764 = vmatpush.msrb.mxu1 %v3537_v30  ;;  %v3580_v53 = vld [vmem:[#allocation10 + $0x170] sm:$0xff]  ;;  %v3563_v30 = vld [vmem:[#allocation10 + $0xe8] sm:$0xff] }
 0x67d   : > { %3818 = vmatpush.msra.mxu0 %v3660_v37  ;;  %v3557_v37 = vld [vmem:[#allocation10 + $0xb8] sm:$0xff] }
 0x67e   : > { %3695 = vmatpush.msrb.mxu2 %v3534_v22  ;;  %3841 = vmatpush.msra.mxu1 %v3661_v54  ;;  %v3546_v54 = vld [vmem:[#allocation10 + $0x60] sm:$0xff] }
 0x680   : > { %3772 = vmatpush.msra.mxu2 %v3658_v49  ;;  %3842 = vmatpush.msra.mxu1 %v3653_v61  ;;  %v3549_v61 = vld [vmem:[#allocation10 + $0x78] sm:$0xff] }
 0x682   : > { %3773 = vmatpush.msra.mxu2 %v3650_v43  ;;  %3843 = vmatpush.msra.mxu1 %v3645_v46  ;;  %v3547_v43 = vld [vmem:[#allocation10 + $0x68] sm:$0xff]  ;;  %v3540_v46 = vld [vmem:[#allocation10 + $0x30] sm:$0xff] }
 0x684   : > { %3774 = vmatpush.msra.mxu2 %v3642_v2  ;;  %3844 = vmatpush.msra.mxu1 %v3637_v23  ;;  %v3538_v2 = vld [vmem:[#allocation10 + $0x20] sm:$0xff] }
 0x686   : > { %3775 = vmatpush.msra.mxu2 %v3634_v14  ;;  %3845 = vmatpush.msra.mxu1 %v3629_v47  ;;  %v3541_v14 = vld [vmem:[#allocation10 + $0x38] sm:$0xff]  ;;  %v4023_v47 = vld [vmem:[#allocation13 + $0x78] sm:$0xff] }
 0x688   : > { %3776 = vmatpush.msra.mxu2 %v3626_v17  ;;  %3846 = vmatpush.msra.mxu1 %v3621_v16  ;;  %v4022_v16 = vld [vmem:[#allocation13 + $0x70] sm:$0xff] }
 0x68a   : > { %3777 = vmatpush.msra.mxu2 %v3618_v29  ;;  %3847 = vmatpush.msra.mxu1 %v3613_v39  ;;  %v4039_v29 = vld [vmem:[#allocation13 + $0xf8] sm:$0xff]  ;;  %v4037_v39 = vld [vmem:[#allocation13 + $0xe8] sm:$0xff] }
 0x68c   : > { %3848 = vmatpush.msra.mxu1 %v3605_v1  ;;  %v4065_v1 = vld [vmem:[#allocation13 + $0x1c8] sm:$0xff] }
 0x68e   : > { %3849 = vmatpush.msra.mxu1 %v3597_v11  ;;  %v4064_v11 = vld [vmem:[#allocation13 + $0x1c0] sm:$0xff] }
 0x690   : > { %3850 = vmatpush.msra.mxu1 %v3589_v59  ;;  %v4063_v59 = vld [vmem:[#allocation13 + $0x1b8] sm:$0xff] }
 0x692   : > { %3851 = vmatpush.msra.mxu1 %v3581_v35  ;;  %v4062_v35 = vld [vmem:[#allocation13 + $0x1b0] sm:$0xff] }
 0x69e   : > { %v3497_v28 = vpop.xlane.xlu2 %3496 }
 0x69f   : > { %v3499_v6 = vmul.f32 %v3497_v28, %v5370_v34 }
 0x6a1   : > { %v6771_v56 = vsub.f32 %v6760_v51, %v3499_v6 }
 0x6a3   : > { %v3503_v9 = vmul.f32 %v6771_v56, %v6771_v56 }
 0x6a5   : > { %3506 = vadd.xlane.f32.xlu0 %v3503_v9 }
 0x6ec   : > { %v3505_v52 = vpop.xlane.xlu1 %3504 }
 0x6ed   : > { %v3508_v41 = vmul.f32 %v3505_v52, %v5370_v34  ;;  %v3620_v52 = vld [vmem:[#allocation10 + $0x2b0] sm:$0xff] }
 0x6ef   : > { %v3510_v10 = vadd.f32 1e-05, %v3508_v41  ;;  %v3610_v41 = vld [vmem:[#allocation10 + $0x260] sm:$0xff] }
 0x6f0   : > { %3778 = vmatpush.msra.mxu2 %v3610_v41  ;;  %v4051_v41 = vld [vmem:[#allocation13 + $0x158] sm:$0xff] }
 0x6f1   : > { %4803 = vrsqrt.f32 %v3510_v10  ;;  %vm3518_vm13 = vweird.f32 %v3510_v10 }
 0x6f7   : > { %v4804_v50 = vpop.eup %4803 }
 0x6f8   : > { %v3513_v45 = vmul.f32 %v4804_v50, %v3510_v10  ;;  %vm3519_vm12 = vweird.f32 %v4804_v50  ;;  %v3602_v10 = vld [vmem:[#allocation10 + $0x220] sm:$0xff] }
 0x6f9   : > { %vm3520_vm14 = vmor %vm3518_vm13, %vm3519_vm12  ;;  %3779 = vmatpush.msra.mxu2 %v3602_v10  ;;  %v4066_v10 = vld [vmem:[#allocation13 + $0x1d0] sm:$0xff] }
 0x6fa   : > { %v3514_v25 = vmul.f32 %v4804_v50, %v3513_v45  ;;  %v3573_v45 = vld [vmem:[#allocation10 + $0x138] sm:$0xff] }
 0x6fb   : > { %3852 = vmatpush.msra.mxu1 %v3573_v45  ;;  %v4031_v45 = vld [vmem:[#allocation13 + $0xb8] sm:$0xff] }
 0x6fc   : > { %v3515_v27 = vmul.f32 0.5, %v3514_v25 }
 0x6fe   : > { %v3516_v19 = vsub.f32 1.5, %v3515_v27  ;;  %v3564_v27 = vld [vmem:[#allocation10 + $0xf0] sm:$0xff] }
 0x700   : > { %v3517_v28 = vmul.f32 %v4804_v50, %v3516_v19  ;;  %v3565_v19 = vld [vmem:[#allocation10 + $0xf8] sm:$0xff] }
 0x701   : > { %3853 = vmatpush.msra.mxu1 %v3565_v19  ;;  %v4043_v19 = vld [vmem:[#allocation13 + $0x118] sm:$0xff] }
 0x702   : > { %v3521_v6 = vsel %vm3520_vm14, %v4804_v50, %v3517_v28  ;;  %v3571_v50 = vld [vmem:[#allocation10 + $0x128] sm:$0xff]  ;;  %v3554_v28 = vld [vmem:[#allocation10 + $0xa0] sm:$0xff] }
 0x703   : > { %v6777_v9 = vmul.f32 %v3521_v6, %v6765_v7  ;;  %v3652_v7 = vld [vmem:[#allocation10 + $0x3b0] sm:$0xff]  ;;  %3806 = vmatpush.msra.mxu3 %v3571_v50  ;;  %v3555_v6 = vld [vmem:[#allocation10 + $0xa8] sm:$0xff]  ;;  %3854 = vmatpush.msra.mxu1 %v3557_v37  ;;  %v4058_v37 = vld [vmem:[#allocation13 + $0x190] sm:$0xff] }
 0x704   : > { %3819 = vmatpush.msra.mxu0 %v3652_v7  ;;  %v3548_v7 = vld [vmem:[#allocation10 + $0x70] sm:$0xff] }
 0x705   : > { %3696 = vmatmul.f32.vlgmr.msrb.gmra.mxu2 %v6777_v9  ;;  %3719 = vmatmul.f32.vlgmr.msrb.gmra.mxu3 %v6777_v9  ;;  %v4045_v50 = vld [vmem:[#allocation13 + $0x128] sm:$0xff] }
 0x706   : > { %3742 = vmatmul.f32.vlgmr.msrb.gmra.mxu0 %v6777_v9  ;;  %3765 = vmatmul.f32.vlgmr.msrb.gmra.mxu1 %v6777_v9 }
 0x707   : > { %3820 = vmatpush.msra.mxu0 %v3644_v44  ;;  %3807 = vmatpush.msra.mxu3 %v3563_v30  ;;  %v4060_v30 = vld [vmem:[#allocation13 + $0x1a0] sm:$0xff] }
 0x708   : > { %3855 = vmatpush.msra.mxu1 %v3549_v61  ;;  %v4057_v61 = vld [vmem:[#allocation13 + $0x188] sm:$0xff] }
 0x709   : > { %3821 = vmatpush.msra.mxu0 %v3636_v58  ;;  %3808 = vmatpush.msra.mxu3 %v3555_v6  ;;  %v4071_v58 = vld [vmem:[#allocation13 + $0x1f8] sm:$0xff]  ;;  %v4013_v6 = vld [vmem:[#allocation13 + $0x28] sm:$0xff] }
 0x70a   : > { %3856 = vmatpush.msra.mxu1 %v3541_v14 }
 0x70b   : > { %3822 = vmatpush.msra.mxu0 %v3628_v12  ;;  %3809 = vmatpush.msra.mxu3 %v3547_v43  ;;  %v4070_v12 = vld [vmem:[#allocation13 + $0x1f0] sm:$0xff]  ;;  %v4028_v43 = vld [vmem:[#allocation13 + $0xa0] sm:$0xff] }
 0x70c   : > { %4209 = vmatpush.msrb.mxu1 %v4071_v58  ;;  %v4010_v58 = vld [vmem:[#allocation13 + $0x10] sm:$0xff] }
 0x70d   : > { %3823 = vmatpush.msra.mxu0 %v3620_v52  ;;  %3810 = vmatpush.msra.mxu3 %v3539_v4  ;;  %v4052_v52 = vld [vmem:[#allocation13 + $0x160] sm:$0xff]  ;;  %v4027_v4 = vld [vmem:[#allocation13 + $0x98] sm:$0xff] }
 0x70e   : > { %4210 = vmatpush.msrb.mxu1 %v4070_v12 }
 0x70f   : > { %3824 = vmatpush.msra.mxu0 %v3612_v26  ;;  %4163 = vmatpush.msrb.mxu3 %v4039_v29  ;;  %v4021_v26 = vld [vmem:[#allocation13 + $0x68] sm:$0xff] }
 0x711   : > { %3825 = vmatpush.msra.mxu0 %v3604_v40  ;;  %v4049_v40 = vld [vmem:[#allocation13 + $0x148] sm:$0xff] }
 0x713   : > { %3826 = vmatpush.msra.mxu0 %v3596_v13  ;;  %v4048_v13 = vld [vmem:[#allocation13 + $0x140] sm:$0xff] }
 0x715   : > { %3827 = vmatpush.msra.mxu0 %v3588_v32  ;;  %v4047_v32 = vld [vmem:[#allocation13 + $0x138] sm:$0xff] }
 0x717   : > { %3828 = vmatpush.msra.mxu0 %v3580_v53  ;;  %v4046_v53 = vld [vmem:[#allocation13 + $0x130] sm:$0xff] }
 0x718   : > { %v3507_v20 = vpop.xlane.xlu0 %3506 }
 0x719   : > { %v3509_v5 = vmul.f32 %v3507_v20, %v5370_v34  ;;  %v3594_v34 = vld [vmem:[#allocation10 + $0x1e0] sm:$0xff]  ;;  %3829 = vmatpush.msra.mxu0 %v3572_v63  ;;  %v4069_v20 = vld [vmem:[#allocation13 + $0x1e8] sm:$0xff] }
 0x71a   : > { %3780 = vmatpush.msra.mxu2 %v3594_v34  ;;  %4211 = vmatpush.msrb.mxu1 %v4069_v20  ;;  %v4019_v34 = vld [vmem:[#allocation13 + $0x58] sm:$0xff]  ;;  %v4008_v20 = vld [vmem:[#allocation13] sm:$0xff] }
 0x71b   : > { %v6784_v62 = vadd.f32 1e-05, %v3509_v5  ;;  %3830 = vmatpush.msra.mxu0 %v3564_v27  ;;  %v4038_v5 = vld [vmem:[#allocation13 + $0xf0] sm:$0xff]  ;;  %v4015_v63 = vld [vmem:[#allocation13 + $0x38] sm:$0xff] }
 0x71c   : > { %3781 = vmatpush.msra.mxu2 %v3586_v8  ;;  %4164 = vmatpush.msrb.mxu3 %v4038_v5  ;;  %v4018_v8 = vld [vmem:[#allocation13 + $0x50] sm:$0xff] }
 0x71d   : > { %4805 = vrsqrt.f32 %v6784_v62  ;;  %3831 = vmatpush.msra.mxu0 %v3556_v57  ;;  %vm3528_vm0 = vweird.f32 %v6784_v62  ;;  %v4030_v27 = vld [vmem:[#allocation13 + $0xb0] sm:$0xff] }
 0x71e   : > { %3782 = vmatpush.msra.mxu2 %v3578_v33  ;;  %4165 = vmatpush.msrb.mxu3 %v4037_v39  ;;  %v4017_v33 = vld [vmem:[#allocation13 + $0x48] sm:$0xff]  ;;  %v4042_v57 = vld [vmem:[#allocation13 + $0x110] sm:$0xff] }
 0x71f   : > { %3832 = vmatpush.msra.mxu0 %v3548_v7  ;;  %v4041_v7 = vld [vmem:[#allocation13 + $0x108] sm:$0xff] }
 0x720   : > { %3783 = vmatpush.msra.mxu2 %v3570_v60  ;;  %v4032_v60 = vld [vmem:[#allocation13 + $0xc0] sm:$0xff] }
 0x721   : > { %3833 = vmatpush.msra.mxu0 %v3540_v46  ;;  %v4056_v46 = vld [vmem:[#allocation13 + $0x180] sm:$0xff] }
 0x722   : > { %3784 = vmatpush.msra.mxu2 %v3562_v42  ;;  %v4044_v42 = vld [vmem:[#allocation13 + $0x120] sm:$0xff] }
 0x723   : > { %v4806_v38 = vpop.eup %4805  ;;  %4186 = vmatpush.msrb.mxu0 %v4055_v55 }
 0x724   : > { %v3523_v22 = vmul.f32 %v4806_v38, %v6784_v62  ;;  %vm3529_vm15 = vweird.f32 %v4806_v38  ;;  %3785 = vmatpush.msra.mxu2 %v3554_v28  ;;  %v4050_v62 = vld [vmem:[#allocation13 + $0x150] sm:$0xff]  ;;  %v4059_v28 = vld [vmem:[#allocation13 + $0x198] sm:$0xff] }
 0x725   : > { %vm3530_vm1 = vmor %vm3528_vm0, %vm3529_vm15  ;;  %4187 = vmatpush.msrb.mxu0 %v4054_v15  ;;  %v4025_v15 = vld [vmem:[#allocation13 + $0x88] sm:$0xff] }
 0x726   : > { %v3524_v25 = vmul.f32 %v4806_v38, %v3523_v22  ;;  %3786 = vmatpush.msra.mxu2 %v3546_v54  ;;  %v4061_v22 = vld [vmem:[#allocation13 + $0x1a8] sm:$0xff]  ;;  %v4012_v54 = vld [vmem:[#allocation13 + $0x20] sm:$0xff] }
 0x727   : > { %4188 = vmatpush.msrb.mxu0 %v4053_v24 }
 0x728   : > { %v3525_v49 = vmul.f32 0.5, %v3524_v25  ;;  %3787 = vmatpush.msra.mxu2 %v3538_v2  ;;  %v4014_v25 = vld [vmem:[#allocation13 + $0x30] sm:$0xff]  ;;  %v4011_v2 = vld [vmem:[#allocation13 + $0x18] sm:$0xff] }
 0x729   : > { %4189 = vmatpush.msrb.mxu0 %v4052_v52  ;;  %v4024_v52 = vld [vmem:[#allocation13 + $0x80] sm:$0xff] }
 0x72a   : > { %v3526_v36 = vsub.f32 1.5, %v3525_v49  ;;  %4140 = vmatpush.msrb.mxu2 %v4023_v47  ;;  %v4029_v49 = vld [vmem:[#allocation13 + $0xa8] sm:$0xff] }
 0x72b   : > { %4190 = vmatpush.msrb.mxu0 %v4051_v41 }
 0x72c   : > { %v3527_v44 = vmul.f32 %v4806_v38, %v3526_v36  ;;  %4141 = vmatpush.msrb.mxu2 %v4022_v16  ;;  %v6795_v36 = vld [vmem:[#allocation11] sm:$0xff] }
 0x72d   : > { %4191 = vmatpush.msrb.mxu0 %v4050_v62  ;;  %v3666_v14 = vperm.slane %v6795_v36, 2  ;;  %v3667_v55 = vperm.slane %v6795_v36, 3  ;;  %v3665_v16 = vperm.slane %v6795_v36, 1 }
 0x72e   : > { %v3531_v23 = vsel %vm3530_vm1, %v4806_v38, %v3527_v44  ;;  %4142 = vmatpush.msrb.mxu2 %v4021_v26  ;;  %v4016_v38 = vld [vmem:[#allocation13 + $0x40] sm:$0xff] }
 0x72f   : > { %v3533_v17 = vmul.f32 %v3531_v23, %v6771_v56  ;;  %v4068_v56 = vld [vmem:[#allocation13 + $0x1e0] sm:$0xff]  ;;  %4192 = vmatpush.msrb.mxu0 %v4049_v40  ;;  %v4026_v23 = vld [vmem:[#allocation13 + $0x90] sm:$0xff] }
 0x730   : > { %4212 = vmatpush.msrb.mxu1 %v4068_v56  ;;  %4143 = vmatpush.msrb.mxu2 %v4020_v3  ;;  %v4040_v44 = vld [vmem:[#allocation13 + $0x100] sm:$0xff]  ;;  %v3664_v56 = vperm.slane %v6795_v36, 0 }
 0x731   : > { %3699 = vmatmul.f32.gmra.mxu2 %v3533_v17  ;;  %3722 = vmatmul.f32.gmra.mxu3 %v3533_v17 }
 0x732   : > { %3745 = vmatmul.f32.gmra.mxu0 %v3533_v17  ;;  %3768 = vmatmul.f32.gmra.mxu1 %v3533_v17 }
 0x733   : > { %4213 = vmatpush.msrb.mxu1 %v4067_v31  ;;  %4144 = vmatpush.msrb.mxu2 %v4019_v34 }
 0x734   : > { %4193 = vmatpush.msrb.mxu0 %v4048_v13 }
 0x735   : > { %4214 = vmatpush.msrb.mxu1 %v4066_v10  ;;  %4145 = vmatpush.msrb.mxu2 %v4018_v8 }
 0x736   : > { %4194 = vmatpush.msrb.mxu0 %v4047_v32  ;;  %v4135_v32 = vld [vmem:[#allocation13 + $0x3f8] sm:$0xff] }
 0x737   : > { %4215 = vmatpush.msrb.mxu1 %v4065_v1  ;;  %4146 = vmatpush.msrb.mxu2 %v4017_v33 }
 0x738   : > { %4195 = vmatpush.msrb.mxu0 %v4046_v53  ;;  %v4134_v53 = vld [vmem:[#allocation13 + $0x3f0] sm:$0xff] }
 0x739   : > { %3788 = vmatmul.f32.vlgmr.msra.gmra.mxu2 %v6777_v9  ;;  %3811 = vmatmul.f32.vlgmr.msra.gmra.mxu3 %v6777_v9 }
 0x73a   : > { %3834 = vmatmul.f32.vlgmr.msra.gmra.mxu0 %v6777_v9  ;;  %3857 = vmatmul.f32.vlgmr.msra.gmra.mxu1 %v6777_v9  ;;  %v4036_v9 = vld [vmem:[#allocation13 + $0xe0] sm:$0xff] }
 0x73b   : > { %4166 = vmatpush.msrb.mxu3 %v4036_v9  ;;  %4216 = vmatpush.msrb.mxu1 %v4064_v11 }
 0x73c   : > { %4147 = vmatpush.msrb.mxu2 %v4016_v38  ;;  %4196 = vmatpush.msrb.mxu0 %v4045_v50  ;;  %v4133_v50 = vld [vmem:[#allocation13 + $0x3e8] sm:$0xff] }
 0x73d   : > { %4167 = vmatpush.msrb.mxu3 %v4035_v0  ;;  %4217 = vmatpush.msrb.mxu1 %v4063_v59  ;;  %v4118_v59 = vld [vmem:[#allocation13 + $0x370] sm:$0xff] }
 0x73e   : > { %4148 = vmatpush.msrb.mxu2 %v4015_v63  ;;  %4197 = vmatpush.msrb.mxu0 %v4044_v42  ;;  %v4103_v42 = vld [vmem:[#allocation13 + $0x2f8] sm:$0xff] }
 0x73f   : > { %4168 = vmatpush.msrb.mxu3 %v4034_v18  ;;  %4218 = vmatpush.msrb.mxu1 %v4062_v35  ;;  %v4119_v18 = vld [vmem:[#allocation13 + $0x378] sm:$0xff] }
 0x740   : > { %4149 = vmatpush.msrb.mxu2 %v4014_v25  ;;  %4198 = vmatpush.msrb.mxu0 %v4043_v19  ;;  %v4132_v19 = vld [vmem:[#allocation13 + $0x3e0] sm:$0xff] }
 0x741   : > { %3791 = vmatmul.f32.gmra.mxu2 %v3533_v17  ;;  %3814 = vmatmul.f32.gmra.mxu3 %v3533_v17 }
 0x742   : > { %3837 = vmatmul.f32.gmra.mxu0 %v3533_v17  ;;  %3860 = vmatmul.f32.gmra.mxu1 %v3533_v17  ;;  %v4009_v17 = vld [vmem:[#allocation13 + $0x8] sm:$0xff] }
 0x743   : > { %4169 = vmatpush.msrb.mxu3 %v4033_v21  ;;  %4219 = vmatpush.msrb.mxu1 %v4061_v22 }
 0x744   : > { %4150 = vmatpush.msrb.mxu2 %v4013_v6  ;;  %4199 = vmatpush.msrb.mxu0 %v4042_v57 }
 0x745   : > { %4170 = vmatpush.msrb.mxu3 %v4032_v60  ;;  %4220 = vmatpush.msrb.mxu1 %v4060_v30  ;;  %v4117_v60 = vld [vmem:[#allocation13 + $0x368] sm:$0xff]  ;;  %v4116_v30 = vld [vmem:[#allocation13 + $0x360] sm:$0xff] }
 0x746   : > { %4151 = vmatpush.msrb.mxu2 %v4012_v54  ;;  %4200 = vmatpush.msrb.mxu0 %v4041_v7 }
 0x747   : > { %4171 = vmatpush.msrb.mxu3 %v4031_v45  ;;  %4221 = vmatpush.msrb.mxu1 %v4059_v28  ;;  %v4087_v45 = vld [vmem:[#allocation13 + $0x278] sm:$0xff] }
 0x748   : > { %4152 = vmatpush.msrb.mxu2 %v4011_v2  ;;  %4201 = vmatpush.msrb.mxu0 %v4040_v44  ;;  %v4086_v2 = vld [vmem:[#allocation13 + $0x270] sm:$0xff]  ;;  %v4115_v44 = vld [vmem:[#allocation13 + $0x358] sm:$0xff] }
 0x749   : > { %4172 = vmatpush.msrb.mxu3 %v4030_v27  ;;  %4222 = vmatpush.msrb.mxu1 %v4058_v37 }
 0x74a   : > { %4153 = vmatpush.msrb.mxu2 %v4010_v58  ;;  %4278 = vmatpush.msra.mxu0 %v4119_v18  ;;  %v4126_v18 = vld [vmem:[#allocation13 + $0x3b0] sm:$0xff] }
 0x74b   : > { %4173 = vmatpush.msrb.mxu3 %v4029_v49  ;;  %4223 = vmatpush.msrb.mxu1 %v4057_v61 }
 0x74c   : > { %4154 = vmatpush.msrb.mxu2 %v4009_v17  ;;  %4279 = vmatpush.msra.mxu0 %v4118_v59  ;;  %v4131_v17 = vld [vmem:[#allocation13 + $0x3d8] sm:$0xff]  ;;  %v4096_v59 = vld [vmem:[#allocation13 + $0x2c0] sm:$0xff] }
 0x74d   : > { %4174 = vmatpush.msrb.mxu3 %v4028_v43  ;;  %4224 = vmatpush.msrb.mxu1 %v4056_v46 }
 0x74e   : > { %4155 = vmatpush.msrb.mxu2 %v4008_v20  ;;  %4280 = vmatpush.msra.mxu0 %v4117_v60  ;;  %v4130_v20 = vld [vmem:[#allocation13 + $0x3d0] sm:$0xff]  ;;  %v4124_v60 = vld [vmem:[#allocation13 + $0x3a0] sm:$0xff] }
 0x74f   : > { %4175 = vmatpush.msrb.mxu3 %v4027_v4  ;;  %4301 = vmatpush.msra.mxu1 %v4135_v32  ;;  %v4102_v4 = vld [vmem:[#allocation13 + $0x2f0] sm:$0xff]  ;;  %v4080_v32 = vld [vmem:[#allocation13 + $0x240] sm:$0xff] }
 0x750   : > { %4232 = vmatpush.msra.mxu2 %v4087_v45  ;;  %4281 = vmatpush.msra.mxu0 %v4116_v30  ;;  %v4123_v30 = vld [vmem:[#allocation13 + $0x398] sm:$0xff] }
 0x751   : > { %4176 = vmatpush.msrb.mxu3 %v4026_v23  ;;  %4302 = vmatpush.msra.mxu1 %v4134_v53  ;;  %v4079_v53 = vld [vmem:[#allocation13 + $0x238] sm:$0xff] }
 0x752   : > { %4233 = vmatpush.msra.mxu2 %v4086_v2  ;;  %4282 = vmatpush.msra.mxu0 %v4115_v44  ;;  %v3671_v44 = vperm.slane %v6795_v36, 7 }
 0x753   : > { %4177 = vmatpush.msrb.mxu3 %v4025_v15  ;;  %4303 = vmatpush.msra.mxu1 %v4133_v50  ;;  %v4085_v15 = vld [vmem:[#allocation13 + $0x268] sm:$0xff]  ;;  %v4078_v50 = vld [vmem:[#allocation13 + $0x230] sm:$0xff] }
 0x754   : > { %4234 = vmatpush.msra.mxu2 %v4085_v15 }
 0x755   : > { %4178 = vmatpush.msrb.mxu3 %v4024_v52  ;;  %4304 = vmatpush.msra.mxu1 %v4132_v19 }
 0x757   : > { %4255 = vmatpush.msra.mxu3 %v4103_v42  ;;  %4305 = vmatpush.msra.mxu1 %v4131_v17  ;;  %v4104_v17 = vld [vmem:[#allocation13 + $0x300] sm:$0xff] }
 0x759   : > { %4256 = vmatpush.msra.mxu3 %v4102_v4  ;;  %4306 = vmatpush.msra.mxu1 %v4130_v20  ;;  %v3670_v4 = vperm.slane %v6795_v36, 6  ;;  %v4074_v20 = vld [vmem:[#allocation13 + $0x210] sm:$0xff] }
 0x783   : > { %v3743_v12 = vpop.f32.mrf.mxu0  ;;  %v3766_v47 = vpop.f32.mrf.mxu1 }
 0x784   : > { %v3744_v29 = vadd.f32 %v3743_v12, %v3666_v14  ;;  %v3767_v24 = vadd.f32 %v3766_v47, %v3667_v55  ;;  %v4101_v12 = vld [vmem:[#allocation13 + $0x2e8] sm:$0xff] }
 0x785   : > { %4257 = vmatpush.msra.mxu3 %v4101_v12 }
 0x786   : > { %v3882_v5 = vmul.f32 0.044715, %v3744_v29  ;;  %v3883_v41 = vmul.f32 0.044715, %v3767_v24  ;;  %v3866_v49 = vmul.f32 0.5, %v3744_v29  ;;  %v3867_v37 = vmul.f32 0.5, %v3767_v24 }
 0x788   : > { %v3898_v31 = vmul.f32 %v3882_v5, %v3744_v29  ;;  %v3899_v26 = vmul.f32 %v3883_v41, %v3767_v24  ;;  %v3697_v39 = vpop.f32.mrf.mxu2  ;;  %v3720_v62 = vpop.f32.mrf.mxu3  ;;  %v4084_v5 = vld [vmem:[#allocation13 + $0x260] sm:$0xff] }
 0x789   : > { %v3698_v10 = vadd.f32 %v3697_v39, %v3664_v56  ;;  %v3721_v3 = vadd.f32 %v3720_v62, %v3665_v16  ;;  %v4129_v39 = vld [vmem:[#allocation13 + $0x3c8] sm:$0xff]  ;;  %v4083_v62 = vld [vmem:[#allocation13 + $0x258] sm:$0xff]  ;;  %4235 = vmatpush.msra.mxu2 %v4084_v5 }
 0x78a   : > { %v3914_v9 = vmul.f32 %v3898_v31, %v3744_v29  ;;  %v3915_v40 = vmul.f32 %v3899_v26, %v3767_v24  ;;  %v4100_v31 = vld [vmem:[#allocation13 + $0x2e0] sm:$0xff]  ;;  %v4113_v26 = vld [vmem:[#allocation13 + $0x348] sm:$0xff]  ;;  %4307 = vmatpush.msra.mxu1 %v4129_v39 }
 0x78b   : > { %v3880_v1 = vmul.f32 0.044715, %v3698_v10  ;;  %v3881_v34 = vmul.f32 0.044715, %v3721_v3  ;;  %v3864_v58 = vmul.f32 0.5, %v3698_v10  ;;  %v3865_v47 = vmul.f32 0.5, %v3721_v3  ;;  %4258 = vmatpush.msra.mxu3 %v4100_v31  ;;  %4236 = vmatpush.msra.mxu2 %v4083_v62 }
 0x78c   : > { %v3930_v0 = vadd.f32 %v3914_v9, %v3744_v29  ;;  %v3931_v13 = vadd.f32 %v3915_v40, %v3767_v24  ;;  %v4114_v24 = vld [vmem:[#allocation13 + $0x350] sm:$0xff]  ;;  %v4128_v9 = vld [vmem:[#allocation13 + $0x3c0] sm:$0xff] }
 0x78d   : > { %v3896_v11 = vmul.f32 %v3880_v1, %v3698_v10  ;;  %v3897_v8 = vmul.f32 %v3881_v34, %v3721_v3  ;;  %4283 = vmatpush.msra.mxu0 %v4114_v24  ;;  %v4082_v40 = vld [vmem:[#allocation13 + $0x250] sm:$0xff]  ;;  %v4111_v34 = vld [vmem:[#allocation13 + $0x338] sm:$0xff]  ;;  %4308 = vmatpush.msra.mxu1 %v4128_v9  ;;  %v3668_v9 = vperm.slane %v6795_v36, 4 }
 0x78e   : > { %v3946_v33 = vmul.f32 0.7978846, %v3930_v0  ;;  %v3947_v21 = vmul.f32 0.7978846, %v3931_v13  ;;  %v4098_v1 = vld [vmem:[#allocation13 + $0x2d0] sm:$0xff]  ;;  %v4127_v0 = vld [vmem:[#allocation13 + $0x3b8] sm:$0xff]  ;;  %4237 = vmatpush.msra.mxu2 %v4082_v40 }
 0x78f   : > { %v3912_v35 = vmul.f32 %v3896_v11, %v3698_v10  ;;  %v3913_v38 = vmul.f32 %v3897_v8, %v3721_v3  ;;  %4284 = vmatpush.msra.mxu0 %v4113_v26  ;;  %v4081_v13 = vld [vmem:[#allocation13 + $0x248] sm:$0xff]  ;;  %v4110_v8 = vld [vmem:[#allocation13 + $0x330] sm:$0xff]  ;;  %4309 = vmatpush.msra.mxu1 %v4127_v0  ;;  %v3669_v40 = vperm.slane %v6795_v36, 5  ;;  %v4072_v0 = vld [vmem:[#allocation13 + $0x200] sm:$0xff] }
 0x790   : > { %4807 = vtanh.f32 %v3946_v33  ;;  %v4097_v11 = vld [vmem:[#allocation13 + $0x2c8] sm:$0xff]  ;;  %4238 = vmatpush.msra.mxu2 %v4081_v13  ;;  %v4088_v13 = vld [vmem:[#allocation13 + $0x280] sm:$0xff] }
 0x791   : > { %4809 = vtanh.f32 %v3947_v21  ;;  %v3928_v22 = vadd.f32 %v3912_v35, %v3698_v10  ;;  %v3929_v63 = vadd.f32 %v3913_v38, %v3721_v3  ;;  %v4099_v10 = vld [vmem:[#allocation13 + $0x2d8] sm:$0xff]  ;;  %v4112_v3 = vld [vmem:[#allocation13 + $0x340] sm:$0xff]  ;;  %v4109_v33 = vld [vmem:[#allocation13 + $0x328] sm:$0xff]  ;;  %4310 = vmatpush.msra.mxu1 %v4126_v18 }
 0x792   : > { %4259 = vmatpush.msra.mxu3 %v4099_v10  ;;  %4285 = vmatpush.msra.mxu0 %v4112_v3  ;;  %v4125_v21 = vld [vmem:[#allocation13 + $0x3a8] sm:$0xff]  ;;  %v4095_v35 = vld [vmem:[#allocation13 + $0x2b8] sm:$0xff]  ;;  %v4108_v38 = vld [vmem:[#allocation13 + $0x320] sm:$0xff] }
 0x793   : > { %v3944_v25 = vmul.f32 0.7978846, %v3928_v22  ;;  %v3945_v27 = vmul.f32 0.7978846, %v3929_v63  ;;  %4239 = vmatpush.msra.mxu2 %v4080_v32  ;;  %4311 = vmatpush.msra.mxu1 %v4125_v21  ;;  %v4094_v22 = vld [vmem:[#allocation13 + $0x2b0] sm:$0xff]  ;;  %v4107_v63 = vld [vmem:[#allocation13 + $0x318] sm:$0xff] }
 0x794   : > { %4260 = vmatpush.msra.mxu3 %v4098_v1  ;;  %4286 = vmatpush.msra.mxu0 %v4111_v34  ;;  %v4073_v10 = vld [vmem:[#allocation13 + $0x208] sm:$0xff] }
 0x795   : > { %4811 = vtanh.f32 %v3944_v25  ;;  %4240 = vmatpush.msra.mxu2 %v4079_v53  ;;  %v4077_v25 = vld [vmem:[#allocation13 + $0x228] sm:$0xff]  ;;  %4312 = vmatpush.msra.mxu1 %v4124_v60 }
 0x796   : > { %v4808_v28 = vpop.eup %4807  ;;  %4813 = vtanh.f32 %v3945_v27  ;;  %4261 = vmatpush.msra.mxu3 %v4097_v11  ;;  %4287 = vmatpush.msra.mxu0 %v4110_v8  ;;  %v4089_v3 = vld [vmem:[#allocation13 + $0x288] sm:$0xff] }
 0x797   : > { %v4810_v6 = vpop.eup %4809  ;;  %v3978_v57 = vadd.f32 1.0, %v4808_v28  ;;  %4241 = vmatpush.msra.mxu2 %v4078_v50  ;;  %v4093_v28 = vld [vmem:[#allocation13 + $0x2a8] sm:$0xff]  ;;  %4313 = vmatpush.msra.mxu1 %v4123_v30 }
 0x798   : > { %v3979_v54 = vadd.f32 1.0, %v4810_v6  ;;  %4262 = vmatpush.msra.mxu3 %v4096_v59  ;;  %4288 = vmatpush.msra.mxu0 %v4109_v33  ;;  %v4106_v6 = vld [vmem:[#allocation13 + $0x310] sm:$0xff] }
 0x799   : > { %v3994_v43 = vmul.f32 %v3978_v57, %v3866_v49  ;;  %v4122_v49 = vld [vmem:[#allocation13 + $0x390] sm:$0xff]  ;;  %v4076_v57 = vld [vmem:[#allocation13 + $0x220] sm:$0xff]  ;;  %4242 = vmatpush.msra.mxu2 %v4077_v25 }
 0x79a   : > { %v3995_v7 = vmul.f32 %v3979_v54, %v3867_v37  ;;  %4263 = vmatpush.msra.mxu3 %v4095_v35  ;;  %4289 = vmatpush.msra.mxu0 %v4108_v38 }
 0x79b   : > { %v4812_v61 = vpop.eup %4811  ;;  %4202 = vmatmul.f32.vlgmr.msrb.gmra.mxu0 %v3994_v43  ;;  %v4105_v43 = vld [vmem:[#allocation13 + $0x308] sm:$0xff]  ;;  %4314 = vmatpush.msra.mxu1 %v4122_v49 }
 0x79c   : > { %v4814_v46 = vpop.eup %4813  ;;  %4225 = vmatmul.f32.vlgmr.msrb.gmra.mxu1 %v3995_v7  ;;  %v3976_v23 = vadd.f32 1.0, %v4812_v61  ;;  %4264 = vmatpush.msra.mxu3 %v4094_v22  ;;  %v4075_v7 = vld [vmem:[#allocation13 + $0x218] sm:$0xff] }
 0x79d   : > { %v3977_v29 = vadd.f32 1.0, %v4814_v46  ;;  %4290 = vmatpush.msra.mxu0 %v4107_v63  ;;  %4243 = vmatpush.msra.mxu2 %v4076_v57 }
 0x79e   : > { %v3992_v52 = vmul.f32 %v3976_v23, %v3864_v58  ;;  %4265 = vmatpush.msra.mxu3 %v4093_v28  ;;  %v4091_v23 = vld [vmem:[#allocation13 + $0x298] sm:$0xff] }
 0x79f   : > { %v3993_v41 = vmul.f32 %v3977_v29, %v3865_v47  ;;  %4291 = vmatpush.msra.mxu0 %v4106_v6  ;;  %v4120_v47 = vld [vmem:[#allocation13 + $0x380] sm:$0xff]  ;;  %4244 = vmatpush.msra.mxu2 %v4075_v7 }
 0x7a0   : > { %4156 = vmatmul.f32.vlgmr.msrb.gmra.mxu2 %v3992_v52  ;;  %v4090_v52 = vld [vmem:[#allocation13 + $0x290] sm:$0xff] }
 0x7a1   : > { %4179 = vmatmul.f32.vlgmr.msrb.gmra.mxu3 %v3993_v41  ;;  %4292 = vmatpush.msra.mxu0 %v4105_v43 }
 0x7a2   : > { %4245 = vmatpush.msra.mxu2 %v4074_v20 }
 0x7a3   : > { %4293 = vmatpush.msra.mxu0 %v4104_v17 }
 0x7a4   : > { %4246 = vmatpush.msra.mxu2 %v4073_v10 }
 0x7a6   : > { %4247 = vmatpush.msra.mxu2 %v4072_v0 }
 0x7af   : > { %v3746_v45 = vpop.f32.mrf.mxu0  ;;  %v3769_v42 = vpop.f32.mrf.mxu1 }
 0x7b0   : > { %v6811_v27 = vadd.f32 %v3746_v45, %v3666_v14  ;;  %v6815_v19 = vadd.f32 %v3769_v42, %v3667_v55  ;;  %v4092_v14 = vld [vmem:[#allocation13 + $0x2a0] sm:$0xff]  ;;  %v4121_v55 = vld [vmem:[#allocation13 + $0x388] sm:$0xff] }
 0x7b1   : > { %4266 = vmatpush.msra.mxu3 %v4092_v14  ;;  %4315 = vmatpush.msra.mxu1 %v4121_v55 }
 0x7b2   : > { %v3890_v37 = vmul.f32 0.044715, %v6811_v27  ;;  %v3891_v54 = vmul.f32 0.044715, %v6815_v19 }
 0x7b3   : > { %4267 = vmatpush.msra.mxu3 %v4091_v23  ;;  %4316 = vmatpush.msra.mxu1 %v4120_v47 }
 0x7b4   : > { %v3700_v61 = vpop.f32.mrf.mxu2  ;;  %v3723_v2 = vpop.f32.mrf.mxu3  ;;  %v3906_v46 = vmul.f32 %v3890_v37, %v6811_v27  ;;  %v3907_v58 = vmul.f32 %v3891_v54, %v6815_v19  ;;  %v3874_v37 = vmul.f32 0.5, %v6811_v27 }
 0x7b5   : > { %v6825_v15 = vadd.f32 %v3700_v61, %v3664_v56  ;;  %v6829_v12 = vadd.f32 %v3723_v2, %v3665_v16  ;;  %4268 = vmatpush.msra.mxu3 %v4090_v52 }
 0x7b6   : > { %v3922_v29 = vmul.f32 %v3906_v46, %v6811_v27  ;;  %v3923_v24 = vmul.f32 %v3907_v58, %v6815_v19 }
 0x7b7   : > { %v3835_v5 = vpop.f32.mrf.mxu0  ;;  %v3858_v41 = vpop.f32.mrf.mxu1  ;;  %v3888_v56 = vmul.f32 0.044715, %v6825_v15  ;;  %v3889_v31 = vmul.f32 0.044715, %v6829_v12  ;;  %4269 = vmatpush.msra.mxu3 %v4089_v3  ;;  %v3872_v52 = vmul.f32 0.5, %v6825_v15 }
 0x7b8   : > { %v6837_v16 = vadd.f32 %v3835_v5, %v3670_v4  ;;  %v6841_v26 = vadd.f32 %v3858_v41, %v3671_v44  ;;  %v3938_v39 = vadd.f32 %v3922_v29, %v6811_v27  ;;  %v3939_v62 = vadd.f32 %v3923_v24, %v6815_v19 }
 0x7b9   : > { %v3904_v1 = vmul.f32 %v3888_v56, %v6825_v15  ;;  %v3905_v34 = vmul.f32 %v3889_v31, %v6829_v12  ;;  %4270 = vmatpush.msra.mxu3 %v4088_v13 }
 0x7ba   : > { %v3886_v11 = vmul.f32 0.044715, %v6837_v16  ;;  %v3887_v8 = vmul.f32 0.044715, %v6841_v26  ;;  %v3954_v18 = vmul.f32 0.7978846, %v3938_v39 }
 0x7bb   : > { %v3955_v32 = vmul.f32 0.7978846, %v3939_v62  ;;  %v3920_v59 = vmul.f32 %v3904_v1, %v6825_v15  ;;  %v3921_v33 = vmul.f32 %v3905_v34, %v6829_v12  ;;  %v3870_v10 = vmul.f32 0.5, %v6837_v16 }
 0x7bc   : > { %v3902_v21 = vmul.f32 %v3886_v11, %v6837_v16  ;;  %v3903_v53 = vmul.f32 %v3887_v8, %v6841_v26  ;;  %v3789_v35 = vpop.f32.mrf.mxu2  ;;  %v3812_v38 = vpop.f32.mrf.mxu3  ;;  %4815 = vtanh.f32 %v3954_v18  ;;  %v3871_v8 = vmul.f32 0.5, %v6841_v26 }
 0x7bd   : > { %v6855_v60 = vadd.f32 %v3789_v35, %v3668_v9  ;;  %v6857_v50 = vadd.f32 %v3812_v38, %v3669_v40  ;;  %4817 = vtanh.f32 %v3955_v32  ;;  %v3936_v22 = vadd.f32 %v3920_v59, %v6825_v15 }
 0x7be   : > { %v3918_v63 = vmul.f32 %v3902_v21, %v6837_v16  ;;  %v3919_v45 = vmul.f32 %v3903_v53, %v6841_v26  ;;  %v3937_v42 = vadd.f32 %v3921_v33, %v6829_v12  ;;  %v3873_v15 = vmul.f32 0.5, %v6829_v12 }
 0x7bf   : > { %v3884_v30 = vmul.f32 0.044715, %v6855_v60  ;;  %v3885_v25 = vmul.f32 0.044715, %v6857_v50  ;;  %v3838_v28 = vpop.f32.mrf.mxu0  ;;  %v3861_v6 = vpop.f32.mrf.mxu1  ;;  %v3952_v49 = vmul.f32 0.7978846, %v3936_v22 }
 0x7c0   : > { %v6867_v57 = vadd.f32 %v3838_v28, %v3670_v4  ;;  %v3953_v54 = vmul.f32 0.7978846, %v3937_v42  ;;  %v3934_v14 = vadd.f32 %v3918_v63, %v6837_v16  ;;  %v3935_v7 = vadd.f32 %v3919_v45, %v6841_v26 }
 0x7c1   : > { %v3900_v43 = vmul.f32 %v3884_v30, %v6855_v60  ;;  %v3901_v55 = vmul.f32 %v3885_v25, %v6857_v50  ;;  %4819 = vtanh.f32 %v3952_v49  ;;  %v6876_v2 = vadd.f32 %v3861_v6, %v3671_v44 }
 0x7c2   : > { %v4816_v61 = vpop.eup %4815  ;;  %v3875_v4 = vmul.f32 0.5, %v6815_v19  ;;  %4821 = vtanh.f32 %v3953_v54  ;;  %v3950_v46 = vmul.f32 0.7978846, %v3934_v14  ;;  %v3951_v47 = vmul.f32 0.7978846, %v3935_v7 }
 0x7c3   : > { %v4818_v27 = vpop.eup %4817  ;;  %v3916_v58 = vmul.f32 %v3900_v43, %v6855_v60  ;;  %v3917_v23 = vmul.f32 %v3901_v55, %v6857_v50  ;;  %v3986_v17 = vadd.f32 1.0, %v4816_v61  ;;  %v3894_v36 = vmul.f32 0.044715, %v6867_v57 }
 0x7c4   : > { %v3792_v29 = vpop.f32.mrf.mxu2  ;;  %v3815_v24 = vpop.f32.mrf.mxu3  ;;  %v3987_v20 = vadd.f32 1.0, %v4818_v27  ;;  %4823 = vtanh.f32 %v3950_v46  ;;  %v3895_v3 = vmul.f32 0.044715, %v6876_v2  ;;  %v3868_v55 = vmul.f32 0.5, %v6855_v60 }
 0x7c5   : > { %v6883_v44 = vadd.f32 %v3792_v29, %v3668_v9  ;;  %v6885_v19 = vadd.f32 %v3815_v24, %v3669_v40  ;;  %v4002_v5 = vmul.f32 %v3986_v17, %v3874_v37  ;;  %4825 = vtanh.f32 %v3951_v47 }
 0x7c6   : > { %v4003_v41 = vmul.f32 %v3987_v20, %v3875_v4  ;;  %v3932_v56 = vadd.f32 %v3916_v58, %v6855_v60  ;;  %v3933_v31 = vadd.f32 %v3917_v23, %v6857_v50  ;;  %v3910_v39 = vmul.f32 %v3894_v36, %v6867_v57 }
 0x7c7   : > { %v4820_v62 = vpop.eup %4819  ;;  %4205 = vmatmul.f32.gmra.mxu0 %v4002_v5  ;;  %v3892_v9 = vmul.f32 0.044715, %v6883_v44  ;;  %v3911_v18 = vmul.f32 %v3895_v3, %v6876_v2  ;;  %v3893_v33 = vmul.f32 0.044715, %v6885_v19  ;;  %v3869_v61 = vmul.f32 0.5, %v6857_v50 }
 0x7c8   : > { %v4822_v40 = vpop.eup %4821  ;;  %4228 = vmatmul.f32.gmra.mxu1 %v4003_v41  ;;  %v3984_v1 = vadd.f32 1.0, %v4820_v62  ;;  %v3948_v34 = vmul.f32 0.7978846, %v3932_v56  ;;  %v3949_v0 = vmul.f32 0.7978846, %v3933_v31  ;;  %v3926_v13 = vmul.f32 %v3910_v39, %v6867_v57 }
 0x7c9   : > { %v3985_v11 = vadd.f32 1.0, %v4822_v40  ;;  %v3908_v12 = vmul.f32 %v3892_v9, %v6883_v44  ;;  %v3927_v38 = vmul.f32 %v3911_v18, %v6876_v2  ;;  %v3909_v45 = vmul.f32 %v3893_v33, %v6885_v19  ;;  %v4732_v62 = vld [vmem:[%s6961_s8] ss:$0 sm:$0xff] }
 0x7ca   : > { %v4824_v32 = vpop.eup %4823  ;;  %v4000_v16 = vmul.f32 %v3984_v1, %v3872_v52  ;;  %4827 = vtanh.f32 %v3948_v34  ;;  %v3942_v59 = vadd.f32 %v3926_v13, %v6867_v57  ;;  %v3878_v17 = vmul.f32 0.5, %v6867_v57 }
 0x7cb   : > { %v4826_v21 = vpop.eup %4825  ;;  %v4001_v53 = vmul.f32 %v3985_v11, %v3873_v15  ;;  %v3982_v35 = vadd.f32 1.0, %v4824_v32  ;;  %4829 = vtanh.f32 %v3949_v0  ;;  %v3924_v63 = vmul.f32 %v3908_v12, %v6883_v44 }
 0x7cc   : > { %4159 = vmatmul.f32.gmra.mxu2 %v4000_v16  ;;  %v3983_v22 = vadd.f32 1.0, %v4826_v21  ;;  %v3958_v26 = vmul.f32 0.7978846, %v3942_v59  ;;  %v3943_v30 = vadd.f32 %v3927_v38, %v6876_v2  ;;  %v3925_v6 = vmul.f32 %v3909_v45, %v6885_v19 }
 0x7cd   : > { %4182 = vmatmul.f32.gmra.mxu3 %v4001_v53  ;;  %v3998_v42 = vmul.f32 %v3982_v35, %v3870_v10  ;;  %v3940_v28 = vadd.f32 %v3924_v63, %v6883_v44  ;;  %v3879_v60 = vmul.f32 0.5, %v6876_v2  ;;  %v3876_v50 = vmul.f32 0.5, %v6883_v44 }
 0x7ce   : > { %v3999_v25 = vmul.f32 %v3983_v22, %v3871_v8  ;;  %4831 = vtanh.f32 %v3958_v26  ;;  %v3959_v49 = vmul.f32 0.7978846, %v3943_v30  ;;  %v3941_v14 = vadd.f32 %v3925_v6, %v6885_v19 }
 0x7cf   : > { %4294 = vmatmul.f32.vlgmr.msra.gmra.mxu0 %v3998_v42  ;;  %v3956_v54 = vmul.f32 0.7978846, %v3940_v28  ;;  %v3877_v31 = vmul.f32 0.5, %v6885_v19 }
 0x7d0   : > { %v4828_v37 = vpop.eup %4827  ;;  %4317 = vmatmul.f32.vlgmr.msra.gmra.mxu1 %v3999_v25  ;;  %4833 = vtanh.f32 %v3959_v49  ;;  %v3957_v46 = vmul.f32 0.7978846, %v3941_v14 }
 0x7d1   : > { %v4830_v43 = vpop.eup %4829  ;;  %v3980_v7 = vadd.f32 1.0, %v4828_v37  ;;  %4835 = vtanh.f32 %v3956_v54 }
 0x7d2   : > { %v3981_v4 = vadd.f32 1.0, %v4830_v43  ;;  %4837 = vtanh.f32 %v3957_v46 }
 0x7d3   : > { %v3996_v27 = vmul.f32 %v3980_v7, %v3868_v55 }
 0x7d4   : > { %v4832_v58 = vpop.eup %4831  ;;  %v3997_v23 = vmul.f32 %v3981_v4, %v3869_v61 }
 0x7d5   : > { %4248 = vmatmul.f32.vlgmr.msra.gmra.mxu2 %v3996_v27  ;;  %v3990_v47 = vadd.f32 1.0, %v4832_v58 }
 0x7d6   : > { %4271 = vmatmul.f32.vlgmr.msra.gmra.mxu3 %v3997_v23  ;;  %v4834_v29 = vpop.eup %4833 }
 0x7d7   : > { %v4006_v24 = vmul.f32 %v3990_v47, %v3878_v17  ;;  %v4836_v20 = vpop.eup %4835  ;;  %v3991_v52 = vadd.f32 1.0, %v4834_v29 }
 0x7d8   : > { %v3988_v36 = vadd.f32 1.0, %v4836_v20  ;;  %v4838_v5 = vpop.eup %4837 }
 0x7d9   : > { %4297 = vmatmul.f32.gmra.mxu0 %v4006_v24  ;;  %v4007_v41 = vmul.f32 %v3991_v52, %v3879_v60  ;;  %v3989_v39 = vadd.f32 1.0, %v4838_v5 }
 0x7da   : > { %v4004_v56 = vmul.f32 %v3988_v36, %v3876_v50 }
 0x7db   : > { %4320 = vmatmul.f32.gmra.mxu1 %v4007_v41  ;;  %v4005_v57 = vmul.f32 %v3989_v39, %v3877_v31 }
 0x7dd   : > { %4251 = vmatmul.f32.gmra.mxu2 %v4004_v56 }
 0x7de   : > { %4274 = vmatmul.f32.gmra.mxu3 %v4005_v57 }
 0x818   : > { %v4203_v15 = vpop.f32.mrf.mxu0 }
 0x819   : > { %v4226_v3 = vpop.f32.mrf.mxu1 }
 0x823   : > { %v4157_v2 = vpop.f32.mrf.mxu2 }
 0x824   : > { %v4180_v10 = vpop.f32.mrf.mxu3  ;;  %v4158_v44 = vadd.f32 %v4732_v62, %v4157_v2 }
 0x826   : > { %v4181_v9 = vadd.f32 %v4180_v10, %v4158_v44 }
 0x828   : > { %v4204_v19 = vadd.f32 %v4203_v15, %v4181_v9 }
 0x82a   : > { %v4227_v8 = vadd.f32 %v4226_v3, %v4204_v19 }
 0x844   : > { %v4206_v1 = vpop.f32.mrf.mxu0 }
 0x845   : > { %v4229_v0 = vpop.f32.mrf.mxu1 }
 0x84c   : > { %v4295_v16 = vpop.f32.mrf.mxu0 }
 0x84d   : > { %v4318_v21 = vpop.f32.mrf.mxu1 }
 0x84f   : > { %v4160_v40 = vpop.f32.mrf.mxu2 }
 0x850   : > { %v4183_v34 = vpop.f32.mrf.mxu3  ;;  %v4161_v13 = vadd.f32 %v4732_v62, %v4160_v40 }
 0x852   : > { %v4184_v11 = vadd.f32 %v4183_v34, %v4161_v13 }
 0x854   : > { %v4207_v59 = vadd.f32 %v4206_v1, %v4184_v11 }
 0x856   : > { %v4230_v38 = vadd.f32 %v4229_v0, %v4207_v59  ;;  %v4298_v30 = vpop.f32.mrf.mxu0 }
 0x858   : > { %v4249_v18 = vpop.f32.mrf.mxu2  ;;  %v4321_v28 = vpop.f32.mrf.mxu1 }
 0x859   : > { %v4250_v12 = vadd.f32 %v4249_v18, %v4227_v8  ;;  %v4272_v32 = vpop.f32.mrf.mxu3 }
 0x85b   : > { %v4273_v33 = vadd.f32 %v4272_v32, %v4250_v12 }
 0x85d   : > { %v4296_v53 = vadd.f32 %v4295_v16, %v4273_v33 }
 0x85f   : > { %v4319_v35 = vadd.f32 %v4318_v21, %v4296_v53 }
 0x860   : > { %v4252_v22 = vpop.f32.mrf.mxu2 }
 0x861   : > { %v4324_v26 = vadd.f32 %v4319_v35, %v6756_v48  ;;  %v4253_v63 = vadd.f32 %v4252_v22, %v4230_v38  ;;  %v4275_v45 = vpop.f32.mrf.mxu3 }
 0x863   : > { %4326 = vst [vmem:[%s447_s19] sm:$0xff] %v4324_v26  ;;  %v4276_v42 = vadd.f32 %v4275_v45, %v4253_v63 }
 0x865   : > { %v4299_v25 = vadd.f32 %v4298_v30, %v4276_v42 }
 0x867   : > { %v4322_v6 = vadd.f32 %v4321_v28, %v4299_v25 }
 0x869   : > { %v4325_v48 = vadd.f32 %v4322_v6, %v6760_v51 }
 0x86b   : > { %4327 = vst [vmem:[%s447_s19 + $0x8] sm:$0xff] %v4325_v48 }
 0x86c   : > { %5078 = shalt.err (!%p5075_p9)
}
 0x86d   : > { %s5149_s25 = smov 128   ;;  %s5150_s24 = smov 8  }
 0x86e   : > { %4576 = dma.vmem_to_hbm [thread:$0]  (%p5304_p4), %s4342_s5, 256, %s4344_s21, %s4329_s16, %s5149_s25, %s5149_s25, %s5150_s24  }
 0x86f PF: > { %s4358_s15 = sand.u32 1, %s5117_s30   ;;  %p6992_p10 = scmp.ge.s32.totalorder %s5129_s12, 2 }
 0x870   : > { %s4359_s19 = scalar_lea.sflag [#allocation4], %s4358_s15 }
 0x871   : > { %p4602_p13 = pnand %p6992_p10, %p5308_p6 }
 0x873   : > { %p4603_p11 = pneg %p4602_p13 }
 0x875   : > { %5112 = dma.done.wait (%p4603_p11), %s4359_s19, 256  }
 0x876   : > { %5114 = vsyncadd (%p4603_p11), %s4359_s19, 4294967040  ;;  %p25_p0 = scmp.ge.s32.totalorder %s5278_s27, 4   ;;  %s6993_s30 = smov %s5121_s10 }
 0x877   : > { %s6994_s10 = smov %s5125_s11  ;;  %s6995_s11 = smov %s5289_s1 }
 0x878   : > { %s6996_s12 = smov %s5278_s27  ;;  %27 = sbr.rel (!%p25_p0) target bundleno = 13 (0xd), region = 125 }
 0x87d   :  { %4365 = vsyncpa [#allocation3], 1 }
 0x87e   :  { %4367 = vsyncpa [#allocation3 + $0x1], 1 }
 0x87f   :  { %4368 = vsyncpa [#allocation6], 1 }
 0x880   :  { %4369 = vsyncpa [#allocation9], 1 }
 0x881   :  { %4370 = vsyncpa [#allocation12], 1 }
 0x882   :  { %4371 = vsyncpa [#allocation4], 1 }
 0x883   :  { %4373 = vsyncpa [#allocation4 + $0x1], 1 }

</bundles_post_ra>
